<compile_context>
chip_gen: v5e
topology: v5e:2x2
jax: 0.10.0
libtpu: 0.0.40
codegen_flags: <defaults>
</compile_context>

<pallas_src>
import jax
import jax.numpy as jnp
from jax.experimental import pallas as pl
from jax.experimental.pallas import tpu as pltpu

# ------------------- scaled-down ViT hyper-parameters ------------------------
IMG = 16                      # image height/width
CHANS = 3                     # input channels
PATCH = 4                     # 4x4 patches -> 16 patches
EMBED = 32                    # feature_dim (vit_base would be 768)
HEADS = 4
HEAD_DIM = EMBED // HEADS
DEPTH = 2                     # transformer blocks (vit_base would be 12)
MLP_DIM = 4 * EMBED
NUM_PATCHES = (IMG // PATCH) ** 2
PATCH_DIM = CHANS * PATCH * PATCH
TOKENS = NUM_PATCHES + 1      # +1 CLS token = 17
T_PAD = ((TOKENS + 7) // 8) * 8        # 24 rows: sublane-aligned token count
DEC_HID = EMBED // 2          # decoder hidden = feature_dim // 2

# TODO(synk): pretrained timm 'vit_base_patch16_224' weights cannot be loaded
# here; the encoder uses deterministic random initialization at reduced size.

_PARAM_ORDER = (
    "patch_w",
    "ln1_g", "ln1_b",
    "wq", "wk", "wv", "bq", "bk", "bv",
    "proj_w", "proj_b",
    "ln2_g", "ln2_b",
    "fc1_w", "fc1_b", "fc2_w", "fc2_b",
    "lnf_g", "lnf_b",
    "dec_w1", "dec_b1", "dec_w2", "dec_b2",
)


# ------------------------------ fused kernel ---------------------------------
def _model_kernel(
    patches_ref, tok_init_ref,
    patch_w_ref,
    ln1_g_ref, ln1_b_ref,
    wq_ref, wk_ref, wv_ref, bq_ref, bk_ref, bv_ref,
    proj_w_ref, proj_b_ref,
    ln2_g_ref, ln2_b_ref,
    fc1_w_ref, fc1_b_ref, fc2_w_ref, fc2_b_ref,
    lnf_g_ref, lnf_b_ref,
    dec_w1_ref, dec_b1_ref, dec_w2_ref, dec_b2_ref,
    shared_ref, recon_ref,
):
    f32 = jnp.float32
    bf16 = jnp.bfloat16

    def mm(a, b):  # [m,k] @ [k,n] on the MXU, bf16 inputs / f32 accumulation
        return jnp.dot(a.astype(bf16), b.astype(bf16),
                       preferred_element_type=f32)

    def mm_nt(a, b):  # [m,d] @ [n,d]^T -> [m,n] (contract last dims of both)
        return jax.lax.dot_general(
            a.astype(bf16), b.astype(bf16),
            (((1,), (1,)), ((), ())), preferred_element_type=f32)

    def ln(x, g, b, eps=1e-6):  # row-wise LayerNorm in f32
        mu = jnp.mean(x, axis=-1, keepdims=True)
        var = jnp.mean(jnp.square(x - mu), axis=-1, keepdims=True)
        return (x - mu) * jax.lax.rsqrt(var + eps) * g + b

    # --- patch embedding; CLS / pos / patch-bias are pre-folded in tok_init ---
    # patches_ref: [T_PAD, PATCH_DIM] with zero rows at the CLS slot and pads.
    tok = mm(patches_ref[...], patch_w_ref[...]) + tok_init_ref[...]   # [T_PAD, E]

    # pad tokens (rows >= TOKENS) must never contribute as attention keys
    kmask = jax.lax.broadcasted_iota(jnp.int32, (T_PAD, T_PAD), 1) < TOKENS
    neg = f32(-1e30)
    scale = f32(1.0 / (HEAD_DIM ** 0.5))

    for d in range(DEPTH):                # static, unrolled
        # ---------- attention sub-block (pre-norm), residual fused ----------
        xn = ln(tok, ln1_g_ref[d], ln1_b_ref[d])
        attn = jnp.zeros((T_PAD, EMBED), f32)
        for h in range(HEADS):            # per-head weights: no reshapes/transposes
            q = mm(xn, wq_ref[d, h]) + bq_ref[d, h]          # [T_PAD, hd]
            k = mm(xn, wk_ref[d, h]) + bk_ref[d, h]
            v = mm(xn, wv_ref[d, h]) + bv_ref[d, h]
            s = mm_nt(q, k) * scale                          # [T_PAD, T_PAD]
            s = jnp.where(kmask, s, neg)
            s = s - jnp.max(s, axis=-1, keepdims=True)
            p = jnp.exp(s)
            p = p * pl.reciprocal(jnp.sum(p, axis=-1, keepdims=True), approx=True)
            o = mm(p, v)                                     # [T_PAD, hd]
            attn = attn + mm(o, proj_w_ref[d, h])            # [T_PAD, E]
        tok = tok + attn + proj_b_ref[d]

        # ---------- MLP sub-block (pre-norm), residual fused ----------
        yn = ln(tok, ln2_g_ref[d], ln2_b_ref[d])
        hid = mm(yn, fc1_w_ref[d]) + fc1_b_ref[d]            # [T_PAD, 128] lane-dense
        # TODO(synk): timm/PyTorch ViT uses exact (erf) GELU; tanh approximation here.
        hid = jax.nn.gelu(hid, approximate=True)
        tok = tok + mm(hid, fc2_w_ref[d]) + fc2_b_ref[d]

    # ---------- final LayerNorm + CLS pooling (timm ViT, head=Identity) ----------
    feat = ln(tok[0:1, :], lnf_g_ref[...], lnf_b_ref[...])   # [1, E]
    shared_ref[...] = feat.astype(shared_ref.dtype)

    # ---------- decoder: Linear(E, E//2) -> ReLU -> Linear(E//2, E) ----------
    hdec = jnp.maximum(mm(feat, dec_w1_ref[...]) + dec_b1_ref[...], 0.0)
    recon = mm(hdec, dec_w2_ref[...]) + dec_b2_ref[...]
    recon_ref[...] = recon.astype(recon_ref.dtype)


# ------------------------- wrapper / pallas_call ------------------------------
def _replicated_spec(shape):
    nd = len(shape)
    return pl.BlockSpec(tuple(shape), lambda b, _nd=nd: (0,) * _nd)


def _patchify(x):
    """NCHW image -> [B, T_PAD, PATCH_DIM] with zero rows at CLS slot & tail pads."""
    B = x.shape[0]
    xg = x.reshape(B, CHANS, IMG // PATCH, PATCH, IMG // PATCH, PATCH)
    xg = xg.transpose(0, 2, 4, 1, 3, 5)
    patches = xg.reshape(B, NUM_PATCHES, PATCH_DIM)
    return jnp.pad(patches, ((0, 0), (1, T_PAD - 1 - NUM_PATCHES), (0, 0)))


def _cost_estimate(batch, weight_bytes):
    blk_flops = (
        2 * T_PAD * EMBED * 3 * EMBED                # q/k/v projections
        + 2 * 2 * HEADS * T_PAD * T_PAD * HEAD_DIM   # q@k^T and p@v
        + 2 * T_PAD * HEAD_DIM * EMBED * HEADS       # output projection
        + 2 * 2 * T_PAD * EMBED * MLP_DIM            # mlp fc1 + fc2
    )
    img_flops = (2 * T_PAD * PATCH_DIM * EMBED + DEPTH * blk_flops
                 + 2 * (EMBED * DEC_HID + DEC_HID * EMBED))
    trans = DEPTH * (HEADS * T_PAD * T_PAD + T_PAD * MLP_DIM)
    io_bytes = 4 * (T_PAD * PATCH_DIM + 2 * EMBED)
    return pl.CostEstimate(flops=int(batch * img_flops),
                           transcendentals=int(batch * trans),
                           bytes_accessed=int(batch * io_bytes + weight_bytes))


@jax.jit
def self_supervised_forward(x, p):
    B = x.shape[0]
    patches = _patchify(x)                                   # [B, T_PAD, PATCH_DIM]

    # Token init slab: row 0 = cls + pos[0]; rows 1..16 = pos + patch bias; pads = 0.
    tok_init = jnp.concatenate(
        [p["cls"] + p["pos"][0:1],
         p["pos"][1:TOKENS] + p["patch_b"],
         jnp.zeros((T_PAD - TOKENS, EMBED), jnp.float32)], axis=0)   # [T_PAD, E]

    weights = [p[name] for name in _PARAM_ORDER]
    weight_bytes = sum(int(w.size) * 4 for w in weights) + int(tok_init.size) * 4

    in_specs = [pl.BlockSpec((None, T_PAD, PATCH_DIM), lambda b: (b, 0, 0)),
                _replicated_spec(tok_init.shape)]
    in_specs += [_replicated_spec(tuple(w.shape)) for w in weights]
    out_spec = pl.BlockSpec((None, 1, EMBED), lambda b: (b, 0, 0))

    shared, recon = pl.pallas_call(
        _model_kernel,
        grid=(B,),
        in_specs=in_specs,
        out_specs=[out_spec, out_spec],
        out_shape=[jax.ShapeDtypeStruct((B, 1, EMBED), jnp.float32),
                   jax.ShapeDtypeStruct((B, 1, EMBED), jnp.float32)],
        compiler_params=pltpu.CompilerParams(
            dimension_semantics=("parallel",)),      # both TCs on v7x; no-op v5e/v6e
        cost_estimate=_cost_estimate(B, weight_bytes),
    )(patches, tok_init, *weights)

    return shared[:, 0, :], recon[:, 0, :]


# ------------------------- parameter initialization --------------------------
def init_params(key):
    ks = jax.random.split(key, 12)

    def nrm(k, shape, s=0.02):
        return (s * jax.random.normal(k, shape)).astype(jnp.float32)

    return {
        "patch_w": nrm(ks[0], (PATCH_DIM, EMBED)),
        "patch_b": jnp.zeros((1, EMBED), jnp.float32),
        "cls":     nrm(ks[1], (1, EMBED)),
        "pos":     nrm(ks[2], (TOKENS, EMBED)),
        "ln1_g":   jnp.ones((DEPTH, 1, EMBED), jnp.float32),
        "ln1_b":   jnp.zeros((DEPTH, 1, EMBED), jnp.float32),
        # qkv Linear(E, 3E) stored pre-split per head: [DEPTH, HEADS, E, hd]
        "wq":      nrm(ks[3], (DEPTH, HEADS, EMBED, HEAD_DIM)),
        "wk":      nrm(ks[4], (DEPTH, HEADS, EMBED, HEAD_DIM)),
        "wv":      nrm(ks[5], (DEPTH, HEADS, EMBED, HEAD_DIM)),
        "bq":      jnp.zeros((DEPTH, HEADS, 1, HEAD_DIM), jnp.float32),
        "bk":      jnp.zeros((DEPTH, HEADS, 1, HEAD_DIM), jnp.float32),
        "bv":      jnp.zeros((DEPTH, HEADS, 1, HEAD_DIM), jnp.float32),
        # output projection Linear(E, E) stored per head: [DEPTH, HEADS, hd, E]
        "proj_w":  nrm(ks[6], (DEPTH, HEADS, HEAD_DIM, EMBED)),
        "proj_b":  jnp.zeros((DEPTH, 1, EMBED), jnp.float32),
        "ln2_g":   jnp.ones((DEPTH, 1, EMBED), jnp.float32),
        "ln2_b":   jnp.zeros((DEPTH, 1, EMBED), jnp.float32),
        "fc1_w":   nrm(ks[7], (DEPTH, EMBED, MLP_DIM)),
        "fc1_b":   jnp.zeros((DEPTH, 1, MLP_DIM), jnp.float32),
        "fc2_w":   nrm(ks[8], (DEPTH, MLP_DIM, EMBED)),
        "fc2_b":   jnp.zeros((DEPTH, 1, EMBED), jnp.float32),
        "lnf_g":   jnp.ones((1, EMBED), jnp.float32),
        "lnf_b":   jnp.zeros((1, EMBED), jnp.float32),
        "dec_w1":  nrm(ks[9], (EMBED, DEC_HID)),
        "dec_b1":  jnp.zeros((1, DEC_HID), jnp.float32),
        "dec_w2":  nrm(ks[10], (DEC_HID, EMBED)),
        "dec_b2":  jnp.zeros((1, EMBED), jnp.float32),
    }


# ---------------------------------- main --------------------------------------
if __name__ == "__main__":
    key = jax.random.PRNGKey(0)
    xkey, pkey = jax.random.split(key)
    x = jax.random.normal(xkey, (2, CHANS, IMG, IMG), dtype=jnp.float32)  # NCHW
    params = init_params(pkey)

    shared, recon = self_supervised_forward(x, params)
    jax.block_until_ready((shared, recon))

    assert shared.shape == (2, EMBED) and recon.shape == (2, EMBED)
    assert bool(jnp.all(jnp.isfinite(shared))) and bool(jnp.all(jnp.isfinite(recon)))
    print("KERNEL_OK")
</pallas_src>

<mosaic_0001>
module attributes {stable_mosaic.version = 11 : i64} {
  func.func @_model_kernel(%arg0: i32, %arg1: memref<1x24x48xf32, #tpu.memory_space<vmem>>, %arg2: memref<24x32xf32, #tpu.memory_space<vmem>>, %arg3: memref<48x32xf32, #tpu.memory_space<vmem>>, %arg4: memref<2x1x32xf32, #tpu.memory_space<vmem>>, %arg5: memref<2x1x32xf32, #tpu.memory_space<vmem>>, %arg6: memref<2x4x32x8xf32, #tpu.memory_space<vmem>>, %arg7: memref<2x4x32x8xf32, #tpu.memory_space<vmem>>, %arg8: memref<2x4x32x8xf32, #tpu.memory_space<vmem>>, %arg9: memref<2x4x1x8xf32, #tpu.memory_space<vmem>>, %arg10: memref<2x4x1x8xf32, #tpu.memory_space<vmem>>, %arg11: memref<2x4x1x8xf32, #tpu.memory_space<vmem>>, %arg12: memref<2x4x8x32xf32, #tpu.memory_space<vmem>>, %arg13: memref<2x1x32xf32, #tpu.memory_space<vmem>>, %arg14: memref<2x1x32xf32, #tpu.memory_space<vmem>>, %arg15: memref<2x1x32xf32, #tpu.memory_space<vmem>>, %arg16: memref<2x32x128xf32, #tpu.memory_space<vmem>>, %arg17: memref<2x1x128xf32, #tpu.memory_space<vmem>>, %arg18: memref<2x128x32xf32, #tpu.memory_space<vmem>>, %arg19: memref<2x1x32xf32, #tpu.memory_space<vmem>>, %arg20: memref<1x32xf32, #tpu.memory_space<vmem>>, %arg21: memref<1x32xf32, #tpu.memory_space<vmem>>, %arg22: memref<32x16xf32, #tpu.memory_space<vmem>>, %arg23: memref<1x16xf32, #tpu.memory_space<vmem>>, %arg24: memref<16x32xf32, #tpu.memory_space<vmem>>, %arg25: memref<1x32xf32, #tpu.memory_space<vmem>>, %arg26: memref<1x1x32xf32, #tpu.memory_space<vmem>>, %arg27: memref<1x1x32xf32, #tpu.memory_space<vmem>>) attributes {dimension_semantics = [#tpu.dimension_semantics<parallel>], iteration_bounds = array<i64: 2>, scalar_prefetch = 0 : i64, scratch_operands = 0 : i64, tpu.core_type = #tpu.core_type<tc>, window_params = [{transform_indices = @transform_0, window_bounds = array<i64: 1, 24, 48>}, {pipeline_mode = #tpu.pipeline_mode<synchronous>, transform_indices = @transform_1, window_bounds = array<i64: 24, 32>}, {pipeline_mode = #tpu.pipeline_mode<synchronous>, transform_indices = @transform_2, window_bounds = array<i64: 48, 32>}, {pipeline_mode = #tpu.pipeline_mode<synchronous>, transform_indices = @transform_3, window_bounds = array<i64: 2, 1, 32>}, {pipeline_mode = #tpu.pipeline_mode<synchronous>, transform_indices = @transform_4, window_bounds = array<i64: 2, 1, 32>}, {pipeline_mode = #tpu.pipeline_mode<synchronous>, transform_indices = @transform_5, window_bounds = array<i64: 2, 4, 32, 8>}, {pipeline_mode = #tpu.pipeline_mode<synchronous>, transform_indices = @transform_6, window_bounds = array<i64: 2, 4, 32, 8>}, {pipeline_mode = #tpu.pipeline_mode<synchronous>, transform_indices = @transform_7, window_bounds = array<i64: 2, 4, 32, 8>}, {pipeline_mode = #tpu.pipeline_mode<synchronous>, transform_indices = @transform_8, window_bounds = array<i64: 2, 4, 1, 8>}, {pipeline_mode = #tpu.pipeline_mode<synchronous>, transform_indices = @transform_9, window_bounds = array<i64: 2, 4, 1, 8>}, {pipeline_mode = #tpu.pipeline_mode<synchronous>, transform_indices = @transform_10, window_bounds = array<i64: 2, 4, 1, 8>}, {pipeline_mode = #tpu.pipeline_mode<synchronous>, transform_indices = @transform_11, window_bounds = array<i64: 2, 4, 8, 32>}, {pipeline_mode = #tpu.pipeline_mode<synchronous>, transform_indices = @transform_12, window_bounds = array<i64: 2, 1, 32>}, {pipeline_mode = #tpu.pipeline_mode<synchronous>, transform_indices = @transform_13, window_bounds = array<i64: 2, 1, 32>}, {pipeline_mode = #tpu.pipeline_mode<synchronous>, transform_indices = @transform_14, window_bounds = array<i64: 2, 1, 32>}, {pipeline_mode = #tpu.pipeline_mode<synchronous>, transform_indices = @transform_15, window_bounds = array<i64: 2, 32, 128>}, {pipeline_mode = #tpu.pipeline_mode<synchronous>, transform_indices = @transform_16, window_bounds = array<i64: 2, 1, 128>}, {pipeline_mode = #tpu.pipeline_mode<synchronous>, transform_indices = @transform_17, window_bounds = array<i64: 2, 128, 32>}, {pipeline_mode = #tpu.pipeline_mode<synchronous>, transform_indices = @transform_18, window_bounds = array<i64: 2, 1, 32>}, {pipeline_mode = #tpu.pipeline_mode<synchronous>, transform_indices = @transform_19, window_bounds = array<i64: 1, 32>}, {pipeline_mode = #tpu.pipeline_mode<synchronous>, transform_indices = @transform_20, window_bounds = array<i64: 1, 32>}, {pipeline_mode = #tpu.pipeline_mode<synchronous>, transform_indices = @transform_21, window_bounds = array<i64: 32, 16>}, {pipeline_mode = #tpu.pipeline_mode<synchronous>, transform_indices = @transform_22, window_bounds = array<i64: 1, 16>}, {pipeline_mode = #tpu.pipeline_mode<synchronous>, transform_indices = @transform_23, window_bounds = array<i64: 16, 32>}, {pipeline_mode = #tpu.pipeline_mode<synchronous>, transform_indices = @transform_24, window_bounds = array<i64: 1, 32>}, {transform_indices = @transform_25, window_bounds = array<i64: 1, 1, 32>}, {transform_indices = @transform_26, window_bounds = array<i64: 1, 1, 32>}]} {
    %c0 = arith.constant 0 : index
    %c0_0 = arith.constant 0 : index
    %c0_1 = arith.constant 0 : index
    %0 = vector.load %arg1[%c0, %c0_0, %c0_1] : memref<1x24x48xf32, #tpu.memory_space<vmem>>, vector<1x24x48xf32>
    %1 = vector.shape_cast %0 : vector<1x24x48xf32> to vector<24x48xf32>
    %c0_2 = arith.constant 0 : index
    %c0_3 = arith.constant 0 : index
    %2 = vector.load %arg3[%c0_2, %c0_3] : memref<48x32xf32, #tpu.memory_space<vmem>>, vector<48x32xf32>
    %3 = arith.truncf %1 : vector<24x48xf32> to vector<24x48xbf16>
    %4 = arith.truncf %2 : vector<48x32xf32> to vector<48x32xbf16>
    %cst = arith.constant dense<0.000000e+00> : vector<24x32xf32>
    %5 = tpu.matmul %3, %4, %cst {dimension_numbers = #tpu.dot_dimension_numbers<[1], [0], [0], [1], [0, 0, 1, 1], [], []>} : vector<24x48xbf16>, vector<48x32xbf16>, vector<24x32xf32> -> vector<24x32xf32>
    %c0_4 = arith.constant 0 : index
    %c0_5 = arith.constant 0 : index
    %6 = vector.load %arg2[%c0_4, %c0_5] : memref<24x32xf32, #tpu.memory_space<vmem>>, vector<24x32xf32>
    %7 = arith.addf %5, %6 : vector<24x32xf32>
    %8 = tpu.iota {dimensions = array<i32: 1>} : vector<24x24xi32>
    %c17_i32 = arith.constant 17 : i32
    %9 = vector.broadcast %c17_i32 : i32 to vector<24x24xi32>
    %10 = arith.cmpi slt, %8, %9 : vector<24x24xi32>
    %c0_6 = arith.constant 0 : index
    %c0_7 = arith.constant 0 : index
    %c0_8 = arith.constant 0 : index
    %11 = vector.load %arg4[%c0_6, %c0_7, %c0_8] : memref<2x1x32xf32, #tpu.memory_space<vmem>>, vector<1x1x32xf32>
    %12 = vector.shape_cast %11 : vector<1x1x32xf32> to vector<1x32xf32>
    %c0_9 = arith.constant 0 : index
    %c0_10 = arith.constant 0 : index
    %c0_11 = arith.constant 0 : index
    %13 = vector.load %arg5[%c0_9, %c0_10, %c0_11] : memref<2x1x32xf32, #tpu.memory_space<vmem>>, vector<1x1x32xf32>
    %14 = vector.shape_cast %13 : vector<1x1x32xf32> to vector<1x32xf32>
    %cst_12 = arith.constant dense<0.000000e+00> : vector<24xf32>
    %15 = vector.multi_reduction <add>, %7, %cst_12 [1] : vector<24x32xf32> to vector<24xf32>
    %16 = vector.shape_cast %15 : vector<24xf32> to vector<24x1xf32>
    %cst_13 = arith.constant 3.200000e+01 : f32
    %17 = vector.broadcast %cst_13 : f32 to vector<24x1xf32>
    %18 = arith.divf %16, %17 : vector<24x1xf32>
    %19 = vector.broadcast %18 : vector<24x1xf32> to vector<24x32xf32>
    %20 = arith.subf %7, %19 : vector<24x32xf32>
    %21 = arith.mulf %20, %20 : vector<24x32xf32>
    %cst_14 = arith.constant dense<0.000000e+00> : vector<24xf32>
    %22 = vector.multi_reduction <add>, %21, %cst_14 [1] : vector<24x32xf32> to vector<24xf32>
    %23 = vector.shape_cast %22 : vector<24xf32> to vector<24x1xf32>
    %cst_15 = arith.constant 3.200000e+01 : f32
    %24 = vector.broadcast %cst_15 : f32 to vector<24x1xf32>
    %25 = arith.divf %23, %24 : vector<24x1xf32>
    %26 = vector.broadcast %18 : vector<24x1xf32> to vector<24x32xf32>
    %27 = arith.subf %7, %26 : vector<24x32xf32>
    %cst_16 = arith.constant 9.99999997E-7 : f32
    %28 = vector.broadcast %cst_16 : f32 to vector<24x1xf32>
    %29 = arith.addf %25, %28 : vector<24x1xf32>
    %30 = math.rsqrt %29 : vector<24x1xf32>
    %31 = vector.broadcast %30 : vector<24x1xf32> to vector<24x32xf32>
    %32 = arith.mulf %27, %31 : vector<24x32xf32>
    %33 = vector.broadcast %12 : vector<1x32xf32> to vector<24x32xf32>
    %34 = arith.mulf %32, %33 : vector<24x32xf32>
    %35 = vector.broadcast %14 : vector<1x32xf32> to vector<24x32xf32>
    %36 = arith.addf %34, %35 : vector<24x32xf32>
    %cst_17 = arith.constant 0.000000e+00 : f32
    %37 = vector.broadcast %cst_17 : f32 to vector<24x32xf32>
    %c0_18 = arith.constant 0 : index
    %c0_19 = arith.constant 0 : index
    %c0_20 = arith.constant 0 : index
    %c0_21 = arith.constant 0 : index
    %38 = vector.load %arg6[%c0_18, %c0_19, %c0_20, %c0_21] : memref<2x4x32x8xf32, #tpu.memory_space<vmem>>, vector<1x1x32x8xf32>
    %39 = vector.shape_cast %38 : vector<1x1x32x8xf32> to vector<32x8xf32>
    %40 = arith.truncf %36 : vector<24x32xf32> to vector<24x32xbf16>
    %41 = arith.truncf %39 : vector<32x8xf32> to vector<32x8xbf16>
    %cst_22 = arith.constant dense<0.000000e+00> : vector<24x8xf32>
    %42 = tpu.matmul %40, %41, %cst_22 {dimension_numbers = #tpu.dot_dimension_numbers<[1], [0], [0], [1], [0, 0, 1, 1], [], []>} : vector<24x32xbf16>, vector<32x8xbf16>, vector<24x8xf32> -> vector<24x8xf32>
    %c0_23 = arith.constant 0 : index
    %c0_24 = arith.constant 0 : index
    %c0_25 = arith.constant 0 : index
    %c0_26 = arith.constant 0 : index
    %43 = vector.load %arg9[%c0_23, %c0_24, %c0_25, %c0_26] : memref<2x4x1x8xf32, #tpu.memory_space<vmem>>, vector<1x1x1x8xf32>
    %44 = vector.shape_cast %43 : vector<1x1x1x8xf32> to vector<1x8xf32>
    %45 = vector.broadcast %44 : vector<1x8xf32> to vector<24x8xf32>
    %46 = arith.addf %42, %45 : vector<24x8xf32>
    %c0_27 = arith.constant 0 : index
    %c0_28 = arith.constant 0 : index
    %c0_29 = arith.constant 0 : index
    %c0_30 = arith.constant 0 : index
    %47 = vector.load %arg7[%c0_27, %c0_28, %c0_29, %c0_30] : memref<2x4x32x8xf32, #tpu.memory_space<vmem>>, vector<1x1x32x8xf32>
    %48 = vector.shape_cast %47 : vector<1x1x32x8xf32> to vector<32x8xf32>
    %49 = arith.truncf %36 : vector<24x32xf32> to vector<24x32xbf16>
    %50 = arith.truncf %48 : vector<32x8xf32> to vector<32x8xbf16>
    %cst_31 = arith.constant dense<0.000000e+00> : vector<24x8xf32>
    %51 = tpu.matmul %49, %50, %cst_31 {dimension_numbers = #tpu.dot_dimension_numbers<[1], [0], [0], [1], [0, 0, 1, 1], [], []>} : vector<24x32xbf16>, vector<32x8xbf16>, vector<24x8xf32> -> vector<24x8xf32>
    %c0_32 = arith.constant 0 : index
    %c0_33 = arith.constant 0 : index
    %c0_34 = arith.constant 0 : index
    %c0_35 = arith.constant 0 : index
    %52 = vector.load %arg10[%c0_32, %c0_33, %c0_34, %c0_35] : memref<2x4x1x8xf32, #tpu.memory_space<vmem>>, vector<1x1x1x8xf32>
    %53 = vector.shape_cast %52 : vector<1x1x1x8xf32> to vector<1x8xf32>
    %54 = vector.broadcast %53 : vector<1x8xf32> to vector<24x8xf32>
    %55 = arith.addf %51, %54 : vector<24x8xf32>
    %c0_36 = arith.constant 0 : index
    %c0_37 = arith.constant 0 : index
    %c0_38 = arith.constant 0 : index
    %c0_39 = arith.constant 0 : index
    %56 = vector.load %arg8[%c0_36, %c0_37, %c0_38, %c0_39] : memref<2x4x32x8xf32, #tpu.memory_space<vmem>>, vector<1x1x32x8xf32>
    %57 = vector.shape_cast %56 : vector<1x1x32x8xf32> to vector<32x8xf32>
    %58 = arith.truncf %36 : vector<24x32xf32> to vector<24x32xbf16>
    %59 = arith.truncf %57 : vector<32x8xf32> to vector<32x8xbf16>
    %cst_40 = arith.constant dense<0.000000e+00> : vector<24x8xf32>
    %60 = tpu.matmul %58, %59, %cst_40 {dimension_numbers = #tpu.dot_dimension_numbers<[1], [0], [0], [1], [0, 0, 1, 1], [], []>} : vector<24x32xbf16>, vector<32x8xbf16>, vector<24x8xf32> -> vector<24x8xf32>
    %c0_41 = arith.constant 0 : index
    %c0_42 = arith.constant 0 : index
    %c0_43 = arith.constant 0 : index
    %c0_44 = arith.constant 0 : index
    %61 = vector.load %arg11[%c0_41, %c0_42, %c0_43, %c0_44] : memref<2x4x1x8xf32, #tpu.memory_space<vmem>>, vector<1x1x1x8xf32>
    %62 = vector.shape_cast %61 : vector<1x1x1x8xf32> to vector<1x8xf32>
    %63 = vector.broadcast %62 : vector<1x8xf32> to vector<24x8xf32>
    %64 = arith.addf %60, %63 : vector<24x8xf32>
    %65 = arith.truncf %46 : vector<24x8xf32> to vector<24x8xbf16>
    %66 = arith.truncf %55 : vector<24x8xf32> to vector<24x8xbf16>
    %cst_45 = arith.constant dense<0.000000e+00> : vector<24x24xf32>
    %67 = tpu.matmul %65, %66, %cst_45 {dimension_numbers = #tpu.dot_dimension_numbers<[1], [1], [0], [0], [0, 0, 1, 0], [], []>} : vector<24x8xbf16>, vector<24x8xbf16>, vector<24x24xf32> -> vector<24x24xf32>
    %cst_46 = arith.constant 0.353553385 : f32
    %68 = vector.broadcast %cst_46 : f32 to vector<24x24xf32>
    %69 = arith.mulf %67, %68 : vector<24x24xf32>
    %cst_47 = arith.constant -1.000000e+30 : f32
    %70 = vector.broadcast %cst_47 : f32 to vector<24x24xf32>
    %71 = arith.select %10, %69, %70 : vector<24x24xi1>, vector<24x24xf32>
    %cst_48 = arith.constant dense<0xFF800000> : vector<24xf32>
    %72 = vector.multi_reduction <maximumf>, %71, %cst_48 [1] : vector<24x24xf32> to vector<24xf32>
    %73 = vector.shape_cast %72 : vector<24xf32> to vector<24x1xf32>
    %74 = vector.broadcast %73 : vector<24x1xf32> to vector<24x24xf32>
    %75 = arith.subf %71, %74 : vector<24x24xf32>
    %76 = math.exp %75 : vector<24x24xf32>
    %cst_49 = arith.constant dense<0.000000e+00> : vector<24xf32>
    %77 = vector.multi_reduction <add>, %76, %cst_49 [1] : vector<24x24xf32> to vector<24xf32>
    %78 = vector.shape_cast %77 : vector<24xf32> to vector<24x1xf32>
    %79 = tpu.reciprocal %78 {approx = true} : vector<24x1xf32> -> vector<24x1xf32>
    %80 = vector.broadcast %79 : vector<24x1xf32> to vector<24x24xf32>
    %81 = arith.mulf %76, %80 : vector<24x24xf32>
    %82 = arith.truncf %81 : vector<24x24xf32> to vector<24x24xbf16>
    %83 = arith.truncf %64 : vector<24x8xf32> to vector<24x8xbf16>
    %cst_50 = arith.constant dense<0.000000e+00> : vector<24x8xf32>
    %84 = tpu.matmul %82, %83, %cst_50 {dimension_numbers = #tpu.dot_dimension_numbers<[1], [0], [0], [1], [0, 0, 1, 1], [], []>} : vector<24x24xbf16>, vector<24x8xbf16>, vector<24x8xf32> -> vector<24x8xf32>
    %c0_51 = arith.constant 0 : index
    %c0_52 = arith.constant 0 : index
    %c0_53 = arith.constant 0 : index
    %c0_54 = arith.constant 0 : index
    %85 = vector.load %arg12[%c0_51, %c0_52, %c0_53, %c0_54] : memref<2x4x8x32xf32, #tpu.memory_space<vmem>>, vector<1x1x8x32xf32>
    %86 = vector.shape_cast %85 : vector<1x1x8x32xf32> to vector<8x32xf32>
    %87 = arith.truncf %84 : vector<24x8xf32> to vector<24x8xbf16>
    %88 = arith.truncf %86 : vector<8x32xf32> to vector<8x32xbf16>
    %cst_55 = arith.constant dense<0.000000e+00> : vector<24x32xf32>
    %89 = tpu.matmul %87, %88, %cst_55 {dimension_numbers = #tpu.dot_dimension_numbers<[1], [0], [0], [1], [0, 0, 1, 1], [], []>} : vector<24x8xbf16>, vector<8x32xbf16>, vector<24x32xf32> -> vector<24x32xf32>
    %90 = arith.addf %37, %89 : vector<24x32xf32>
    %c0_56 = arith.constant 0 : index
    %c1 = arith.constant 1 : index
    %c0_57 = arith.constant 0 : index
    %c0_58 = arith.constant 0 : index
    %91 = vector.load %arg6[%c0_56, %c1, %c0_57, %c0_58] : memref<2x4x32x8xf32, #tpu.memory_space<vmem>>, vector<1x1x32x8xf32>
    %92 = vector.shape_cast %91 : vector<1x1x32x8xf32> to vector<32x8xf32>
    %93 = arith.truncf %36 : vector<24x32xf32> to vector<24x32xbf16>
    %94 = arith.truncf %92 : vector<32x8xf32> to vector<32x8xbf16>
    %cst_59 = arith.constant dense<0.000000e+00> : vector<24x8xf32>
    %95 = tpu.matmul %93, %94, %cst_59 {dimension_numbers = #tpu.dot_dimension_numbers<[1], [0], [0], [1], [0, 0, 1, 1], [], []>} : vector<24x32xbf16>, vector<32x8xbf16>, vector<24x8xf32> -> vector<24x8xf32>
    %c0_60 = arith.constant 0 : index
    %c1_61 = arith.constant 1 : index
    %c0_62 = arith.constant 0 : index
    %c0_63 = arith.constant 0 : index
    %96 = vector.load %arg9[%c0_60, %c1_61, %c0_62, %c0_63] : memref<2x4x1x8xf32, #tpu.memory_space<vmem>>, vector<1x1x1x8xf32>
    %97 = vector.shape_cast %96 : vector<1x1x1x8xf32> to vector<1x8xf32>
    %98 = vector.broadcast %97 : vector<1x8xf32> to vector<24x8xf32>
    %99 = arith.addf %95, %98 : vector<24x8xf32>
    %c0_64 = arith.constant 0 : index
    %c1_65 = arith.constant 1 : index
    %c0_66 = arith.constant 0 : index
    %c0_67 = arith.constant 0 : index
    %100 = vector.load %arg7[%c0_64, %c1_65, %c0_66, %c0_67] : memref<2x4x32x8xf32, #tpu.memory_space<vmem>>, vector<1x1x32x8xf32>
    %101 = vector.shape_cast %100 : vector<1x1x32x8xf32> to vector<32x8xf32>
    %102 = arith.truncf %36 : vector<24x32xf32> to vector<24x32xbf16>
    %103 = arith.truncf %101 : vector<32x8xf32> to vector<32x8xbf16>
    %cst_68 = arith.constant dense<0.000000e+00> : vector<24x8xf32>
    %104 = tpu.matmul %102, %103, %cst_68 {dimension_numbers = #tpu.dot_dimension_numbers<[1], [0], [0], [1], [0, 0, 1, 1], [], []>} : vector<24x32xbf16>, vector<32x8xbf16>, vector<24x8xf32> -> vector<24x8xf32>
    %c0_69 = arith.constant 0 : index
    %c1_70 = arith.constant 1 : index
    %c0_71 = arith.constant 0 : index
    %c0_72 = arith.constant 0 : index
    %105 = vector.load %arg10[%c0_69, %c1_70, %c0_71, %c0_72] : memref<2x4x1x8xf32, #tpu.memory_space<vmem>>, vector<1x1x1x8xf32>
    %106 = vector.shape_cast %105 : vector<1x1x1x8xf32> to vector<1x8xf32>
    %107 = vector.broadcast %106 : vector<1x8xf32> to vector<24x8xf32>
    %108 = arith.addf %104, %107 : vector<24x8xf32>
    %c0_73 = arith.constant 0 : index
    %c1_74 = arith.constant 1 : index
    %c0_75 = arith.constant 0 : index
    %c0_76 = arith.constant 0 : index
    %109 = vector.load %arg8[%c0_73, %c1_74, %c0_75, %c0_76] : memref<2x4x32x8xf32, #tpu.memory_space<vmem>>, vector<1x1x32x8xf32>
    %110 = vector.shape_cast %109 : vector<1x1x32x8xf32> to vector<32x8xf32>
    %111 = arith.truncf %36 : vector<24x32xf32> to vector<24x32xbf16>
    %112 = arith.truncf %110 : vector<32x8xf32> to vector<32x8xbf16>
    %cst_77 = arith.constant dense<0.000000e+00> : vector<24x8xf32>
    %113 = tpu.matmul %111, %112, %cst_77 {dimension_numbers = #tpu.dot_dimension_numbers<[1], [0], [0], [1], [0, 0, 1, 1], [], []>} : vector<24x32xbf16>, vector<32x8xbf16>, vector<24x8xf32> -> vector<24x8xf32>
    %c0_78 = arith.constant 0 : index
    %c1_79 = arith.constant 1 : index
    %c0_80 = arith.constant 0 : index
    %c0_81 = arith.constant 0 : index
    %114 = vector.load %arg11[%c0_78, %c1_79, %c0_80, %c0_81] : memref<2x4x1x8xf32, #tpu.memory_space<vmem>>, vector<1x1x1x8xf32>
    %115 = vector.shape_cast %114 : vector<1x1x1x8xf32> to vector<1x8xf32>
    %116 = vector.broadcast %115 : vector<1x8xf32> to vector<24x8xf32>
    %117 = arith.addf %113, %116 : vector<24x8xf32>
    %118 = arith.truncf %99 : vector<24x8xf32> to vector<24x8xbf16>
    %119 = arith.truncf %108 : vector<24x8xf32> to vector<24x8xbf16>
    %cst_82 = arith.constant dense<0.000000e+00> : vector<24x24xf32>
    %120 = tpu.matmul %118, %119, %cst_82 {dimension_numbers = #tpu.dot_dimension_numbers<[1], [1], [0], [0], [0, 0, 1, 0], [], []>} : vector<24x8xbf16>, vector<24x8xbf16>, vector<24x24xf32> -> vector<24x24xf32>
    %cst_83 = arith.constant 0.353553385 : f32
    %121 = vector.broadcast %cst_83 : f32 to vector<24x24xf32>
    %122 = arith.mulf %120, %121 : vector<24x24xf32>
    %cst_84 = arith.constant -1.000000e+30 : f32
    %123 = vector.broadcast %cst_84 : f32 to vector<24x24xf32>
    %124 = arith.select %10, %122, %123 : vector<24x24xi1>, vector<24x24xf32>
    %cst_85 = arith.constant dense<0xFF800000> : vector<24xf32>
    %125 = vector.multi_reduction <maximumf>, %124, %cst_85 [1] : vector<24x24xf32> to vector<24xf32>
    %126 = vector.shape_cast %125 : vector<24xf32> to vector<24x1xf32>
    %127 = vector.broadcast %126 : vector<24x1xf32> to vector<24x24xf32>
    %128 = arith.subf %124, %127 : vector<24x24xf32>
    %129 = math.exp %128 : vector<24x24xf32>
    %cst_86 = arith.constant dense<0.000000e+00> : vector<24xf32>
    %130 = vector.multi_reduction <add>, %129, %cst_86 [1] : vector<24x24xf32> to vector<24xf32>
    %131 = vector.shape_cast %130 : vector<24xf32> to vector<24x1xf32>
    %132 = tpu.reciprocal %131 {approx = true} : vector<24x1xf32> -> vector<24x1xf32>
    %133 = vector.broadcast %132 : vector<24x1xf32> to vector<24x24xf32>
    %134 = arith.mulf %129, %133 : vector<24x24xf32>
    %135 = arith.truncf %134 : vector<24x24xf32> to vector<24x24xbf16>
    %136 = arith.truncf %117 : vector<24x8xf32> to vector<24x8xbf16>
    %cst_87 = arith.constant dense<0.000000e+00> : vector<24x8xf32>
    %137 = tpu.matmul %135, %136, %cst_87 {dimension_numbers = #tpu.dot_dimension_numbers<[1], [0], [0], [1], [0, 0, 1, 1], [], []>} : vector<24x24xbf16>, vector<24x8xbf16>, vector<24x8xf32> -> vector<24x8xf32>
    %c0_88 = arith.constant 0 : index
    %c1_89 = arith.constant 1 : index
    %c0_90 = arith.constant 0 : index
    %c0_91 = arith.constant 0 : index
    %138 = vector.load %arg12[%c0_88, %c1_89, %c0_90, %c0_91] : memref<2x4x8x32xf32, #tpu.memory_space<vmem>>, vector<1x1x8x32xf32>
    %139 = vector.shape_cast %138 : vector<1x1x8x32xf32> to vector<8x32xf32>
    %140 = arith.truncf %137 : vector<24x8xf32> to vector<24x8xbf16>
    %141 = arith.truncf %139 : vector<8x32xf32> to vector<8x32xbf16>
    %cst_92 = arith.constant dense<0.000000e+00> : vector<24x32xf32>
    %142 = tpu.matmul %140, %141, %cst_92 {dimension_numbers = #tpu.dot_dimension_numbers<[1], [0], [0], [1], [0, 0, 1, 1], [], []>} : vector<24x8xbf16>, vector<8x32xbf16>, vector<24x32xf32> -> vector<24x32xf32>
    %143 = arith.addf %90, %142 : vector<24x32xf32>
    %c0_93 = arith.constant 0 : index
    %c2 = arith.constant 2 : index
    %c0_94 = arith.constant 0 : index
    %c0_95 = arith.constant 0 : index
    %144 = vector.load %arg6[%c0_93, %c2, %c0_94, %c0_95] : memref<2x4x32x8xf32, #tpu.memory_space<vmem>>, vector<1x1x32x8xf32>
    %145 = vector.shape_cast %144 : vector<1x1x32x8xf32> to vector<32x8xf32>
    %146 = arith.truncf %36 : vector<24x32xf32> to vector<24x32xbf16>
    %147 = arith.truncf %145 : vector<32x8xf32> to vector<32x8xbf16>
    %cst_96 = arith.constant dense<0.000000e+00> : vector<24x8xf32>
    %148 = tpu.matmul %146, %147, %cst_96 {dimension_numbers = #tpu.dot_dimension_numbers<[1], [0], [0], [1], [0, 0, 1, 1], [], []>} : vector<24x32xbf16>, vector<32x8xbf16>, vector<24x8xf32> -> vector<24x8xf32>
    %c0_97 = arith.constant 0 : index
    %c2_98 = arith.constant 2 : index
    %c0_99 = arith.constant 0 : index
    %c0_100 = arith.constant 0 : index
    %149 = vector.load %arg9[%c0_97, %c2_98, %c0_99, %c0_100] : memref<2x4x1x8xf32, #tpu.memory_space<vmem>>, vector<1x1x1x8xf32>
    %150 = vector.shape_cast %149 : vector<1x1x1x8xf32> to vector<1x8xf32>
    %151 = vector.broadcast %150 : vector<1x8xf32> to vector<24x8xf32>
    %152 = arith.addf %148, %151 : vector<24x8xf32>
    %c0_101 = arith.constant 0 : index
    %c2_102 = arith.constant 2 : index
    %c0_103 = arith.constant 0 : index
    %c0_104 = arith.constant 0 : index
    %153 = vector.load %arg7[%c0_101, %c2_102, %c0_103, %c0_104] : memref<2x4x32x8xf32, #tpu.memory_space<vmem>>, vector<1x1x32x8xf32>
    %154 = vector.shape_cast %153 : vector<1x1x32x8xf32> to vector<32x8xf32>
    %155 = arith.truncf %36 : vector<24x32xf32> to vector<24x32xbf16>
    %156 = arith.truncf %154 : vector<32x8xf32> to vector<32x8xbf16>
    %cst_105 = arith.constant dense<0.000000e+00> : vector<24x8xf32>
    %157 = tpu.matmul %155, %156, %cst_105 {dimension_numbers = #tpu.dot_dimension_numbers<[1], [0], [0], [1], [0, 0, 1, 1], [], []>} : vector<24x32xbf16>, vector<32x8xbf16>, vector<24x8xf32> -> vector<24x8xf32>
    %c0_106 = arith.constant 0 : index
    %c2_107 = arith.constant 2 : index
    %c0_108 = arith.constant 0 : index
    %c0_109 = arith.constant 0 : index
    %158 = vector.load %arg10[%c0_106, %c2_107, %c0_108, %c0_109] : memref<2x4x1x8xf32, #tpu.memory_space<vmem>>, vector<1x1x1x8xf32>
    %159 = vector.shape_cast %158 : vector<1x1x1x8xf32> to vector<1x8xf32>
    %160 = vector.broadcast %159 : vector<1x8xf32> to vector<24x8xf32>
    %161 = arith.addf %157, %160 : vector<24x8xf32>
    %c0_110 = arith.constant 0 : index
    %c2_111 = arith.constant 2 : index
    %c0_112 = arith.constant 0 : index
    %c0_113 = arith.constant 0 : index
    %162 = vector.load %arg8[%c0_110, %c2_111, %c0_112, %c0_113] : memref<2x4x32x8xf32, #tpu.memory_space<vmem>>, vector<1x1x32x8xf32>
    %163 = vector.shape_cast %162 : vector<1x1x32x8xf32> to vector<32x8xf32>
    %164 = arith.truncf %36 : vector<24x32xf32> to vector<24x32xbf16>
    %165 = arith.truncf %163 : vector<32x8xf32> to vector<32x8xbf16>
    %cst_114 = arith.constant dense<0.000000e+00> : vector<24x8xf32>
    %166 = tpu.matmul %164, %165, %cst_114 {dimension_numbers = #tpu.dot_dimension_numbers<[1], [0], [0], [1], [0, 0, 1, 1], [], []>} : vector<24x32xbf16>, vector<32x8xbf16>, vector<24x8xf32> -> vector<24x8xf32>
    %c0_115 = arith.constant 0 : index
    %c2_116 = arith.constant 2 : index
    %c0_117 = arith.constant 0 : index
    %c0_118 = arith.constant 0 : index
    %167 = vector.load %arg11[%c0_115, %c2_116, %c0_117, %c0_118] : memref<2x4x1x8xf32, #tpu.memory_space<vmem>>, vector<1x1x1x8xf32>
    %168 = vector.shape_cast %167 : vector<1x1x1x8xf32> to vector<1x8xf32>
    %169 = vector.broadcast %168 : vector<1x8xf32> to vector<24x8xf32>
    %170 = arith.addf %166, %169 : vector<24x8xf32>
    %171 = arith.truncf %152 : vector<24x8xf32> to vector<24x8xbf16>
    %172 = arith.truncf %161 : vector<24x8xf32> to vector<24x8xbf16>
    %cst_119 = arith.constant dense<0.000000e+00> : vector<24x24xf32>
    %173 = tpu.matmul %171, %172, %cst_119 {dimension_numbers = #tpu.dot_dimension_numbers<[1], [1], [0], [0], [0, 0, 1, 0], [], []>} : vector<24x8xbf16>, vector<24x8xbf16>, vector<24x24xf32> -> vector<24x24xf32>
    %cst_120 = arith.constant 0.353553385 : f32
    %174 = vector.broadcast %cst_120 : f32 to vector<24x24xf32>
    %175 = arith.mulf %173, %174 : vector<24x24xf32>
    %cst_121 = arith.constant -1.000000e+30 : f32
    %176 = vector.broadcast %cst_121 : f32 to vector<24x24xf32>
    %177 = arith.select %10, %175, %176 : vector<24x24xi1>, vector<24x24xf32>
    %cst_122 = arith.constant dense<0xFF800000> : vector<24xf32>
    %178 = vector.multi_reduction <maximumf>, %177, %cst_122 [1] : vector<24x24xf32> to vector<24xf32>
    %179 = vector.shape_cast %178 : vector<24xf32> to vector<24x1xf32>
    %180 = vector.broadcast %179 : vector<24x1xf32> to vector<24x24xf32>
    %181 = arith.subf %177, %180 : vector<24x24xf32>
    %182 = math.exp %181 : vector<24x24xf32>
    %cst_123 = arith.constant dense<0.000000e+00> : vector<24xf32>
    %183 = vector.multi_reduction <add>, %182, %cst_123 [1] : vector<24x24xf32> to vector<24xf32>
    %184 = vector.shape_cast %183 : vector<24xf32> to vector<24x1xf32>
    %185 = tpu.reciprocal %184 {approx = true} : vector<24x1xf32> -> vector<24x1xf32>
    %186 = vector.broadcast %185 : vector<24x1xf32> to vector<24x24xf32>
    %187 = arith.mulf %182, %186 : vector<24x24xf32>
    %188 = arith.truncf %187 : vector<24x24xf32> to vector<24x24xbf16>
    %189 = arith.truncf %170 : vector<24x8xf32> to vector<24x8xbf16>
    %cst_124 = arith.constant dense<0.000000e+00> : vector<24x8xf32>
    %190 = tpu.matmul %188, %189, %cst_124 {dimension_numbers = #tpu.dot_dimension_numbers<[1], [0], [0], [1], [0, 0, 1, 1], [], []>} : vector<24x24xbf16>, vector<24x8xbf16>, vector<24x8xf32> -> vector<24x8xf32>
    %c0_125 = arith.constant 0 : index
    %c2_126 = arith.constant 2 : index
    %c0_127 = arith.constant 0 : index
    %c0_128 = arith.constant 0 : index
    %191 = vector.load %arg12[%c0_125, %c2_126, %c0_127, %c0_128] : memref<2x4x8x32xf32, #tpu.memory_space<vmem>>, vector<1x1x8x32xf32>
    %192 = vector.shape_cast %191 : vector<1x1x8x32xf32> to vector<8x32xf32>
    %193 = arith.truncf %190 : vector<24x8xf32> to vector<24x8xbf16>
    %194 = arith.truncf %192 : vector<8x32xf32> to vector<8x32xbf16>
    %cst_129 = arith.constant dense<0.000000e+00> : vector<24x32xf32>
    %195 = tpu.matmul %193, %194, %cst_129 {dimension_numbers = #tpu.dot_dimension_numbers<[1], [0], [0], [1], [0, 0, 1, 1], [], []>} : vector<24x8xbf16>, vector<8x32xbf16>, vector<24x32xf32> -> vector<24x32xf32>
    %196 = arith.addf %143, %195 : vector<24x32xf32>
    %c0_130 = arith.constant 0 : index
    %c3 = arith.constant 3 : index
    %c0_131 = arith.constant 0 : index
    %c0_132 = arith.constant 0 : index
    %197 = vector.load %arg6[%c0_130, %c3, %c0_131, %c0_132] : memref<2x4x32x8xf32, #tpu.memory_space<vmem>>, vector<1x1x32x8xf32>
    %198 = vector.shape_cast %197 : vector<1x1x32x8xf32> to vector<32x8xf32>
    %199 = arith.truncf %36 : vector<24x32xf32> to vector<24x32xbf16>
    %200 = arith.truncf %198 : vector<32x8xf32> to vector<32x8xbf16>
    %cst_133 = arith.constant dense<0.000000e+00> : vector<24x8xf32>
    %201 = tpu.matmul %199, %200, %cst_133 {dimension_numbers = #tpu.dot_dimension_numbers<[1], [0], [0], [1], [0, 0, 1, 1], [], []>} : vector<24x32xbf16>, vector<32x8xbf16>, vector<24x8xf32> -> vector<24x8xf32>
    %c0_134 = arith.constant 0 : index
    %c3_135 = arith.constant 3 : index
    %c0_136 = arith.constant 0 : index
    %c0_137 = arith.constant 0 : index
    %202 = vector.load %arg9[%c0_134, %c3_135, %c0_136, %c0_137] : memref<2x4x1x8xf32, #tpu.memory_space<vmem>>, vector<1x1x1x8xf32>
    %203 = vector.shape_cast %202 : vector<1x1x1x8xf32> to vector<1x8xf32>
    %204 = vector.broadcast %203 : vector<1x8xf32> to vector<24x8xf32>
    %205 = arith.addf %201, %204 : vector<24x8xf32>
    %c0_138 = arith.constant 0 : index
    %c3_139 = arith.constant 3 : index
    %c0_140 = arith.constant 0 : index
    %c0_141 = arith.constant 0 : index
    %206 = vector.load %arg7[%c0_138, %c3_139, %c0_140, %c0_141] : memref<2x4x32x8xf32, #tpu.memory_space<vmem>>, vector<1x1x32x8xf32>
    %207 = vector.shape_cast %206 : vector<1x1x32x8xf32> to vector<32x8xf32>
    %208 = arith.truncf %36 : vector<24x32xf32> to vector<24x32xbf16>
    %209 = arith.truncf %207 : vector<32x8xf32> to vector<32x8xbf16>
    %cst_142 = arith.constant dense<0.000000e+00> : vector<24x8xf32>
    %210 = tpu.matmul %208, %209, %cst_142 {dimension_numbers = #tpu.dot_dimension_numbers<[1], [0], [0], [1], [0, 0, 1, 1], [], []>} : vector<24x32xbf16>, vector<32x8xbf16>, vector<24x8xf32> -> vector<24x8xf32>
    %c0_143 = arith.constant 0 : index
    %c3_144 = arith.constant 3 : index
    %c0_145 = arith.constant 0 : index
    %c0_146 = arith.constant 0 : index
    %211 = vector.load %arg10[%c0_143, %c3_144, %c0_145, %c0_146] : memref<2x4x1x8xf32, #tpu.memory_space<vmem>>, vector<1x1x1x8xf32>
    %212 = vector.shape_cast %211 : vector<1x1x1x8xf32> to vector<1x8xf32>
    %213 = vector.broadcast %212 : vector<1x8xf32> to vector<24x8xf32>
    %214 = arith.addf %210, %213 : vector<24x8xf32>
    %c0_147 = arith.constant 0 : index
    %c3_148 = arith.constant 3 : index
    %c0_149 = arith.constant 0 : index
    %c0_150 = arith.constant 0 : index
    %215 = vector.load %arg8[%c0_147, %c3_148, %c0_149, %c0_150] : memref<2x4x32x8xf32, #tpu.memory_space<vmem>>, vector<1x1x32x8xf32>
    %216 = vector.shape_cast %215 : vector<1x1x32x8xf32> to vector<32x8xf32>
    %217 = arith.truncf %36 : vector<24x32xf32> to vector<24x32xbf16>
    %218 = arith.truncf %216 : vector<32x8xf32> to vector<32x8xbf16>
    %cst_151 = arith.constant dense<0.000000e+00> : vector<24x8xf32>
    %219 = tpu.matmul %217, %218, %cst_151 {dimension_numbers = #tpu.dot_dimension_numbers<[1], [0], [0], [1], [0, 0, 1, 1], [], []>} : vector<24x32xbf16>, vector<32x8xbf16>, vector<24x8xf32> -> vector<24x8xf32>
    %c0_152 = arith.constant 0 : index
    %c3_153 = arith.constant 3 : index
    %c0_154 = arith.constant 0 : index
    %c0_155 = arith.constant 0 : index
    %220 = vector.load %arg11[%c0_152, %c3_153, %c0_154, %c0_155] : memref<2x4x1x8xf32, #tpu.memory_space<vmem>>, vector<1x1x1x8xf32>
    %221 = vector.shape_cast %220 : vector<1x1x1x8xf32> to vector<1x8xf32>
    %222 = vector.broadcast %221 : vector<1x8xf32> to vector<24x8xf32>
    %223 = arith.addf %219, %222 : vector<24x8xf32>
    %224 = arith.truncf %205 : vector<24x8xf32> to vector<24x8xbf16>
    %225 = arith.truncf %214 : vector<24x8xf32> to vector<24x8xbf16>
    %cst_156 = arith.constant dense<0.000000e+00> : vector<24x24xf32>
    %226 = tpu.matmul %224, %225, %cst_156 {dimension_numbers = #tpu.dot_dimension_numbers<[1], [1], [0], [0], [0, 0, 1, 0], [], []>} : vector<24x8xbf16>, vector<24x8xbf16>, vector<24x24xf32> -> vector<24x24xf32>
    %cst_157 = arith.constant 0.353553385 : f32
    %227 = vector.broadcast %cst_157 : f32 to vector<24x24xf32>
    %228 = arith.mulf %226, %227 : vector<24x24xf32>
    %cst_158 = arith.constant -1.000000e+30 : f32
    %229 = vector.broadcast %cst_158 : f32 to vector<24x24xf32>
    %230 = arith.select %10, %228, %229 : vector<24x24xi1>, vector<24x24xf32>
    %cst_159 = arith.constant dense<0xFF800000> : vector<24xf32>
    %231 = vector.multi_reduction <maximumf>, %230, %cst_159 [1] : vector<24x24xf32> to vector<24xf32>
    %232 = vector.shape_cast %231 : vector<24xf32> to vector<24x1xf32>
    %233 = vector.broadcast %232 : vector<24x1xf32> to vector<24x24xf32>
    %234 = arith.subf %230, %233 : vector<24x24xf32>
    %235 = math.exp %234 : vector<24x24xf32>
    %cst_160 = arith.constant dense<0.000000e+00> : vector<24xf32>
    %236 = vector.multi_reduction <add>, %235, %cst_160 [1] : vector<24x24xf32> to vector<24xf32>
    %237 = vector.shape_cast %236 : vector<24xf32> to vector<24x1xf32>
    %238 = tpu.reciprocal %237 {approx = true} : vector<24x1xf32> -> vector<24x1xf32>
    %239 = vector.broadcast %238 : vector<24x1xf32> to vector<24x24xf32>
    %240 = arith.mulf %235, %239 : vector<24x24xf32>
    %241 = arith.truncf %240 : vector<24x24xf32> to vector<24x24xbf16>
    %242 = arith.truncf %223 : vector<24x8xf32> to vector<24x8xbf16>
    %cst_161 = arith.constant dense<0.000000e+00> : vector<24x8xf32>
    %243 = tpu.matmul %241, %242, %cst_161 {dimension_numbers = #tpu.dot_dimension_numbers<[1], [0], [0], [1], [0, 0, 1, 1], [], []>} : vector<24x24xbf16>, vector<24x8xbf16>, vector<24x8xf32> -> vector<24x8xf32>
    %c0_162 = arith.constant 0 : index
    %c3_163 = arith.constant 3 : index
    %c0_164 = arith.constant 0 : index
    %c0_165 = arith.constant 0 : index
    %244 = vector.load %arg12[%c0_162, %c3_163, %c0_164, %c0_165] : memref<2x4x8x32xf32, #tpu.memory_space<vmem>>, vector<1x1x8x32xf32>
    %245 = vector.shape_cast %244 : vector<1x1x8x32xf32> to vector<8x32xf32>
    %246 = arith.truncf %243 : vector<24x8xf32> to vector<24x8xbf16>
    %247 = arith.truncf %245 : vector<8x32xf32> to vector<8x32xbf16>
    %cst_166 = arith.constant dense<0.000000e+00> : vector<24x32xf32>
    %248 = tpu.matmul %246, %247, %cst_166 {dimension_numbers = #tpu.dot_dimension_numbers<[1], [0], [0], [1], [0, 0, 1, 1], [], []>} : vector<24x8xbf16>, vector<8x32xbf16>, vector<24x32xf32> -> vector<24x32xf32>
    %249 = arith.addf %196, %248 : vector<24x32xf32>
    %250 = arith.addf %7, %249 : vector<24x32xf32>
    %c0_167 = arith.constant 0 : index
    %c0_168 = arith.constant 0 : index
    %c0_169 = arith.constant 0 : index
    %251 = vector.load %arg13[%c0_167, %c0_168, %c0_169] : memref<2x1x32xf32, #tpu.memory_space<vmem>>, vector<1x1x32xf32>
    %252 = vector.shape_cast %251 : vector<1x1x32xf32> to vector<1x32xf32>
    %253 = vector.broadcast %252 : vector<1x32xf32> to vector<24x32xf32>
    %254 = arith.addf %250, %253 : vector<24x32xf32>
    %c0_170 = arith.constant 0 : index
    %c0_171 = arith.constant 0 : index
    %c0_172 = arith.constant 0 : index
    %255 = vector.load %arg14[%c0_170, %c0_171, %c0_172] : memref<2x1x32xf32, #tpu.memory_space<vmem>>, vector<1x1x32xf32>
    %256 = vector.shape_cast %255 : vector<1x1x32xf32> to vector<1x32xf32>
    %c0_173 = arith.constant 0 : index
    %c0_174 = arith.constant 0 : index
    %c0_175 = arith.constant 0 : index
    %257 = vector.load %arg15[%c0_173, %c0_174, %c0_175] : memref<2x1x32xf32, #tpu.memory_space<vmem>>, vector<1x1x32xf32>
    %258 = vector.shape_cast %257 : vector<1x1x32xf32> to vector<1x32xf32>
    %cst_176 = arith.constant dense<0.000000e+00> : vector<24xf32>
    %259 = vector.multi_reduction <add>, %254, %cst_176 [1] : vector<24x32xf32> to vector<24xf32>
    %260 = vector.shape_cast %259 : vector<24xf32> to vector<24x1xf32>
    %cst_177 = arith.constant 3.200000e+01 : f32
    %261 = vector.broadcast %cst_177 : f32 to vector<24x1xf32>
    %262 = arith.divf %260, %261 : vector<24x1xf32>
    %263 = vector.broadcast %262 : vector<24x1xf32> to vector<24x32xf32>
    %264 = arith.subf %254, %263 : vector<24x32xf32>
    %265 = arith.mulf %264, %264 : vector<24x32xf32>
    %cst_178 = arith.constant dense<0.000000e+00> : vector<24xf32>
    %266 = vector.multi_reduction <add>, %265, %cst_178 [1] : vector<24x32xf32> to vector<24xf32>
    %267 = vector.shape_cast %266 : vector<24xf32> to vector<24x1xf32>
    %cst_179 = arith.constant 3.200000e+01 : f32
    %268 = vector.broadcast %cst_179 : f32 to vector<24x1xf32>
    %269 = arith.divf %267, %268 : vector<24x1xf32>
    %270 = vector.broadcast %262 : vector<24x1xf32> to vector<24x32xf32>
    %271 = arith.subf %254, %270 : vector<24x32xf32>
    %cst_180 = arith.constant 9.99999997E-7 : f32
    %272 = vector.broadcast %cst_180 : f32 to vector<24x1xf32>
    %273 = arith.addf %269, %272 : vector<24x1xf32>
    %274 = math.rsqrt %273 : vector<24x1xf32>
    %275 = vector.broadcast %274 : vector<24x1xf32> to vector<24x32xf32>
    %276 = arith.mulf %271, %275 : vector<24x32xf32>
    %277 = vector.broadcast %256 : vector<1x32xf32> to vector<24x32xf32>
    %278 = arith.mulf %276, %277 : vector<24x32xf32>
    %279 = vector.broadcast %258 : vector<1x32xf32> to vector<24x32xf32>
    %280 = arith.addf %278, %279 : vector<24x32xf32>
    %c0_181 = arith.constant 0 : index
    %c0_182 = arith.constant 0 : index
    %c0_183 = arith.constant 0 : index
    %281 = vector.load %arg16[%c0_181, %c0_182, %c0_183] : memref<2x32x128xf32, #tpu.memory_space<vmem>>, vector<1x32x128xf32>
    %282 = vector.shape_cast %281 : vector<1x32x128xf32> to vector<32x128xf32>
    %283 = arith.truncf %280 : vector<24x32xf32> to vector<24x32xbf16>
    %284 = arith.truncf %282 : vector<32x128xf32> to vector<32x128xbf16>
    %cst_184 = arith.constant dense<0.000000e+00> : vector<24x128xf32>
    %285 = tpu.matmul %283, %284, %cst_184 {dimension_numbers = #tpu.dot_dimension_numbers<[1], [0], [0], [1], [0, 0, 1, 1], [], []>} : vector<24x32xbf16>, vector<32x128xbf16>, vector<24x128xf32> -> vector<24x128xf32>
    %c0_185 = arith.constant 0 : index
    %c0_186 = arith.constant 0 : index
    %c0_187 = arith.constant 0 : index
    %286 = vector.load %arg17[%c0_185, %c0_186, %c0_187] : memref<2x1x128xf32, #tpu.memory_space<vmem>>, vector<1x1x128xf32>
    %287 = vector.shape_cast %286 : vector<1x1x128xf32> to vector<1x128xf32>
    %288 = vector.broadcast %287 : vector<1x128xf32> to vector<24x128xf32>
    %289 = arith.addf %285, %288 : vector<24x128xf32>
    %290 = arith.mulf %289, %289 : vector<24x128xf32>
    %291 = arith.mulf %289, %290 : vector<24x128xf32>
    %cst_188 = arith.constant 4.471500e-02 : f32
    %292 = vector.broadcast %cst_188 : f32 to vector<24x128xf32>
    %293 = arith.mulf %292, %291 : vector<24x128xf32>
    %294 = arith.addf %289, %293 : vector<24x128xf32>
    %cst_189 = arith.constant 0.797884583 : f32
    %295 = vector.broadcast %cst_189 : f32 to vector<24x128xf32>
    %296 = arith.mulf %295, %294 : vector<24x128xf32>
    %297 = math.tanh %296 : vector<24x128xf32>
    %cst_190 = arith.constant 1.000000e+00 : f32
    %298 = vector.broadcast %cst_190 : f32 to vector<24x128xf32>
    %299 = arith.addf %298, %297 : vector<24x128xf32>
    %cst_191 = arith.constant 5.000000e-01 : f32
    %300 = vector.broadcast %cst_191 : f32 to vector<24x128xf32>
    %301 = arith.mulf %300, %299 : vector<24x128xf32>
    %302 = arith.mulf %289, %301 : vector<24x128xf32>
    %c0_192 = arith.constant 0 : index
    %c0_193 = arith.constant 0 : index
    %c0_194 = arith.constant 0 : index
    %303 = vector.load %arg18[%c0_192, %c0_193, %c0_194] : memref<2x128x32xf32, #tpu.memory_space<vmem>>, vector<1x128x32xf32>
    %304 = vector.shape_cast %303 : vector<1x128x32xf32> to vector<128x32xf32>
    %305 = arith.truncf %302 : vector<24x128xf32> to vector<24x128xbf16>
    %306 = arith.truncf %304 : vector<128x32xf32> to vector<128x32xbf16>
    %cst_195 = arith.constant dense<0.000000e+00> : vector<24x32xf32>
    %307 = tpu.matmul %305, %306, %cst_195 {dimension_numbers = #tpu.dot_dimension_numbers<[1], [0], [0], [1], [0, 0, 1, 1], [], []>} : vector<24x128xbf16>, vector<128x32xbf16>, vector<24x32xf32> -> vector<24x32xf32>
    %308 = arith.addf %254, %307 : vector<24x32xf32>
    %c0_196 = arith.constant 0 : index
    %c0_197 = arith.constant 0 : index
    %c0_198 = arith.constant 0 : index
    %309 = vector.load %arg19[%c0_196, %c0_197, %c0_198] : memref<2x1x32xf32, #tpu.memory_space<vmem>>, vector<1x1x32xf32>
    %310 = vector.shape_cast %309 : vector<1x1x32xf32> to vector<1x32xf32>
    %311 = vector.broadcast %310 : vector<1x32xf32> to vector<24x32xf32>
    %312 = arith.addf %308, %311 : vector<24x32xf32>
    %c1_199 = arith.constant 1 : index
    %c0_200 = arith.constant 0 : index
    %c0_201 = arith.constant 0 : index
    %313 = vector.load %arg4[%c1_199, %c0_200, %c0_201] : memref<2x1x32xf32, #tpu.memory_space<vmem>>, vector<1x1x32xf32>
    %314 = vector.shape_cast %313 : vector<1x1x32xf32> to vector<1x32xf32>
    %c1_202 = arith.constant 1 : index
    %c0_203 = arith.constant 0 : index
    %c0_204 = arith.constant 0 : index
    %315 = vector.load %arg5[%c1_202, %c0_203, %c0_204] : memref<2x1x32xf32, #tpu.memory_space<vmem>>, vector<1x1x32xf32>
    %316 = vector.shape_cast %315 : vector<1x1x32xf32> to vector<1x32xf32>
    %cst_205 = arith.constant dense<0.000000e+00> : vector<24xf32>
    %317 = vector.multi_reduction <add>, %312, %cst_205 [1] : vector<24x32xf32> to vector<24xf32>
    %318 = vector.shape_cast %317 : vector<24xf32> to vector<24x1xf32>
    %cst_206 = arith.constant 3.200000e+01 : f32
    %319 = vector.broadcast %cst_206 : f32 to vector<24x1xf32>
    %320 = arith.divf %318, %319 : vector<24x1xf32>
    %321 = vector.broadcast %320 : vector<24x1xf32> to vector<24x32xf32>
    %322 = arith.subf %312, %321 : vector<24x32xf32>
    %323 = arith.mulf %322, %322 : vector<24x32xf32>
    %cst_207 = arith.constant dense<0.000000e+00> : vector<24xf32>
    %324 = vector.multi_reduction <add>, %323, %cst_207 [1] : vector<24x32xf32> to vector<24xf32>
    %325 = vector.shape_cast %324 : vector<24xf32> to vector<24x1xf32>
    %cst_208 = arith.constant 3.200000e+01 : f32
    %326 = vector.broadcast %cst_208 : f32 to vector<24x1xf32>
    %327 = arith.divf %325, %326 : vector<24x1xf32>
    %328 = vector.broadcast %320 : vector<24x1xf32> to vector<24x32xf32>
    %329 = arith.subf %312, %328 : vector<24x32xf32>
    %cst_209 = arith.constant 9.99999997E-7 : f32
    %330 = vector.broadcast %cst_209 : f32 to vector<24x1xf32>
    %331 = arith.addf %327, %330 : vector<24x1xf32>
    %332 = math.rsqrt %331 : vector<24x1xf32>
    %333 = vector.broadcast %332 : vector<24x1xf32> to vector<24x32xf32>
    %334 = arith.mulf %329, %333 : vector<24x32xf32>
    %335 = vector.broadcast %314 : vector<1x32xf32> to vector<24x32xf32>
    %336 = arith.mulf %334, %335 : vector<24x32xf32>
    %337 = vector.broadcast %316 : vector<1x32xf32> to vector<24x32xf32>
    %338 = arith.addf %336, %337 : vector<24x32xf32>
    %cst_210 = arith.constant 0.000000e+00 : f32
    %339 = vector.broadcast %cst_210 : f32 to vector<24x32xf32>
    %c1_211 = arith.constant 1 : index
    %c0_212 = arith.constant 0 : index
    %c0_213 = arith.constant 0 : index
    %c0_214 = arith.constant 0 : index
    %340 = vector.load %arg6[%c1_211, %c0_212, %c0_213, %c0_214] : memref<2x4x32x8xf32, #tpu.memory_space<vmem>>, vector<1x1x32x8xf32>
    %341 = vector.shape_cast %340 : vector<1x1x32x8xf32> to vector<32x8xf32>
    %342 = arith.truncf %338 : vector<24x32xf32> to vector<24x32xbf16>
    %343 = arith.truncf %341 : vector<32x8xf32> to vector<32x8xbf16>
    %cst_215 = arith.constant dense<0.000000e+00> : vector<24x8xf32>
    %344 = tpu.matmul %342, %343, %cst_215 {dimension_numbers = #tpu.dot_dimension_numbers<[1], [0], [0], [1], [0, 0, 1, 1], [], []>} : vector<24x32xbf16>, vector<32x8xbf16>, vector<24x8xf32> -> vector<24x8xf32>
    %c1_216 = arith.constant 1 : index
    %c0_217 = arith.constant 0 : index
    %c0_218 = arith.constant 0 : index
    %c0_219 = arith.constant 0 : index
    %345 = vector.load %arg9[%c1_216, %c0_217, %c0_218, %c0_219] : memref<2x4x1x8xf32, #tpu.memory_space<vmem>>, vector<1x1x1x8xf32>
    %346 = vector.shape_cast %345 : vector<1x1x1x8xf32> to vector<1x8xf32>
    %347 = vector.broadcast %346 : vector<1x8xf32> to vector<24x8xf32>
    %348 = arith.addf %344, %347 : vector<24x8xf32>
    %c1_220 = arith.constant 1 : index
    %c0_221 = arith.constant 0 : index
    %c0_222 = arith.constant 0 : index
    %c0_223 = arith.constant 0 : index
    %349 = vector.load %arg7[%c1_220, %c0_221, %c0_222, %c0_223] : memref<2x4x32x8xf32, #tpu.memory_space<vmem>>, vector<1x1x32x8xf32>
    %350 = vector.shape_cast %349 : vector<1x1x32x8xf32> to vector<32x8xf32>
    %351 = arith.truncf %338 : vector<24x32xf32> to vector<24x32xbf16>
    %352 = arith.truncf %350 : vector<32x8xf32> to vector<32x8xbf16>
    %cst_224 = arith.constant dense<0.000000e+00> : vector<24x8xf32>
    %353 = tpu.matmul %351, %352, %cst_224 {dimension_numbers = #tpu.dot_dimension_numbers<[1], [0], [0], [1], [0, 0, 1, 1], [], []>} : vector<24x32xbf16>, vector<32x8xbf16>, vector<24x8xf32> -> vector<24x8xf32>
    %c1_225 = arith.constant 1 : index
    %c0_226 = arith.constant 0 : index
    %c0_227 = arith.constant 0 : index
    %c0_228 = arith.constant 0 : index
    %354 = vector.load %arg10[%c1_225, %c0_226, %c0_227, %c0_228] : memref<2x4x1x8xf32, #tpu.memory_space<vmem>>, vector<1x1x1x8xf32>
    %355 = vector.shape_cast %354 : vector<1x1x1x8xf32> to vector<1x8xf32>
    %356 = vector.broadcast %355 : vector<1x8xf32> to vector<24x8xf32>
    %357 = arith.addf %353, %356 : vector<24x8xf32>
    %c1_229 = arith.constant 1 : index
    %c0_230 = arith.constant 0 : index
    %c0_231 = arith.constant 0 : index
    %c0_232 = arith.constant 0 : index
    %358 = vector.load %arg8[%c1_229, %c0_230, %c0_231, %c0_232] : memref<2x4x32x8xf32, #tpu.memory_space<vmem>>, vector<1x1x32x8xf32>
    %359 = vector.shape_cast %358 : vector<1x1x32x8xf32> to vector<32x8xf32>
    %360 = arith.truncf %338 : vector<24x32xf32> to vector<24x32xbf16>
    %361 = arith.truncf %359 : vector<32x8xf32> to vector<32x8xbf16>
    %cst_233 = arith.constant dense<0.000000e+00> : vector<24x8xf32>
    %362 = tpu.matmul %360, %361, %cst_233 {dimension_numbers = #tpu.dot_dimension_numbers<[1], [0], [0], [1], [0, 0, 1, 1], [], []>} : vector<24x32xbf16>, vector<32x8xbf16>, vector<24x8xf32> -> vector<24x8xf32>
    %c1_234 = arith.constant 1 : index
    %c0_235 = arith.constant 0 : index
    %c0_236 = arith.constant 0 : index
    %c0_237 = arith.constant 0 : index
    %363 = vector.load %arg11[%c1_234, %c0_235, %c0_236, %c0_237] : memref<2x4x1x8xf32, #tpu.memory_space<vmem>>, vector<1x1x1x8xf32>
    %364 = vector.shape_cast %363 : vector<1x1x1x8xf32> to vector<1x8xf32>
    %365 = vector.broadcast %364 : vector<1x8xf32> to vector<24x8xf32>
    %366 = arith.addf %362, %365 : vector<24x8xf32>
    %367 = arith.truncf %348 : vector<24x8xf32> to vector<24x8xbf16>
    %368 = arith.truncf %357 : vector<24x8xf32> to vector<24x8xbf16>
    %cst_238 = arith.constant dense<0.000000e+00> : vector<24x24xf32>
    %369 = tpu.matmul %367, %368, %cst_238 {dimension_numbers = #tpu.dot_dimension_numbers<[1], [1], [0], [0], [0, 0, 1, 0], [], []>} : vector<24x8xbf16>, vector<24x8xbf16>, vector<24x24xf32> -> vector<24x24xf32>
    %cst_239 = arith.constant 0.353553385 : f32
    %370 = vector.broadcast %cst_239 : f32 to vector<24x24xf32>
    %371 = arith.mulf %369, %370 : vector<24x24xf32>
    %cst_240 = arith.constant -1.000000e+30 : f32
    %372 = vector.broadcast %cst_240 : f32 to vector<24x24xf32>
    %373 = arith.select %10, %371, %372 : vector<24x24xi1>, vector<24x24xf32>
    %cst_241 = arith.constant dense<0xFF800000> : vector<24xf32>
    %374 = vector.multi_reduction <maximumf>, %373, %cst_241 [1] : vector<24x24xf32> to vector<24xf32>
    %375 = vector.shape_cast %374 : vector<24xf32> to vector<24x1xf32>
    %376 = vector.broadcast %375 : vector<24x1xf32> to vector<24x24xf32>
    %377 = arith.subf %373, %376 : vector<24x24xf32>
    %378 = math.exp %377 : vector<24x24xf32>
    %cst_242 = arith.constant dense<0.000000e+00> : vector<24xf32>
    %379 = vector.multi_reduction <add>, %378, %cst_242 [1] : vector<24x24xf32> to vector<24xf32>
    %380 = vector.shape_cast %379 : vector<24xf32> to vector<24x1xf32>
    %381 = tpu.reciprocal %380 {approx = true} : vector<24x1xf32> -> vector<24x1xf32>
    %382 = vector.broadcast %381 : vector<24x1xf32> to vector<24x24xf32>
    %383 = arith.mulf %378, %382 : vector<24x24xf32>
    %384 = arith.truncf %383 : vector<24x24xf32> to vector<24x24xbf16>
    %385 = arith.truncf %366 : vector<24x8xf32> to vector<24x8xbf16>
    %cst_243 = arith.constant dense<0.000000e+00> : vector<24x8xf32>
    %386 = tpu.matmul %384, %385, %cst_243 {dimension_numbers = #tpu.dot_dimension_numbers<[1], [0], [0], [1], [0, 0, 1, 1], [], []>} : vector<24x24xbf16>, vector<24x8xbf16>, vector<24x8xf32> -> vector<24x8xf32>
    %c1_244 = arith.constant 1 : index
    %c0_245 = arith.constant 0 : index
    %c0_246 = arith.constant 0 : index
    %c0_247 = arith.constant 0 : index
    %387 = vector.load %arg12[%c1_244, %c0_245, %c0_246, %c0_247] : memref<2x4x8x32xf32, #tpu.memory_space<vmem>>, vector<1x1x8x32xf32>
    %388 = vector.shape_cast %387 : vector<1x1x8x32xf32> to vector<8x32xf32>
    %389 = arith.truncf %386 : vector<24x8xf32> to vector<24x8xbf16>
    %390 = arith.truncf %388 : vector<8x32xf32> to vector<8x32xbf16>
    %cst_248 = arith.constant dense<0.000000e+00> : vector<24x32xf32>
    %391 = tpu.matmul %389, %390, %cst_248 {dimension_numbers = #tpu.dot_dimension_numbers<[1], [0], [0], [1], [0, 0, 1, 1], [], []>} : vector<24x8xbf16>, vector<8x32xbf16>, vector<24x32xf32> -> vector<24x32xf32>
    %392 = arith.addf %339, %391 : vector<24x32xf32>
    %c1_249 = arith.constant 1 : index
    %c1_250 = arith.constant 1 : index
    %c0_251 = arith.constant 0 : index
    %c0_252 = arith.constant 0 : index
    %393 = vector.load %arg6[%c1_249, %c1_250, %c0_251, %c0_252] : memref<2x4x32x8xf32, #tpu.memory_space<vmem>>, vector<1x1x32x8xf32>
    %394 = vector.shape_cast %393 : vector<1x1x32x8xf32> to vector<32x8xf32>
    %395 = arith.truncf %338 : vector<24x32xf32> to vector<24x32xbf16>
    %396 = arith.truncf %394 : vector<32x8xf32> to vector<32x8xbf16>
    %cst_253 = arith.constant dense<0.000000e+00> : vector<24x8xf32>
    %397 = tpu.matmul %395, %396, %cst_253 {dimension_numbers = #tpu.dot_dimension_numbers<[1], [0], [0], [1], [0, 0, 1, 1], [], []>} : vector<24x32xbf16>, vector<32x8xbf16>, vector<24x8xf32> -> vector<24x8xf32>
    %c1_254 = arith.constant 1 : index
    %c1_255 = arith.constant 1 : index
    %c0_256 = arith.constant 0 : index
    %c0_257 = arith.constant 0 : index
    %398 = vector.load %arg9[%c1_254, %c1_255, %c0_256, %c0_257] : memref<2x4x1x8xf32, #tpu.memory_space<vmem>>, vector<1x1x1x8xf32>
    %399 = vector.shape_cast %398 : vector<1x1x1x8xf32> to vector<1x8xf32>
    %400 = vector.broadcast %399 : vector<1x8xf32> to vector<24x8xf32>
    %401 = arith.addf %397, %400 : vector<24x8xf32>
    %c1_258 = arith.constant 1 : index
    %c1_259 = arith.constant 1 : index
    %c0_260 = arith.constant 0 : index
    %c0_261 = arith.constant 0 : index
    %402 = vector.load %arg7[%c1_258, %c1_259, %c0_260, %c0_261] : memref<2x4x32x8xf32, #tpu.memory_space<vmem>>, vector<1x1x32x8xf32>
    %403 = vector.shape_cast %402 : vector<1x1x32x8xf32> to vector<32x8xf32>
    %404 = arith.truncf %338 : vector<24x32xf32> to vector<24x32xbf16>
    %405 = arith.truncf %403 : vector<32x8xf32> to vector<32x8xbf16>
    %cst_262 = arith.constant dense<0.000000e+00> : vector<24x8xf32>
    %406 = tpu.matmul %404, %405, %cst_262 {dimension_numbers = #tpu.dot_dimension_numbers<[1], [0], [0], [1], [0, 0, 1, 1], [], []>} : vector<24x32xbf16>, vector<32x8xbf16>, vector<24x8xf32> -> vector<24x8xf32>
    %c1_263 = arith.constant 1 : index
    %c1_264 = arith.constant 1 : index
    %c0_265 = arith.constant 0 : index
    %c0_266 = arith.constant 0 : index
    %407 = vector.load %arg10[%c1_263, %c1_264, %c0_265, %c0_266] : memref<2x4x1x8xf32, #tpu.memory_space<vmem>>, vector<1x1x1x8xf32>
    %408 = vector.shape_cast %407 : vector<1x1x1x8xf32> to vector<1x8xf32>
    %409 = vector.broadcast %408 : vector<1x8xf32> to vector<24x8xf32>
    %410 = arith.addf %406, %409 : vector<24x8xf32>
    %c1_267 = arith.constant 1 : index
    %c1_268 = arith.constant 1 : index
    %c0_269 = arith.constant 0 : index
    %c0_270 = arith.constant 0 : index
    %411 = vector.load %arg8[%c1_267, %c1_268, %c0_269, %c0_270] : memref<2x4x32x8xf32, #tpu.memory_space<vmem>>, vector<1x1x32x8xf32>
    %412 = vector.shape_cast %411 : vector<1x1x32x8xf32> to vector<32x8xf32>
    %413 = arith.truncf %338 : vector<24x32xf32> to vector<24x32xbf16>
    %414 = arith.truncf %412 : vector<32x8xf32> to vector<32x8xbf16>
    %cst_271 = arith.constant dense<0.000000e+00> : vector<24x8xf32>
    %415 = tpu.matmul %413, %414, %cst_271 {dimension_numbers = #tpu.dot_dimension_numbers<[1], [0], [0], [1], [0, 0, 1, 1], [], []>} : vector<24x32xbf16>, vector<32x8xbf16>, vector<24x8xf32> -> vector<24x8xf32>
    %c1_272 = arith.constant 1 : index
    %c1_273 = arith.constant 1 : index
    %c0_274 = arith.constant 0 : index
    %c0_275 = arith.constant 0 : index
    %416 = vector.load %arg11[%c1_272, %c1_273, %c0_274, %c0_275] : memref<2x4x1x8xf32, #tpu.memory_space<vmem>>, vector<1x1x1x8xf32>
    %417 = vector.shape_cast %416 : vector<1x1x1x8xf32> to vector<1x8xf32>
    %418 = vector.broadcast %417 : vector<1x8xf32> to vector<24x8xf32>
    %419 = arith.addf %415, %418 : vector<24x8xf32>
    %420 = arith.truncf %401 : vector<24x8xf32> to vector<24x8xbf16>
    %421 = arith.truncf %410 : vector<24x8xf32> to vector<24x8xbf16>
    %cst_276 = arith.constant dense<0.000000e+00> : vector<24x24xf32>
    %422 = tpu.matmul %420, %421, %cst_276 {dimension_numbers = #tpu.dot_dimension_numbers<[1], [1], [0], [0], [0, 0, 1, 0], [], []>} : vector<24x8xbf16>, vector<24x8xbf16>, vector<24x24xf32> -> vector<24x24xf32>
    %cst_277 = arith.constant 0.353553385 : f32
    %423 = vector.broadcast %cst_277 : f32 to vector<24x24xf32>
    %424 = arith.mulf %422, %423 : vector<24x24xf32>
    %cst_278 = arith.constant -1.000000e+30 : f32
    %425 = vector.broadcast %cst_278 : f32 to vector<24x24xf32>
    %426 = arith.select %10, %424, %425 : vector<24x24xi1>, vector<24x24xf32>
    %cst_279 = arith.constant dense<0xFF800000> : vector<24xf32>
    %427 = vector.multi_reduction <maximumf>, %426, %cst_279 [1] : vector<24x24xf32> to vector<24xf32>
    %428 = vector.shape_cast %427 : vector<24xf32> to vector<24x1xf32>
    %429 = vector.broadcast %428 : vector<24x1xf32> to vector<24x24xf32>
    %430 = arith.subf %426, %429 : vector<24x24xf32>
    %431 = math.exp %430 : vector<24x24xf32>
    %cst_280 = arith.constant dense<0.000000e+00> : vector<24xf32>
    %432 = vector.multi_reduction <add>, %431, %cst_280 [1] : vector<24x24xf32> to vector<24xf32>
    %433 = vector.shape_cast %432 : vector<24xf32> to vector<24x1xf32>
    %434 = tpu.reciprocal %433 {approx = true} : vector<24x1xf32> -> vector<24x1xf32>
    %435 = vector.broadcast %434 : vector<24x1xf32> to vector<24x24xf32>
    %436 = arith.mulf %431, %435 : vector<24x24xf32>
    %437 = arith.truncf %436 : vector<24x24xf32> to vector<24x24xbf16>
    %438 = arith.truncf %419 : vector<24x8xf32> to vector<24x8xbf16>
    %cst_281 = arith.constant dense<0.000000e+00> : vector<24x8xf32>
    %439 = tpu.matmul %437, %438, %cst_281 {dimension_numbers = #tpu.dot_dimension_numbers<[1], [0], [0], [1], [0, 0, 1, 1], [], []>} : vector<24x24xbf16>, vector<24x8xbf16>, vector<24x8xf32> -> vector<24x8xf32>
    %c1_282 = arith.constant 1 : index
    %c1_283 = arith.constant 1 : index
    %c0_284 = arith.constant 0 : index
    %c0_285 = arith.constant 0 : index
    %440 = vector.load %arg12[%c1_282, %c1_283, %c0_284, %c0_285] : memref<2x4x8x32xf32, #tpu.memory_space<vmem>>, vector<1x1x8x32xf32>
    %441 = vector.shape_cast %440 : vector<1x1x8x32xf32> to vector<8x32xf32>
    %442 = arith.truncf %439 : vector<24x8xf32> to vector<24x8xbf16>
    %443 = arith.truncf %441 : vector<8x32xf32> to vector<8x32xbf16>
    %cst_286 = arith.constant dense<0.000000e+00> : vector<24x32xf32>
    %444 = tpu.matmul %442, %443, %cst_286 {dimension_numbers = #tpu.dot_dimension_numbers<[1], [0], [0], [1], [0, 0, 1, 1], [], []>} : vector<24x8xbf16>, vector<8x32xbf16>, vector<24x32xf32> -> vector<24x32xf32>
    %445 = arith.addf %392, %444 : vector<24x32xf32>
    %c1_287 = arith.constant 1 : index
    %c2_288 = arith.constant 2 : index
    %c0_289 = arith.constant 0 : index
    %c0_290 = arith.constant 0 : index
    %446 = vector.load %arg6[%c1_287, %c2_288, %c0_289, %c0_290] : memref<2x4x32x8xf32, #tpu.memory_space<vmem>>, vector<1x1x32x8xf32>
    %447 = vector.shape_cast %446 : vector<1x1x32x8xf32> to vector<32x8xf32>
    %448 = arith.truncf %338 : vector<24x32xf32> to vector<24x32xbf16>
    %449 = arith.truncf %447 : vector<32x8xf32> to vector<32x8xbf16>
    %cst_291 = arith.constant dense<0.000000e+00> : vector<24x8xf32>
    %450 = tpu.matmul %448, %449, %cst_291 {dimension_numbers = #tpu.dot_dimension_numbers<[1], [0], [0], [1], [0, 0, 1, 1], [], []>} : vector<24x32xbf16>, vector<32x8xbf16>, vector<24x8xf32> -> vector<24x8xf32>
    %c1_292 = arith.constant 1 : index
    %c2_293 = arith.constant 2 : index
    %c0_294 = arith.constant 0 : index
    %c0_295 = arith.constant 0 : index
    %451 = vector.load %arg9[%c1_292, %c2_293, %c0_294, %c0_295] : memref<2x4x1x8xf32, #tpu.memory_space<vmem>>, vector<1x1x1x8xf32>
    %452 = vector.shape_cast %451 : vector<1x1x1x8xf32> to vector<1x8xf32>
    %453 = vector.broadcast %452 : vector<1x8xf32> to vector<24x8xf32>
    %454 = arith.addf %450, %453 : vector<24x8xf32>
    %c1_296 = arith.constant 1 : index
    %c2_297 = arith.constant 2 : index
    %c0_298 = arith.constant 0 : index
    %c0_299 = arith.constant 0 : index
    %455 = vector.load %arg7[%c1_296, %c2_297, %c0_298, %c0_299] : memref<2x4x32x8xf32, #tpu.memory_space<vmem>>, vector<1x1x32x8xf32>
    %456 = vector.shape_cast %455 : vector<1x1x32x8xf32> to vector<32x8xf32>
    %457 = arith.truncf %338 : vector<24x32xf32> to vector<24x32xbf16>
    %458 = arith.truncf %456 : vector<32x8xf32> to vector<32x8xbf16>
    %cst_300 = arith.constant dense<0.000000e+00> : vector<24x8xf32>
    %459 = tpu.matmul %457, %458, %cst_300 {dimension_numbers = #tpu.dot_dimension_numbers<[1], [0], [0], [1], [0, 0, 1, 1], [], []>} : vector<24x32xbf16>, vector<32x8xbf16>, vector<24x8xf32> -> vector<24x8xf32>
    %c1_301 = arith.constant 1 : index
    %c2_302 = arith.constant 2 : index
    %c0_303 = arith.constant 0 : index
    %c0_304 = arith.constant 0 : index
    %460 = vector.load %arg10[%c1_301, %c2_302, %c0_303, %c0_304] : memref<2x4x1x8xf32, #tpu.memory_space<vmem>>, vector<1x1x1x8xf32>
    %461 = vector.shape_cast %460 : vector<1x1x1x8xf32> to vector<1x8xf32>
    %462 = vector.broadcast %461 : vector<1x8xf32> to vector<24x8xf32>
    %463 = arith.addf %459, %462 : vector<24x8xf32>
    %c1_305 = arith.constant 1 : index
    %c2_306 = arith.constant 2 : index
    %c0_307 = arith.constant 0 : index
    %c0_308 = arith.constant 0 : index
    %464 = vector.load %arg8[%c1_305, %c2_306, %c0_307, %c0_308] : memref<2x4x32x8xf32, #tpu.memory_space<vmem>>, vector<1x1x32x8xf32>
    %465 = vector.shape_cast %464 : vector<1x1x32x8xf32> to vector<32x8xf32>
    %466 = arith.truncf %338 : vector<24x32xf32> to vector<24x32xbf16>
    %467 = arith.truncf %465 : vector<32x8xf32> to vector<32x8xbf16>
    %cst_309 = arith.constant dense<0.000000e+00> : vector<24x8xf32>
    %468 = tpu.matmul %466, %467, %cst_309 {dimension_numbers = #tpu.dot_dimension_numbers<[1], [0], [0], [1], [0, 0, 1, 1], [], []>} : vector<24x32xbf16>, vector<32x8xbf16>, vector<24x8xf32> -> vector<24x8xf32>
    %c1_310 = arith.constant 1 : index
    %c2_311 = arith.constant 2 : index
    %c0_312 = arith.constant 0 : index
    %c0_313 = arith.constant 0 : index
    %469 = vector.load %arg11[%c1_310, %c2_311, %c0_312, %c0_313] : memref<2x4x1x8xf32, #tpu.memory_space<vmem>>, vector<1x1x1x8xf32>
    %470 = vector.shape_cast %469 : vector<1x1x1x8xf32> to vector<1x8xf32>
    %471 = vector.broadcast %470 : vector<1x8xf32> to vector<24x8xf32>
    %472 = arith.addf %468, %471 : vector<24x8xf32>
    %473 = arith.truncf %454 : vector<24x8xf32> to vector<24x8xbf16>
    %474 = arith.truncf %463 : vector<24x8xf32> to vector<24x8xbf16>
    %cst_314 = arith.constant dense<0.000000e+00> : vector<24x24xf32>
    %475 = tpu.matmul %473, %474, %cst_314 {dimension_numbers = #tpu.dot_dimension_numbers<[1], [1], [0], [0], [0, 0, 1, 0], [], []>} : vector<24x8xbf16>, vector<24x8xbf16>, vector<24x24xf32> -> vector<24x24xf32>
    %cst_315 = arith.constant 0.353553385 : f32
    %476 = vector.broadcast %cst_315 : f32 to vector<24x24xf32>
    %477 = arith.mulf %475, %476 : vector<24x24xf32>
    %cst_316 = arith.constant -1.000000e+30 : f32
    %478 = vector.broadcast %cst_316 : f32 to vector<24x24xf32>
    %479 = arith.select %10, %477, %478 : vector<24x24xi1>, vector<24x24xf32>
    %cst_317 = arith.constant dense<0xFF800000> : vector<24xf32>
    %480 = vector.multi_reduction <maximumf>, %479, %cst_317 [1] : vector<24x24xf32> to vector<24xf32>
    %481 = vector.shape_cast %480 : vector<24xf32> to vector<24x1xf32>
    %482 = vector.broadcast %481 : vector<24x1xf32> to vector<24x24xf32>
    %483 = arith.subf %479, %482 : vector<24x24xf32>
    %484 = math.exp %483 : vector<24x24xf32>
    %cst_318 = arith.constant dense<0.000000e+00> : vector<24xf32>
    %485 = vector.multi_reduction <add>, %484, %cst_318 [1] : vector<24x24xf32> to vector<24xf32>
    %486 = vector.shape_cast %485 : vector<24xf32> to vector<24x1xf32>
    %487 = tpu.reciprocal %486 {approx = true} : vector<24x1xf32> -> vector<24x1xf32>
    %488 = vector.broadcast %487 : vector<24x1xf32> to vector<24x24xf32>
    %489 = arith.mulf %484, %488 : vector<24x24xf32>
    %490 = arith.truncf %489 : vector<24x24xf32> to vector<24x24xbf16>
    %491 = arith.truncf %472 : vector<24x8xf32> to vector<24x8xbf16>
    %cst_319 = arith.constant dense<0.000000e+00> : vector<24x8xf32>
    %492 = tpu.matmul %490, %491, %cst_319 {dimension_numbers = #tpu.dot_dimension_numbers<[1], [0], [0], [1], [0, 0, 1, 1], [], []>} : vector<24x24xbf16>, vector<24x8xbf16>, vector<24x8xf32> -> vector<24x8xf32>
    %c1_320 = arith.constant 1 : index
    %c2_321 = arith.constant 2 : index
    %c0_322 = arith.constant 0 : index
    %c0_323 = arith.constant 0 : index
    %493 = vector.load %arg12[%c1_320, %c2_321, %c0_322, %c0_323] : memref<2x4x8x32xf32, #tpu.memory_space<vmem>>, vector<1x1x8x32xf32>
    %494 = vector.shape_cast %493 : vector<1x1x8x32xf32> to vector<8x32xf32>
    %495 = arith.truncf %492 : vector<24x8xf32> to vector<24x8xbf16>
    %496 = arith.truncf %494 : vector<8x32xf32> to vector<8x32xbf16>
    %cst_324 = arith.constant dense<0.000000e+00> : vector<24x32xf32>
    %497 = tpu.matmul %495, %496, %cst_324 {dimension_numbers = #tpu.dot_dimension_numbers<[1], [0], [0], [1], [0, 0, 1, 1], [], []>} : vector<24x8xbf16>, vector<8x32xbf16>, vector<24x32xf32> -> vector<24x32xf32>
    %498 = arith.addf %445, %497 : vector<24x32xf32>
    %c1_325 = arith.constant 1 : index
    %c3_326 = arith.constant 3 : index
    %c0_327 = arith.constant 0 : index
    %c0_328 = arith.constant 0 : index
    %499 = vector.load %arg6[%c1_325, %c3_326, %c0_327, %c0_328] : memref<2x4x32x8xf32, #tpu.memory_space<vmem>>, vector<1x1x32x8xf32>
    %500 = vector.shape_cast %499 : vector<1x1x32x8xf32> to vector<32x8xf32>
    %501 = arith.truncf %338 : vector<24x32xf32> to vector<24x32xbf16>
    %502 = arith.truncf %500 : vector<32x8xf32> to vector<32x8xbf16>
    %cst_329 = arith.constant dense<0.000000e+00> : vector<24x8xf32>
    %503 = tpu.matmul %501, %502, %cst_329 {dimension_numbers = #tpu.dot_dimension_numbers<[1], [0], [0], [1], [0, 0, 1, 1], [], []>} : vector<24x32xbf16>, vector<32x8xbf16>, vector<24x8xf32> -> vector<24x8xf32>
    %c1_330 = arith.constant 1 : index
    %c3_331 = arith.constant 3 : index
    %c0_332 = arith.constant 0 : index
    %c0_333 = arith.constant 0 : index
    %504 = vector.load %arg9[%c1_330, %c3_331, %c0_332, %c0_333] : memref<2x4x1x8xf32, #tpu.memory_space<vmem>>, vector<1x1x1x8xf32>
    %505 = vector.shape_cast %504 : vector<1x1x1x8xf32> to vector<1x8xf32>
    %506 = vector.broadcast %505 : vector<1x8xf32> to vector<24x8xf32>
    %507 = arith.addf %503, %506 : vector<24x8xf32>
    %c1_334 = arith.constant 1 : index
    %c3_335 = arith.constant 3 : index
    %c0_336 = arith.constant 0 : index
    %c0_337 = arith.constant 0 : index
    %508 = vector.load %arg7[%c1_334, %c3_335, %c0_336, %c0_337] : memref<2x4x32x8xf32, #tpu.memory_space<vmem>>, vector<1x1x32x8xf32>
    %509 = vector.shape_cast %508 : vector<1x1x32x8xf32> to vector<32x8xf32>
    %510 = arith.truncf %338 : vector<24x32xf32> to vector<24x32xbf16>
    %511 = arith.truncf %509 : vector<32x8xf32> to vector<32x8xbf16>
    %cst_338 = arith.constant dense<0.000000e+00> : vector<24x8xf32>
    %512 = tpu.matmul %510, %511, %cst_338 {dimension_numbers = #tpu.dot_dimension_numbers<[1], [0], [0], [1], [0, 0, 1, 1], [], []>} : vector<24x32xbf16>, vector<32x8xbf16>, vector<24x8xf32> -> vector<24x8xf32>
    %c1_339 = arith.constant 1 : index
    %c3_340 = arith.constant 3 : index
    %c0_341 = arith.constant 0 : index
    %c0_342 = arith.constant 0 : index
    %513 = vector.load %arg10[%c1_339, %c3_340, %c0_341, %c0_342] : memref<2x4x1x8xf32, #tpu.memory_space<vmem>>, vector<1x1x1x8xf32>
    %514 = vector.shape_cast %513 : vector<1x1x1x8xf32> to vector<1x8xf32>
    %515 = vector.broadcast %514 : vector<1x8xf32> to vector<24x8xf32>
    %516 = arith.addf %512, %515 : vector<24x8xf32>
    %c1_343 = arith.constant 1 : index
    %c3_344 = arith.constant 3 : index
    %c0_345 = arith.constant 0 : index
    %c0_346 = arith.constant 0 : index
    %517 = vector.load %arg8[%c1_343, %c3_344, %c0_345, %c0_346] : memref<2x4x32x8xf32, #tpu.memory_space<vmem>>, vector<1x1x32x8xf32>
    %518 = vector.shape_cast %517 : vector<1x1x32x8xf32> to vector<32x8xf32>
    %519 = arith.truncf %338 : vector<24x32xf32> to vector<24x32xbf16>
    %520 = arith.truncf %518 : vector<32x8xf32> to vector<32x8xbf16>
    %cst_347 = arith.constant dense<0.000000e+00> : vector<24x8xf32>
    %521 = tpu.matmul %519, %520, %cst_347 {dimension_numbers = #tpu.dot_dimension_numbers<[1], [0], [0], [1], [0, 0, 1, 1], [], []>} : vector<24x32xbf16>, vector<32x8xbf16>, vector<24x8xf32> -> vector<24x8xf32>
    %c1_348 = arith.constant 1 : index
    %c3_349 = arith.constant 3 : index
    %c0_350 = arith.constant 0 : index
    %c0_351 = arith.constant 0 : index
    %522 = vector.load %arg11[%c1_348, %c3_349, %c0_350, %c0_351] : memref<2x4x1x8xf32, #tpu.memory_space<vmem>>, vector<1x1x1x8xf32>
    %523 = vector.shape_cast %522 : vector<1x1x1x8xf32> to vector<1x8xf32>
    %524 = vector.broadcast %523 : vector<1x8xf32> to vector<24x8xf32>
    %525 = arith.addf %521, %524 : vector<24x8xf32>
    %526 = arith.truncf %507 : vector<24x8xf32> to vector<24x8xbf16>
    %527 = arith.truncf %516 : vector<24x8xf32> to vector<24x8xbf16>
    %cst_352 = arith.constant dense<0.000000e+00> : vector<24x24xf32>
    %528 = tpu.matmul %526, %527, %cst_352 {dimension_numbers = #tpu.dot_dimension_numbers<[1], [1], [0], [0], [0, 0, 1, 0], [], []>} : vector<24x8xbf16>, vector<24x8xbf16>, vector<24x24xf32> -> vector<24x24xf32>
    %cst_353 = arith.constant 0.353553385 : f32
    %529 = vector.broadcast %cst_353 : f32 to vector<24x24xf32>
    %530 = arith.mulf %528, %529 : vector<24x24xf32>
    %cst_354 = arith.constant -1.000000e+30 : f32
    %531 = vector.broadcast %cst_354 : f32 to vector<24x24xf32>
    %532 = arith.select %10, %530, %531 : vector<24x24xi1>, vector<24x24xf32>
    %cst_355 = arith.constant dense<0xFF800000> : vector<24xf32>
    %533 = vector.multi_reduction <maximumf>, %532, %cst_355 [1] : vector<24x24xf32> to vector<24xf32>
    %534 = vector.shape_cast %533 : vector<24xf32> to vector<24x1xf32>
    %535 = vector.broadcast %534 : vector<24x1xf32> to vector<24x24xf32>
    %536 = arith.subf %532, %535 : vector<24x24xf32>
    %537 = math.exp %536 : vector<24x24xf32>
    %cst_356 = arith.constant dense<0.000000e+00> : vector<24xf32>
    %538 = vector.multi_reduction <add>, %537, %cst_356 [1] : vector<24x24xf32> to vector<24xf32>
    %539 = vector.shape_cast %538 : vector<24xf32> to vector<24x1xf32>
    %540 = tpu.reciprocal %539 {approx = true} : vector<24x1xf32> -> vector<24x1xf32>
    %541 = vector.broadcast %540 : vector<24x1xf32> to vector<24x24xf32>
    %542 = arith.mulf %537, %541 : vector<24x24xf32>
    %543 = arith.truncf %542 : vector<24x24xf32> to vector<24x24xbf16>
    %544 = arith.truncf %525 : vector<24x8xf32> to vector<24x8xbf16>
    %cst_357 = arith.constant dense<0.000000e+00> : vector<24x8xf32>
    %545 = tpu.matmul %543, %544, %cst_357 {dimension_numbers = #tpu.dot_dimension_numbers<[1], [0], [0], [1], [0, 0, 1, 1], [], []>} : vector<24x24xbf16>, vector<24x8xbf16>, vector<24x8xf32> -> vector<24x8xf32>
    %c1_358 = arith.constant 1 : index
    %c3_359 = arith.constant 3 : index
    %c0_360 = arith.constant 0 : index
    %c0_361 = arith.constant 0 : index
    %546 = vector.load %arg12[%c1_358, %c3_359, %c0_360, %c0_361] : memref<2x4x8x32xf32, #tpu.memory_space<vmem>>, vector<1x1x8x32xf32>
    %547 = vector.shape_cast %546 : vector<1x1x8x32xf32> to vector<8x32xf32>
    %548 = arith.truncf %545 : vector<24x8xf32> to vector<24x8xbf16>
    %549 = arith.truncf %547 : vector<8x32xf32> to vector<8x32xbf16>
    %cst_362 = arith.constant dense<0.000000e+00> : vector<24x32xf32>
    %550 = tpu.matmul %548, %549, %cst_362 {dimension_numbers = #tpu.dot_dimension_numbers<[1], [0], [0], [1], [0, 0, 1, 1], [], []>} : vector<24x8xbf16>, vector<8x32xbf16>, vector<24x32xf32> -> vector<24x32xf32>
    %551 = arith.addf %498, %550 : vector<24x32xf32>
    %552 = arith.addf %312, %551 : vector<24x32xf32>
    %c1_363 = arith.constant 1 : index
    %c0_364 = arith.constant 0 : index
    %c0_365 = arith.constant 0 : index
    %553 = vector.load %arg13[%c1_363, %c0_364, %c0_365] : memref<2x1x32xf32, #tpu.memory_space<vmem>>, vector<1x1x32xf32>
    %554 = vector.shape_cast %553 : vector<1x1x32xf32> to vector<1x32xf32>
    %555 = vector.broadcast %554 : vector<1x32xf32> to vector<24x32xf32>
    %556 = arith.addf %552, %555 : vector<24x32xf32>
    %c1_366 = arith.constant 1 : index
    %c0_367 = arith.constant 0 : index
    %c0_368 = arith.constant 0 : index
    %557 = vector.load %arg14[%c1_366, %c0_367, %c0_368] : memref<2x1x32xf32, #tpu.memory_space<vmem>>, vector<1x1x32xf32>
    %558 = vector.shape_cast %557 : vector<1x1x32xf32> to vector<1x32xf32>
    %c1_369 = arith.constant 1 : index
    %c0_370 = arith.constant 0 : index
    %c0_371 = arith.constant 0 : index
    %559 = vector.load %arg15[%c1_369, %c0_370, %c0_371] : memref<2x1x32xf32, #tpu.memory_space<vmem>>, vector<1x1x32xf32>
    %560 = vector.shape_cast %559 : vector<1x1x32xf32> to vector<1x32xf32>
    %cst_372 = arith.constant dense<0.000000e+00> : vector<24xf32>
    %561 = vector.multi_reduction <add>, %556, %cst_372 [1] : vector<24x32xf32> to vector<24xf32>
    %562 = vector.shape_cast %561 : vector<24xf32> to vector<24x1xf32>
    %cst_373 = arith.constant 3.200000e+01 : f32
    %563 = vector.broadcast %cst_373 : f32 to vector<24x1xf32>
    %564 = arith.divf %562, %563 : vector<24x1xf32>
    %565 = vector.broadcast %564 : vector<24x1xf32> to vector<24x32xf32>
    %566 = arith.subf %556, %565 : vector<24x32xf32>
    %567 = arith.mulf %566, %566 : vector<24x32xf32>
    %cst_374 = arith.constant dense<0.000000e+00> : vector<24xf32>
    %568 = vector.multi_reduction <add>, %567, %cst_374 [1] : vector<24x32xf32> to vector<24xf32>
    %569 = vector.shape_cast %568 : vector<24xf32> to vector<24x1xf32>
    %cst_375 = arith.constant 3.200000e+01 : f32
    %570 = vector.broadcast %cst_375 : f32 to vector<24x1xf32>
    %571 = arith.divf %569, %570 : vector<24x1xf32>
    %572 = vector.broadcast %564 : vector<24x1xf32> to vector<24x32xf32>
    %573 = arith.subf %556, %572 : vector<24x32xf32>
    %cst_376 = arith.constant 9.99999997E-7 : f32
    %574 = vector.broadcast %cst_376 : f32 to vector<24x1xf32>
    %575 = arith.addf %571, %574 : vector<24x1xf32>
    %576 = math.rsqrt %575 : vector<24x1xf32>
    %577 = vector.broadcast %576 : vector<24x1xf32> to vector<24x32xf32>
    %578 = arith.mulf %573, %577 : vector<24x32xf32>
    %579 = vector.broadcast %558 : vector<1x32xf32> to vector<24x32xf32>
    %580 = arith.mulf %578, %579 : vector<24x32xf32>
    %581 = vector.broadcast %560 : vector<1x32xf32> to vector<24x32xf32>
    %582 = arith.addf %580, %581 : vector<24x32xf32>
    %c1_377 = arith.constant 1 : index
    %c0_378 = arith.constant 0 : index
    %c0_379 = arith.constant 0 : index
    %583 = vector.load %arg16[%c1_377, %c0_378, %c0_379] : memref<2x32x128xf32, #tpu.memory_space<vmem>>, vector<1x32x128xf32>
    %584 = vector.shape_cast %583 : vector<1x32x128xf32> to vector<32x128xf32>
    %585 = arith.truncf %582 : vector<24x32xf32> to vector<24x32xbf16>
    %586 = arith.truncf %584 : vector<32x128xf32> to vector<32x128xbf16>
    %cst_380 = arith.constant dense<0.000000e+00> : vector<24x128xf32>
    %587 = tpu.matmul %585, %586, %cst_380 {dimension_numbers = #tpu.dot_dimension_numbers<[1], [0], [0], [1], [0, 0, 1, 1], [], []>} : vector<24x32xbf16>, vector<32x128xbf16>, vector<24x128xf32> -> vector<24x128xf32>
    %c1_381 = arith.constant 1 : index
    %c0_382 = arith.constant 0 : index
    %c0_383 = arith.constant 0 : index
    %588 = vector.load %arg17[%c1_381, %c0_382, %c0_383] : memref<2x1x128xf32, #tpu.memory_space<vmem>>, vector<1x1x128xf32>
    %589 = vector.shape_cast %588 : vector<1x1x128xf32> to vector<1x128xf32>
    %590 = vector.broadcast %589 : vector<1x128xf32> to vector<24x128xf32>
    %591 = arith.addf %587, %590 : vector<24x128xf32>
    %592 = arith.mulf %591, %591 : vector<24x128xf32>
    %593 = arith.mulf %591, %592 : vector<24x128xf32>
    %cst_384 = arith.constant 4.471500e-02 : f32
    %594 = vector.broadcast %cst_384 : f32 to vector<24x128xf32>
    %595 = arith.mulf %594, %593 : vector<24x128xf32>
    %596 = arith.addf %591, %595 : vector<24x128xf32>
    %cst_385 = arith.constant 0.797884583 : f32
    %597 = vector.broadcast %cst_385 : f32 to vector<24x128xf32>
    %598 = arith.mulf %597, %596 : vector<24x128xf32>
    %599 = math.tanh %598 : vector<24x128xf32>
    %cst_386 = arith.constant 1.000000e+00 : f32
    %600 = vector.broadcast %cst_386 : f32 to vector<24x128xf32>
    %601 = arith.addf %600, %599 : vector<24x128xf32>
    %cst_387 = arith.constant 5.000000e-01 : f32
    %602 = vector.broadcast %cst_387 : f32 to vector<24x128xf32>
    %603 = arith.mulf %602, %601 : vector<24x128xf32>
    %604 = arith.mulf %591, %603 : vector<24x128xf32>
    %c1_388 = arith.constant 1 : index
    %c0_389 = arith.constant 0 : index
    %c0_390 = arith.constant 0 : index
    %605 = vector.load %arg18[%c1_388, %c0_389, %c0_390] : memref<2x128x32xf32, #tpu.memory_space<vmem>>, vector<1x128x32xf32>
    %606 = vector.shape_cast %605 : vector<1x128x32xf32> to vector<128x32xf32>
    %607 = arith.truncf %604 : vector<24x128xf32> to vector<24x128xbf16>
    %608 = arith.truncf %606 : vector<128x32xf32> to vector<128x32xbf16>
    %cst_391 = arith.constant dense<0.000000e+00> : vector<24x32xf32>
    %609 = tpu.matmul %607, %608, %cst_391 {dimension_numbers = #tpu.dot_dimension_numbers<[1], [0], [0], [1], [0, 0, 1, 1], [], []>} : vector<24x128xbf16>, vector<128x32xbf16>, vector<24x32xf32> -> vector<24x32xf32>
    %610 = arith.addf %556, %609 : vector<24x32xf32>
    %c1_392 = arith.constant 1 : index
    %c0_393 = arith.constant 0 : index
    %c0_394 = arith.constant 0 : index
    %611 = vector.load %arg19[%c1_392, %c0_393, %c0_394] : memref<2x1x32xf32, #tpu.memory_space<vmem>>, vector<1x1x32xf32>
    %612 = vector.shape_cast %611 : vector<1x1x32xf32> to vector<1x32xf32>
    %613 = vector.broadcast %612 : vector<1x32xf32> to vector<24x32xf32>
    %614 = arith.addf %610, %613 : vector<24x32xf32>
    %615 = vector.extract_strided_slice %614 {offsets = [0, 0], sizes = [1, 32], strides = [1, 1]} : vector<24x32xf32> to vector<1x32xf32>
    %c0_395 = arith.constant 0 : index
    %c0_396 = arith.constant 0 : index
    %616 = vector.load %arg20[%c0_395, %c0_396] : memref<1x32xf32, #tpu.memory_space<vmem>>, vector<1x32xf32>
    %c0_397 = arith.constant 0 : index
    %c0_398 = arith.constant 0 : index
    %617 = vector.load %arg21[%c0_397, %c0_398] : memref<1x32xf32, #tpu.memory_space<vmem>>, vector<1x32xf32>
    %cst_399 = arith.constant dense<0.000000e+00> : vector<1xf32>
    %618 = vector.multi_reduction <add>, %615, %cst_399 [1] : vector<1x32xf32> to vector<1xf32>
    %619 = vector.shape_cast %618 : vector<1xf32> to vector<1x1xf32>
    %cst_400 = arith.constant 3.200000e+01 : f32
    %620 = vector.broadcast %cst_400 : f32 to vector<1x1xf32>
    %621 = arith.divf %619, %620 : vector<1x1xf32>
    %622 = vector.broadcast %621 : vector<1x1xf32> to vector<1x32xf32>
    %623 = arith.subf %615, %622 : vector<1x32xf32>
    %624 = arith.mulf %623, %623 : vector<1x32xf32>
    %cst_401 = arith.constant dense<0.000000e+00> : vector<1xf32>
    %625 = vector.multi_reduction <add>, %624, %cst_401 [1] : vector<1x32xf32> to vector<1xf32>
    %626 = vector.shape_cast %625 : vector<1xf32> to vector<1x1xf32>
    %cst_402 = arith.constant 3.200000e+01 : f32
    %627 = vector.broadcast %cst_402 : f32 to vector<1x1xf32>
    %628 = arith.divf %626, %627 : vector<1x1xf32>
    %629 = vector.broadcast %621 : vector<1x1xf32> to vector<1x32xf32>
    %630 = arith.subf %615, %629 : vector<1x32xf32>
    %cst_403 = arith.constant 9.99999997E-7 : f32
    %631 = vector.broadcast %cst_403 : f32 to vector<1x1xf32>
    %632 = arith.addf %628, %631 : vector<1x1xf32>
    %633 = math.rsqrt %632 : vector<1x1xf32>
    %634 = vector.broadcast %633 : vector<1x1xf32> to vector<1x32xf32>
    %635 = arith.mulf %630, %634 : vector<1x32xf32>
    %636 = arith.mulf %635, %616 : vector<1x32xf32>
    %637 = arith.addf %636, %617 : vector<1x32xf32>
    %c0_404 = arith.constant 0 : index
    %c0_405 = arith.constant 0 : index
    %c0_406 = arith.constant 0 : index
    %638 = vector.load %arg26[%c0_404, %c0_405, %c0_406] : memref<1x1x32xf32, #tpu.memory_space<vmem>>, vector<1x1x32xf32>
    %639 = vector.shape_cast %638 : vector<1x1x32xf32> to vector<1x32xf32>
    %640 = vector.shape_cast %637 : vector<1x32xf32> to vector<1x1x32xf32>
    tpu.vector_store %arg26[%c0_404, %c0_405, %c0_406], %640 {strides = array<i32>} : memref<1x1x32xf32, #tpu.memory_space<vmem>>, vector<1x1x32xf32>,
    %c0_407 = arith.constant 0 : index
    %c0_408 = arith.constant 0 : index
    %641 = vector.load %arg22[%c0_407, %c0_408] : memref<32x16xf32, #tpu.memory_space<vmem>>, vector<32x16xf32>
    %642 = arith.truncf %637 : vector<1x32xf32> to vector<1x32xbf16>
    %643 = arith.truncf %641 : vector<32x16xf32> to vector<32x16xbf16>
    %cst_409 = arith.constant dense<0.000000e+00> : vector<1x16xf32>
    %644 = tpu.matmul %642, %643, %cst_409 {dimension_numbers = #tpu.dot_dimension_numbers<[1], [0], [0], [1], [0, 0, 1, 1], [], []>} : vector<1x32xbf16>, vector<32x16xbf16>, vector<1x16xf32> -> vector<1x16xf32>
    %c0_410 = arith.constant 0 : index
    %c0_411 = arith.constant 0 : index
    %645 = vector.load %arg23[%c0_410, %c0_411] : memref<1x16xf32, #tpu.memory_space<vmem>>, vector<1x16xf32>
    %646 = arith.addf %644, %645 : vector<1x16xf32>
    %cst_412 = arith.constant 0.000000e+00 : f32
    %647 = vector.broadcast %cst_412 : f32 to vector<1x16xf32>
    %648 = arith.maximumf %646, %647 : vector<1x16xf32>
    %c0_413 = arith.constant 0 : index
    %c0_414 = arith.constant 0 : index
    %649 = vector.load %arg24[%c0_413, %c0_414] : memref<16x32xf32, #tpu.memory_space<vmem>>, vector<16x32xf32>
    %650 = arith.truncf %648 : vector<1x16xf32> to vector<1x16xbf16>
    %651 = arith.truncf %649 : vector<16x32xf32> to vector<16x32xbf16>
    %cst_415 = arith.constant dense<0.000000e+00> : vector<1x32xf32>
    %652 = tpu.matmul %650, %651, %cst_415 {dimension_numbers = #tpu.dot_dimension_numbers<[1], [0], [0], [1], [0, 0, 1, 1], [], []>} : vector<1x16xbf16>, vector<16x32xbf16>, vector<1x32xf32> -> vector<1x32xf32>
    %c0_416 = arith.constant 0 : index
    %c0_417 = arith.constant 0 : index
    %653 = vector.load %arg25[%c0_416, %c0_417] : memref<1x32xf32, #tpu.memory_space<vmem>>, vector<1x32xf32>
    %654 = arith.addf %652, %653 : vector<1x32xf32>
    %c0_418 = arith.constant 0 : index
    %c0_419 = arith.constant 0 : index
    %c0_420 = arith.constant 0 : index
    %655 = vector.load %arg27[%c0_418, %c0_419, %c0_420] : memref<1x1x32xf32, #tpu.memory_space<vmem>>, vector<1x1x32xf32>
    %656 = vector.shape_cast %655 : vector<1x1x32xf32> to vector<1x32xf32>
    %657 = vector.shape_cast %654 : vector<1x32xf32> to vector<1x1x32xf32>
    tpu.vector_store %arg27[%c0_418, %c0_419, %c0_420], %657 {strides = array<i32>} : memref<1x1x32xf32, #tpu.memory_space<vmem>>, vector<1x1x32xf32>,
    return
  }
  func.func @transform_0(%arg0: i32) -> (i32, i32, i32) {
    %c0_i32 = arith.constant 0 : i32
    %c0_i32_0 = arith.constant 0 : i32
    %c0_i32_1 = arith.constant 0 : i32
    return %arg0, %c0_i32, %c0_i32_0 : i32, i32, i32
  }
  func.func @transform_1(%arg0: i32) -> (i32, i32) {
    %c0_i32 = arith.constant 0 : i32
    %c0_i32_0 = arith.constant 0 : i32
    %c0_i32_1 = arith.constant 0 : i32
    return %c0_i32, %c0_i32_0 : i32, i32
  }
  func.func @transform_2(%arg0: i32) -> (i32, i32) {
    %c0_i32 = arith.constant 0 : i32
    %c0_i32_0 = arith.constant 0 : i32
    %c0_i32_1 = arith.constant 0 : i32
    return %c0_i32, %c0_i32_0 : i32, i32
  }
  func.func @transform_3(%arg0: i32) -> (i32, i32, i32) {
    %c0_i32 = arith.constant 0 : i32
    %c0_i32_0 = arith.constant 0 : i32
    %c0_i32_1 = arith.constant 0 : i32
    %c0_i32_2 = arith.constant 0 : i32
    return %c0_i32, %c0_i32_0, %c0_i32_1 : i32, i32, i32
  }
  func.func @transform_4(%arg0: i32) -> (i32, i32, i32) {
    %c0_i32 = arith.constant 0 : i32
    %c0_i32_0 = arith.constant 0 : i32
    %c0_i32_1 = arith.constant 0 : i32
    %c0_i32_2 = arith.constant 0 : i32
    return %c0_i32, %c0_i32_0, %c0_i32_1 : i32, i32, i32
  }
  func.func @transform_5(%arg0: i32) -> (i32, i32, i32, i32) {
    %c0_i32 = arith.constant 0 : i32
    %c0_i32_0 = arith.constant 0 : i32
    %c0_i32_1 = arith.constant 0 : i32
    %c0_i32_2 = arith.constant 0 : i32
    %c0_i32_3 = arith.constant 0 : i32
    return %c0_i32, %c0_i32_0, %c0_i32_1, %c0_i32_2 : i32, i32, i32, i32
  }
  func.func @transform_6(%arg0: i32) -> (i32, i32, i32, i32) {
    %c0_i32 = arith.constant 0 : i32
    %c0_i32_0 = arith.constant 0 : i32
    %c0_i32_1 = arith.constant 0 : i32
    %c0_i32_2 = arith.constant 0 : i32
    %c0_i32_3 = arith.constant 0 : i32
    return %c0_i32, %c0_i32_0, %c0_i32_1, %c0_i32_2 : i32, i32, i32, i32
  }
  func.func @transform_7(%arg0: i32) -> (i32, i32, i32, i32) {
    %c0_i32 = arith.constant 0 : i32
    %c0_i32_0 = arith.constant 0 : i32
    %c0_i32_1 = arith.constant 0 : i32
    %c0_i32_2 = arith.constant 0 : i32
    %c0_i32_3 = arith.constant 0 : i32
    return %c0_i32, %c0_i32_0, %c0_i32_1, %c0_i32_2 : i32, i32, i32, i32
  }
  func.func @transform_8(%arg0: i32) -> (i32, i32, i32, i32) {
    %c0_i32 = arith.constant 0 : i32
    %c0_i32_0 = arith.constant 0 : i32
    %c0_i32_1 = arith.constant 0 : i32
    %c0_i32_2 = arith.constant 0 : i32
    %c0_i32_3 = arith.constant 0 : i32
    return %c0_i32, %c0_i32_0, %c0_i32_1, %c0_i32_2 : i32, i32, i32, i32
  }
  func.func @transform_9(%arg0: i32) -> (i32, i32, i32, i32) {
    %c0_i32 = arith.constant 0 : i32
    %c0_i32_0 = arith.constant 0 : i32
    %c0_i32_1 = arith.constant 0 : i32
    %c0_i32_2 = arith.constant 0 : i32
    %c0_i32_3 = arith.constant 0 : i32
    return %c0_i32, %c0_i32_0, %c0_i32_1, %c0_i32_2 : i32, i32, i32, i32
  }
  func.func @transform_10(%arg0: i32) -> (i32, i32, i32, i32) {
    %c0_i32 = arith.constant 0 : i32
    %c0_i32_0 = arith.constant 0 : i32
    %c0_i32_1 = arith.constant 0 : i32
    %c0_i32_2 = arith.constant 0 : i32
    %c0_i32_3 = arith.constant 0 : i32
    return %c0_i32, %c0_i32_0, %c0_i32_1, %c0_i32_2 : i32, i32, i32, i32
  }
  func.func @transform_11(%arg0: i32) -> (i32, i32, i32, i32) {
    %c0_i32 = arith.constant 0 : i32
    %c0_i32_0 = arith.constant 0 : i32
    %c0_i32_1 = arith.constant 0 : i32
    %c0_i32_2 = arith.constant 0 : i32
    %c0_i32_3 = arith.constant 0 : i32
    return %c0_i32, %c0_i32_0, %c0_i32_1, %c0_i32_2 : i32, i32, i32, i32
  }
  func.func @transform_12(%arg0: i32) -> (i32, i32, i32) {
    %c0_i32 = arith.constant 0 : i32
    %c0_i32_0 = arith.constant 0 : i32
    %c0_i32_1 = arith.constant 0 : i32
    %c0_i32_2 = arith.constant 0 : i32
    return %c0_i32, %c0_i32_0, %c0_i32_1 : i32, i32, i32
  }
  func.func @transform_13(%arg0: i32) -> (i32, i32, i32) {
    %c0_i32 = arith.constant 0 : i32
    %c0_i32_0 = arith.constant 0 : i32
    %c0_i32_1 = arith.constant 0 : i32
    %c0_i32_2 = arith.constant 0 : i32
    return %c0_i32, %c0_i32_0, %c0_i32_1 : i32, i32, i32
  }
  func.func @transform_14(%arg0: i32) -> (i32, i32, i32) {
    %c0_i32 = arith.constant 0 : i32
    %c0_i32_0 = arith.constant 0 : i32
    %c0_i32_1 = arith.constant 0 : i32
    %c0_i32_2 = arith.constant 0 : i32
    return %c0_i32, %c0_i32_0, %c0_i32_1 : i32, i32, i32
  }
  func.func @transform_15(%arg0: i32) -> (i32, i32, i32) {
    %c0_i32 = arith.constant 0 : i32
    %c0_i32_0 = arith.constant 0 : i32
    %c0_i32_1 = arith.constant 0 : i32
    %c0_i32_2 = arith.constant 0 : i32
    return %c0_i32, %c0_i32_0, %c0_i32_1 : i32, i32, i32
  }
  func.func @transform_16(%arg0: i32) -> (i32, i32, i32) {
    %c0_i32 = arith.constant 0 : i32
    %c0_i32_0 = arith.constant 0 : i32
    %c0_i32_1 = arith.constant 0 : i32
    %c0_i32_2 = arith.constant 0 : i32
    return %c0_i32, %c0_i32_0, %c0_i32_1 : i32, i32, i32
  }
  func.func @transform_17(%arg0: i32) -> (i32, i32, i32) {
    %c0_i32 = arith.constant 0 : i32
    %c0_i32_0 = arith.constant 0 : i32
    %c0_i32_1 = arith.constant 0 : i32
    %c0_i32_2 = arith.constant 0 : i32
    return %c0_i32, %c0_i32_0, %c0_i32_1 : i32, i32, i32
  }
  func.func @transform_18(%arg0: i32) -> (i32, i32, i32) {
    %c0_i32 = arith.constant 0 : i32
    %c0_i32_0 = arith.constant 0 : i32
    %c0_i32_1 = arith.constant 0 : i32
    %c0_i32_2 = arith.constant 0 : i32
    return %c0_i32, %c0_i32_0, %c0_i32_1 : i32, i32, i32
  }
  func.func @transform_19(%arg0: i32) -> (i32, i32) {
    %c0_i32 = arith.constant 0 : i32
    %c0_i32_0 = arith.constant 0 : i32
    %c0_i32_1 = arith.constant 0 : i32
    return %c0_i32, %c0_i32_0 : i32, i32
  }
  func.func @transform_20(%arg0: i32) -> (i32, i32) {
    %c0_i32 = arith.constant 0 : i32
    %c0_i32_0 = arith.constant 0 : i32
    %c0_i32_1 = arith.constant 0 : i32
    return %c0_i32, %c0_i32_0 : i32, i32
  }
  func.func @transform_21(%arg0: i32) -> (i32, i32) {
    %c0_i32 = arith.constant 0 : i32
    %c0_i32_0 = arith.constant 0 : i32
    %c0_i32_1 = arith.constant 0 : i32
    return %c0_i32, %c0_i32_0 : i32, i32
  }
  func.func @transform_22(%arg0: i32) -> (i32, i32) {
    %c0_i32 = arith.constant 0 : i32
    %c0_i32_0 = arith.constant 0 : i32
    %c0_i32_1 = arith.constant 0 : i32
    return %c0_i32, %c0_i32_0 : i32, i32
  }
  func.func @transform_23(%arg0: i32) -> (i32, i32) {
    %c0_i32 = arith.constant 0 : i32
    %c0_i32_0 = arith.constant 0 : i32
    %c0_i32_1 = arith.constant 0 : i32
    return %c0_i32, %c0_i32_0 : i32, i32
  }
  func.func @transform_24(%arg0: i32) -> (i32, i32) {
    %c0_i32 = arith.constant 0 : i32
    %c0_i32_0 = arith.constant 0 : i32
    %c0_i32_1 = arith.constant 0 : i32
    return %c0_i32, %c0_i32_0 : i32, i32
  }
  func.func @transform_25(%arg0: i32) -> (i32, i32, i32) {
    %c0_i32 = arith.constant 0 : i32
    %c0_i32_0 = arith.constant 0 : i32
    %c0_i32_1 = arith.constant 0 : i32
    return %arg0, %c0_i32, %c0_i32_0 : i32, i32, i32
  }
  func.func @transform_26(%arg0: i32) -> (i32, i32, i32) {
    %c0_i32 = arith.constant 0 : i32
    %c0_i32_0 = arith.constant 0 : i32
    %c0_i32_1 = arith.constant 0 : i32
    return %arg0, %c0_i32, %c0_i32_0 : i32, i32, i32
  }
}

</mosaic_0001>

<bundles_post_ra>
// kernel: self_supervised_forward.1
= control target key start
LH: loop header
LB: loop body
LE: loop exit
PB: predicated region body
PF: predicated region fallthrough
CT: control target
= control target key end

     0   :  { %s5435_s0 = inlined_call_operand.vmem [shape: f32[2,24,48], index: 0, kind: input, shape index: {}]   ;;  %s5436_s1 = inlined_call_operand.vmem [shape: f32[24,32], index: 1, kind: input, shape index: {}]   ;;  %s5437_s2 = inlined_call_operand.vmem [shape: f32[48,32], index: 2, kind: input, shape index: {}]   ;;  %s5438_s3 = inlined_call_operand.vmem [shape: f32[2,1,32], index: 3, kind: input, shape index: {}]   ;;  %s5439_s4 = inlined_call_operand.vmem [shape: f32[2,1,32], index: 4, kind: input, shape index: {}]   ;;  %s5440_s5 = inlined_call_operand.vmem [shape: f32[2,4,32,8], index: 5, kind: input, shape index: {}]   ;;  %s5441_s6 = inlined_call_operand.vmem [shape: f32[2,4,32,8], index: 6, kind: input, shape index: {}]   ;;  %s5442_s7 = inlined_call_operand.vmem [shape: f32[2,4,32,8], index: 7, kind: input, shape index: {}]   ;;  %s5443_s8 = inlined_call_operand.vmem [shape: f32[2,4,1,8], index: 8, kind: input, shape index: {}]   ;;  %s5444_s9 = inlined_call_operand.vmem [shape: f32[2,4,1,8], index: 9, kind: input, shape index: {}]   ;;  %s5445_s10 = inlined_call_operand.vmem [shape: f32[2,4,1,8], index: 10, kind: input, shape index: {}]   ;;  %s5446_s11 = inlined_call_operand.vmem [shape: f32[2,4,8,32], index: 11, kind: input, shape index: {}]   ;;  %s5447_s12 = inlined_call_operand.vmem [shape: f32[2,1,32], index: 12, kind: input, shape index: {}]   ;;  %s5448_s13 = inlined_call_operand.vmem [shape: f32[2,1,32], index: 13, kind: input, shape index: {}]   ;;  %s5449_s14 = inlined_call_operand.vmem [shape: f32[2,1,32], index: 14, kind: input, shape index: {}]   ;;  %s5450_s15 = inlined_call_operand.vmem [shape: f32[2,32,128], index: 15, kind: input, shape index: {}]   ;;  %s5451_s16 = inlined_call_operand.vmem [shape: f32[2,1,128], index: 16, kind: input, shape index: {}]   ;;  %s5452_s17 = inlined_call_operand.vmem [shape: f32[2,128,32], index: 17, kind: input, shape index: {}]   ;;  %s5453_s18 = inlined_call_operand.vmem [shape: f32[2,1,32], index: 18, kind: input, shape index: {}]   ;;  %s5454_s19 = inlined_call_operand.vmem [shape: f32[1,32], index: 19, kind: input, shape index: {}]   ;;  %s5455_s20 = inlined_call_operand.vmem [shape: f32[1,32], index: 20, kind: input, shape index: {}]   ;;  %s5456_s21 = inlined_call_operand.vmem [shape: f32[32,16], index: 21, kind: input, shape index: {}]   ;;  %s5457_s22 = inlined_call_operand.vmem [shape: f32[1,16], index: 22, kind: input, shape index: {}]   ;;  %s5458_s23 = inlined_call_operand.vmem [shape: f32[16,32], index: 23, kind: input, shape index: {}]   ;;  %s5459_s24 = inlined_call_operand.vmem [shape: f32[1,32], index: 24, kind: input, shape index: {}]   ;;  %s5460_s25 = inlined_call_operand.hbm [shape: f32[2,1,32], index: 25, kind: output, shape index: {0}]   ;;  %s5461_s26 = inlined_call_operand.hbm [shape: f32[2,1,32], index: 26, kind: output, shape index: {1}]  }
   0x1   :  { %5490 = sst [smem:[#allocation16_spill]] %s5435_s0 }
   0x2   :  { %5491 = sst [smem:[#allocation17_spill]] %s5436_s1 }
   0x3   :  { %5492 = sst [smem:[#allocation18_spill]] %s5437_s2 }
   0x4   :  { %5493 = sst [smem:[#allocation19_spill]] %s5438_s3 }
   0x5   :  { %5494 = sst [smem:[#allocation20_spill]] %s5439_s4 }
   0x6   :  { %5495 = sst [smem:[#allocation21_spill]] %s5440_s5 }
   0x7   :  { %5496 = sst [smem:[#allocation22_spill]] %s5441_s6 }
   0x8   :  { %5497 = sst [smem:[#allocation23_spill]] %s5442_s7 }
   0x9   :  { %5498 = sst [smem:[#allocation24_spill]] %s5443_s8 }
   0xa   :  { %5499 = sst [smem:[#allocation25_spill]] %s5444_s9 }
   0xb   :  { %5500 = sst [smem:[#allocation26_spill]] %s5445_s10 }
   0xc   :  { %5501 = sst [smem:[#allocation27_spill]] %s5446_s11 }
   0xd   :  { %5502 = sst [smem:[#allocation28_spill]] %s5447_s12 }
   0xe   :  { %5503 = sst [smem:[#allocation29_spill]] %s5448_s13 }
   0xf   :  { %5504 = sst [smem:[#allocation30_spill]] %s5449_s14 }
  0x10   :  { %5505 = sst [smem:[#allocation31_spill]] %s5450_s15 }
  0x11   :  { %5506 = sst [smem:[#allocation32_spill]] %s5455_s20 }
  0x12   :  { %5507 = sst [smem:[#allocation33_spill]] %s5457_s22 }
  0x13   :  { %5508 = sst [smem:[#allocation34_spill]] %s5459_s24 }
  0x14   :  { %5509 = sst [smem:[#allocation35_spill]] %s5460_s25 }
  0x15   :  { %5510 = sst [smem:[#allocation36_spill]] %s5461_s26 }
  0x16   :  { %32 = vsyncpa [#allocation3], 0 }
  0x17   :  { %34 = vsyncpa [#allocation3 + $0x1], 0 }
  0x18   :  { %35 = vsyncpa [#allocation5], 0 }
  0x19   :  { %37 = vsyncpa [#allocation5 + $0x1], 0  ;;  %s4155_s27 = smov 0   ;;  %s4157_s3 = smov 0  }
  0x1a   :  { %s4159_s7 = smov 0   ;;  %s4161_s28 = smov 0  }
  0x1b LB: > { %5511 = sst [smem:[#allocation8_spill]] %s4005_s27  ;;  %s4176_s8 = sadd.s32 4294967295, %s4017_s28   ;;  %s4017_s28 = sphi %s4161_s28, %s5554_s28   ;;  %s4013_s7 = sphi %s4159_s7, %s5556_s7   ;;  %s4009_s3 = sphi %s4157_s3, %s5558_s3   ;;  %s4005_s27 = sphi %s4155_s27, %s5557_s27  }
  0x1c   : > { %5512 = sst [smem:[#allocation9_spill]] %s4013_s7  ;;  %s3451_s4 = sadd.s32 4294967294, %s4017_s28  }
  0x1d   : > { %5513 = sst [smem:[#allocation10_spill]] %s4017_s28  ;;  %s4180_s29 = sadd.s32 1, %s4017_s28  }
  0x1e   : > { %5514 = sst [smem:[#allocation11_spill]] %s4176_s8  ;;  %s580_s0 = sadd.s32 1, %s4013_s7 }
  0x1f   : > { %5515 = sst [smem:[#allocation12_spill]] %s4180_s29  ;;  %s577_s9 = ssub.s32 %s4017_s28, %s4180_s29 }
  0x20   : > { %p590_p0 = scmp.ne.s32.totalorder %s4013_s7, %s4009_s3  ;;  %p578_p1 = scmp.eq.s32.totalorder %s577_s9, 0 }
  0x21   : > { %p591_p2 = scmp.eq.s32.totalorder %s4176_s8, 1  ;;  %p596_p3 = scmp.ne.s32.totalorder %s4009_s3, %s4005_s27 }
  0x22   : > { %p597_p4 = scmp.eq.s32.totalorder %s3451_s4, 1  ;;  %p3454_p7 = scmp.ge.s32.totalorder %s4017_s28, 1 }
  0x23   : > { %s4191_s30 = scalar_select %p578_p1, %s4013_s7, %s580_s0  }
  0x24   : > { %p4193_p5 = por %p591_p2, %p590_p0  ;;  %p4197_p6 = por %p597_p4, %p596_p3 }
  0x25   : > { %5516 = sst [smem:[#allocation13_spill]] %s4191_s30  ;;  %p721_p8 = scmp.lt.s32.totalorder %s4017_s28, 3 }
  0x26   : > { %s5517_s2 = scalar_select %p4193_p5, 1, 0 }
  0x27   : > { %s5519_s5 = scalar_select %p4197_p6, 1, 0 }
  0x28   : > { %5518 = sst [smem:[#allocation14_spill]] %s5517_s2  ;;  %p722_p9 = pnand %p3454_p7, %p721_p8 }
  0x29   : > { %5520 = sst [smem:[#allocation15_spill]] %s5519_s5  ;;  %p794_p10 = scmp.lt.s32.totalorder (!%p722_p9), %s4176_s8, 1 }
  0x2a   : > { %725 = sbr.rel (%p722_p9) target bundleno = 7290 (0x1c7a), region = 120  ;;  %s5521_s1 = sld [smem:[#allocation18_spill]] (!%p722_p9) }
  0x2b   : > { %s5522_s28 = sld [smem:[#allocation16_spill]] (!%p722_p9)  ;;  %s5372_s22 = sand.u32 (!%p722_p9), 1, %s4009_s3  }
  0x2c   : > { %s5523_s29 = sld [smem:[#allocation17_spill]] (!%p722_p9)  ;;  %s787_s9 = scalar_lea.vmem (!%p722_p9), [#allocation2], %s5372_s22 }
  0x2d   : > { %s5527_s26 = sld [smem:[#allocation23_spill]] (!%p722_p9) }
  0x2e   : > { %s5528_s27 = sld [smem:[#allocation19_spill]] (!%p722_p9) }
  0x2f   : > { %s795_s10 = scalar_select %p794_p10, %s4176_s8, 1  ;;  %vm817_vm0 = vcmask 392192   ;;  %vm847_vm1 = vcmask 261120   ;;  %v4019_v27 = vmov 32.0   ;;  %vm1110_vm12 = vcmask 1043456  }
  0x30   : > { %v807_v0 = vld [vmem:[%s5521_s1 + $0x20] sm:$0xff]  ;;  %v808_v1 = vld [vmem:[%s5521_s1 + $0x28] sm:$0xff]  ;;  %v805_v2 = vld [vmem:[%s5521_s1 + $0x10] sm:$0xff]  ;;  %3787 = vrcp.f32 %v4019_v27  ;;  %s5531_s30 = sld [smem:[#allocation25_spill]]  ;;  %vm1029_vm13 = vcmask 64512   ;;  %vm1066_vm15 = vcmask 195584  }
  0x31   : > { %v813_v3 = vpack.c.bf16 %v808_v1, %v807_v0  ;;  %v806_v4 = vld [vmem:[%s5521_s1 + $0x18] sm:$0xff]  ;;  %v803_v5 = vld [vmem:[%s5521_s1] sm:$0xff]  ;;  %v804_v7 = vld [vmem:[%s5521_s1 + $0x8] sm:$0xff]  ;;  %s3703_s0 = smul.u32 24, %s795_s10  ;;  %s5530_s10 = sld [smem:[#allocation20_spill]] }
  0x32   : > { %v812_v6 = vpack.c.bf16 %v806_v4, %v805_v2  ;;  %v811_v8 = vpack.c.bf16 %v804_v7, %v803_v5  ;;  %v814_v14 = vld [vmem:[%s5523_s29] sm:$0xff]  ;;  %v815_v18 = vld [vmem:[%s5523_s29 + $0x8] sm:$0xff]  ;;  %v816_v22 = vld [vmem:[%s5523_s29 + $0x10] sm:$0xff]  ;;  %s5532_s29 = sld [smem:[#allocation26_spill]] }
  0x33   : > { %829 = vmatpush.bf16.msra.mxu0 %v813_v3  ;;  %s798_s24 = scalar_lea.vmem %s5522_s28, %s3703_s0  ;;  %s5524_s0 = sld [smem:[#allocation21_spill]]  ;;  %v999_v54 = vld [vmem:[%s5527_s26 + $0x10] sm:$0xff]  ;;  %v1000_v55 = vld [vmem:[%s5527_s26 + $0x18] sm:$0xff]  ;;  %v997_v1 = vld [vmem:[%s5527_s26] sm:$0xff] }
  0x34   : > { %v800_v9 = vld [vmem:[%s798_s24] sm:$0xff]  ;;  %v801_v10 = vld [vmem:[%s798_s24 + $0x8] sm:$0xff]  ;;  %v802_v12 = vld [vmem:[%s798_s24 + $0x10] sm:$0xff]  ;;  %s5525_s28 = sld [smem:[#allocation22_spill]]  ;;  %v1002_v57 = vpack.c.bf16 %v1000_v55, %v999_v54  ;;  %s5529_s24 = smov %s5528_s27 }
  0x35   : > { %v809_v11 = vpack.c.bf16 %v801_v10, %v800_v9  ;;  %v810_v13 = vpack.c.bf16 %v802_v12, %v802_v12  ;;  %v998_v2 = vld [vmem:[%s5527_s26 + $0x8] sm:$0xff]  ;;  %s5533_s7 = sld [smem:[#allocation24_spill]] }
  0x36   : > { %v3788_v28 = vpop.eup %3787  ;;  %1013 = vmatpush.bf16.msra.mxu3 %v1002_v57  ;;  %v1001_v5 = vpack.c.bf16 %v998_v2, %v997_v1  ;;  %s5535_s11 = sld [smem:[#allocation27_spill]] }
  0x37   : > { %830 = vmatpush.bf16.msra.mxu0 %v812_v6  ;;  %v858_v29 = vmul.f32 32.0, %v3788_v28  ;;  %vm862_vm2 = vweird.f32 %v3788_v28  ;;  %s5536_s12 = sld [smem:[#allocation28_spill]] }
  0x38   : > { %s5537_s15 = sld [smem:[#allocation31_spill]] }
  0x39   : > { %v859_v30 = vsub.f32 1.0, %v858_v29  ;;  %v935_v49 = vld [vmem:[%s5524_s0 + $0x10] sm:$0xff]  ;;  %v936_v50 = vld [vmem:[%s5524_s0 + $0x18] sm:$0xff]  ;;  %v933_v60 = vld [vmem:[%s5524_s0] sm:$0xff]  ;;  %s5538_s13 = sld [smem:[#allocation29_spill]] }
  0x3a   : > { %s5526_s5 = smov %s5525_s28  ;;  %v971_v51 = vld [vmem:[%s5525_s28 + $0x10] sm:$0xff]  ;;  %v940_v52 = vpack.c.bf16 %v936_v50, %v935_v49  ;;  %v934_v61 = vld [vmem:[%s5524_s0 + $0x8] sm:$0xff]  ;;  %1014 = vmatpush.bf16.msra.mxu3 %v1001_v5  ;;  %v3750_v50 = vld [vmem:[%s5530_s10] ss:$0 sm:$0xff]  ;;  %s5539_s14 = sld [smem:[#allocation30_spill]] }
  0x3b   : > { %831 = vmatpush.bf16.msra.mxu0 %v811_v8  ;;  %v860_v31 = vmul.f32 %v3788_v28, %v859_v30  ;;  %v972_v53 = vld [vmem:[%s5526_s5 + $0x18] sm:$0xff]  ;;  %v969_v62 = vld [vmem:[%s5526_s5] sm:$0xff]  ;;  %v939_v63 = vpack.c.bf16 %v934_v61, %v933_v60  ;;  %v970_v0 = vld [vmem:[%s5526_s5 + $0x8] sm:$0xff]  ;;  %s5534_s8 = smov %s5533_s7  ;;  %s5542_s6 = sld [smem:[#allocation32_spill]] }
  0x3c   : > { %v974_v56 = vpack.c.bf16 %v972_v53, %v971_v51  ;;  %3701 = vmatpush.bf16.msra.mxu1 %v940_v52  ;;  %v973_v4 = vpack.c.bf16 %v970_v0, %v969_v62  ;;  %v3477_v12 = vld [vmem:[%s5526_s5 + $0x30] sm:$0xff]  ;;  %s5543_s4 = sld [smem:[#allocation11_spill]] }
  0x3d   : > { %v861_v32 = vadd.f32 %v3788_v28, %v860_v31  ;;  %s5546_s28 = sld [smem:[#allocation35_spill]] }
  0x3e   : > { %3456 = vmatmul.msk.bf16.vlgmr.msra.gmra.mxu0 %vm817_vm0, %v809_v11  ;;  %985 = vmatpush.bf16.msra.mxu2 %v974_v56 }
  0x3f   : > { %v4247_v33 = vsel %vm862_vm2, %v3788_v28, %v861_v32  ;;  %957 = vmatpush.bf16.msrb.mxu0 %v940_v52  ;;  %v3470_v32 = vld [vmem:[%s5524_s0 + $0x30] sm:$0xff] }
  0x40   : > { %3702 = vmatpush.bf16.msra.mxu1 %v939_v63 }
  0x42   : > { %986 = vmatpush.bf16.msra.mxu2 %v973_v4 }
  0x43   : > { %958 = vmatpush.bf16.msrb.mxu0 %v939_v63 }
  0x4e   : > { %3457 = vmatmul.msk.bf16.gmra.mxu0 %vm817_vm0, %v810_v13  ;;  %v3478_v13 = vld [vmem:[%s5526_s5 + $0x38] sm:$0xff] }
  0xbb   : > { %v833_v15 = vpop.f32.mrf.mxu0 }
  0xbc   : > { %v4229_v16 = vadd.f32 %v833_v15, %v814_v14  ;;  %v1172_v14 = vpack.c.bf16 %v3478_v13, %v3477_v12  ;;  %v3475_v15 = vld [vmem:[%s5526_s5 + $0x20] sm:$0xff] }
  0xbe   : > { %v848_v17 = vsel %vm847_vm1, %v4229_v16, 0.0  ;;  %1184 = vmatpush.bf16.msra.mxu0 %v1172_v14 }
  0xbf   : > { %849 = vadd.xlane.f32.xlu0 %v848_v17  ;;  %v3476_v17 = vld [vmem:[%s5526_s5 + $0x28] sm:$0xff] }
  0xc3   : > { %v835_v19 = vpop.f32.mrf.mxu0 }
  0xc4   : > { %v4236_v20 = vadd.f32 %v835_v19, %v815_v18 }
  0xc6   : > { %v851_v21 = vsel %vm847_vm1, %v4236_v20, 0.0 }
  0xc7   : > { %852 = vadd.xlane.f32.xlu0 %v851_v21 }
  0xcb   : > { %v838_v23 = vpop.f32.mrf.mxu0 }
  0xcc   : > { %v4243_v24 = vadd.f32 %v838_v23, %v816_v22  ;;  %v1171_v22 = vpack.c.bf16 %v3476_v17, %v3475_v15 }
  0xce   : > { %v854_v25 = vsel %vm847_vm1, %v4243_v24, 0.0  ;;  %1185 = vmatpush.bf16.msra.mxu0 %v1171_v22 }
  0xcf   : > { %855 = vadd.xlane.f32.xlu1 %v854_v25 }
  0xd3   : > { %v840_v26 = vpop.f32.mrf.mxu0 }
 0x132   : > { %v850_v34 = vpop.xlane.xlu0 %849 }
 0x133   : > { %v864_v35 = vmul.f32 %v4247_v33, %v850_v34  ;;  %v3471_v34 = vld [vmem:[%s5524_s0 + $0x38] sm:$0xff] }
 0x135   : > { %v4251_v36 = vsub.f32 %v4229_v16, %v864_v35  ;;  %v3468_v35 = vld [vmem:[%s5524_s0 + $0x20] sm:$0xff] }
 0x137   : > { %v870_v37 = vmul.f32 %v4251_v36, %v4251_v36 }
 0x139   : > { %v873_v38 = vsel %vm847_vm1, %v870_v37, 0.0  ;;  %v1142_v37 = vpack.c.bf16 %v3471_v34, %v3470_v32 }
 0x13a   : > { %874 = vadd.xlane.f32.xlu1 %v873_v38  ;;  %v853_v39 = vpop.xlane.xlu0 %852  ;;  %v3469_v38 = vld [vmem:[%s5524_s0 + $0x28] sm:$0xff] }
 0x13b   : > { %v865_v40 = vmul.f32 %v4247_v33, %v853_v39  ;;  %1154 = vmatpush.bf16.msrb.mxu3 %v1142_v37  ;;  %v3482_v37 = vld [vmem:[%s5527_s26 + $0x20] sm:$0xff] }
 0x13d   : > { %v4258_v41 = vsub.f32 %v4236_v20, %v865_v40 }
 0x13f   : > { %v871_v42 = vmul.f32 %v4258_v41, %v4258_v41 }
 0x141   : > { %v876_v43 = vsel %vm847_vm1, %v871_v42, 0.0  ;;  %v3749_v42 = vld [vmem:[%s5528_s27] ss:$0 sm:$0xff]  ;;  %s5544_s27 = sld [smem:[#allocation33_spill]] }
 0x142   : > { %v856_v44 = vpop.xlane.xlu1 %855  ;;  %877 = vadd.xlane.f32.xlu2 %v876_v43 }
 0x143   : > { %v866_v45 = vmul.f32 %v4247_v33, %v856_v44  ;;  %v1141_v44 = vpack.c.bf16 %v3469_v38, %v3468_v35  ;;  %v3483_v38 = vld [vmem:[%s5527_s26 + $0x28] sm:$0xff] }
 0x145   : > { %v4265_v46 = vsub.f32 %v4243_v24, %v866_v45  ;;  %1155 = vmatpush.bf16.msrb.mxu3 %v1141_v44 }
 0x147   : > { %v872_v47 = vmul.f32 %v4265_v46, %v4265_v46 }
 0x149   : > { %v879_v48 = vsel %vm847_vm1, %v872_v47, 0.0 }
 0x14a   : > { %880 = vadd.xlane.f32.xlu2 %v879_v48 }
 0x1ad   : > { %v875_v58 = vpop.xlane.xlu1 %874 }
 0x1ae   : > { %v882_v59 = vmul.f32 %v875_v58, %v4247_v33 }
 0x1b0   : > { %v885_v3 = vadd.f32 1e-06, %v882_v59 }
 0x1b2   : > { %3789 = vrsqrt.f32 %v885_v3  ;;  %vm894_vm4 = vweird.f32 %v885_v3 }
 0x1b5   : > { %v878_v6 = vpop.xlane.xlu2 %877 }
 0x1b6   : > { %v883_v7 = vmul.f32 %v878_v6, %v4247_v33 }
 0x1b8   : > { %v3790_v8 = vpop.eup %3789  ;;  %v886_v9 = vadd.f32 1e-06, %v883_v7  ;;  %v3752_v7 = vld [vmem:[%s5531_s30] ss:$0 sm:$0xff] }
 0x1b9   : > { %v889_v10 = vmul.f32 %v3790_v8, %v885_v3  ;;  %vm895_vm3 = vweird.f32 %v3790_v8 }
 0x1ba   : > { %3791 = vrsqrt.f32 %v886_v9  ;;  %vm896_vm5 = vmor %vm894_vm4, %vm895_vm3  ;;  %vm904_vm7 = vweird.f32 %v886_v9 }
 0x1bb   : > { %v890_v11 = vmul.f32 %v3790_v8, %v889_v10 }
 0x1bd   : > { %v891_v18 = vmul.f32 0.5, %v890_v11  ;;  %v881_v19 = vpop.xlane.xlu2 %880 }
 0x1be   : > { %v884_v21 = vmul.f32 %v881_v19, %v4247_v33 }
 0x1bf   : > { %v892_v23 = vsub.f32 1.5, %v891_v18 }
 0x1c0   : > { %v3792_v25 = vpop.eup %3791  ;;  %v887_v26 = vadd.f32 1e-06, %v884_v21 }
 0x1c1   : > { %v893_v27 = vmul.f32 %v3790_v8, %v892_v23  ;;  %v899_v28 = vmul.f32 %v3792_v25, %v886_v9  ;;  %vm905_vm6 = vweird.f32 %v3792_v25 }
 0x1c2   : > { %3793 = vrsqrt.f32 %v887_v26  ;;  %vm906_vm8 = vmor %vm904_vm7, %vm905_vm6  ;;  %vm914_vm10 = vweird.f32 %v887_v26 }
 0x1c3   : > { %v900_v29 = vmul.f32 %v3792_v25, %v899_v28  ;;  %v897_v30 = vsel %vm896_vm5, %v3790_v8, %v893_v27  ;;  %v3753_v8 = vld [vmem:[%s5532_s29] ss:$0 sm:$0xff] }
 0x1c4   : > { %v918_v43 = vmul.f32 %v897_v30, %v4251_v36  ;;  %v3484_v30 = vld [vmem:[%s5527_s26 + $0x30] sm:$0xff] }
 0x1c5   : > { %v901_v31 = vmul.f32 0.5, %v900_v29 }
 0x1c6   : > { %v924_v51 = vmul.f32 %v3749_v42, %v918_v43 }
 0x1c7   : > { %v902_v39 = vsub.f32 1.5, %v901_v31  ;;  %v3485_v31 = vld [vmem:[%s5527_s26 + $0x38] sm:$0xff] }
 0x1c8   : > { %v3794_v40 = vpop.eup %3793  ;;  %v930_v36 = vadd.f32 %v3750_v50, %v924_v51  ;;  %v1202_v35 = vpack.c.bf16 %v3485_v31, %v3484_v30 }
 0x1c9   : > { %v903_v45 = vmul.f32 %v3792_v25, %v902_v39  ;;  %v909_v47 = vmul.f32 %v3794_v40, %v887_v26  ;;  %vm915_vm9 = vweird.f32 %v3794_v40  ;;  %v3754_v26 = vld [vmem:[%s5531_s30 + $0x1] ss:$0 sm:$0xff]  ;;  %v3751_v39 = vld [vmem:[%s5533_s7] ss:$0 sm:$0xff] }
 0x1ca   : > { %vm916_vm11 = vmor %vm914_vm10, %vm915_vm9 }
 0x1cb   : > { %v907_v48 = vsel %vm906_vm8, %v3792_v25, %v903_v45  ;;  %v910_v49 = vmul.f32 %v3794_v40, %v909_v47  ;;  %v1201_v47 = vpack.c.bf16 %v3483_v38, %v3482_v37 }
 0x1cc   : > { %v919_v52 = vmul.f32 %v907_v48, %v4258_v41 }
 0x1cd   : > { %v911_v53 = vmul.f32 0.5, %v910_v49 }
 0x1ce   : > { %v925_v54 = vmul.f32 %v3749_v42, %v919_v52 }
 0x1cf   : > { %v912_v55 = vsub.f32 1.5, %v911_v53 }
 0x1d0   : > { %v931_v56 = vadd.f32 %v3750_v50, %v925_v54 }
 0x1d1   : > { %v913_v57 = vmul.f32 %v3794_v40, %v912_v55 }
 0x1d2   : > { %v4341_v58 = vpack.c.bf16 %v931_v56, %v930_v36 }
 0x1d3   : > { %v917_v59 = vsel %vm916_vm11, %v3794_v40, %v913_v57 }
 0x1d4   : > { %v920_v60 = vmul.f32 %v917_v59, %v4265_v46  ;;  %3458 = vmatmul.msk.bf16.vlgmr.msrb.gmra.mxu0 %vm847_vm1, %v4341_v58  ;;  %3460 = vmatmul.msk.bf16.vlgmr.msra.gmra.mxu2 %vm847_vm1, %v4341_v58 }
 0x1d5   : > { %3462 = vmatmul.msk.bf16.vlgmr.msra.gmra.mxu3 %vm847_vm1, %v4341_v58 }
 0x1d6   : > { %v926_v41 = vmul.f32 %v3749_v42, %v920_v60  ;;  %v842_v60 = vlaneseq }
 0x1d8   : > { %v932_v61 = vadd.f32 %v3750_v50, %v926_v41  ;;  %v4407_v41 = vand.u32 127, %v842_v60 }
 0x1da   : > { %v4350_v62 = vpack.c.bf16 %v932_v61, %v932_v61  ;;  %vm844_vm14 = vcmp.lt.s32.totalorder %v4407_v41, 17 }
 0x1dc   : > { %3459 = vmatmul.msk.bf16.vlgmr.msra.gmra.mxu1 %vm847_vm1, %v4350_v62 }
 0x1e4   : > { %3461 = vmatmul.msk.bf16.gmra.mxu2 %vm847_vm1, %v4350_v62  ;;  %3480 = vmatmul.msk.bf16.vlgmr.msra.gmra.mxu0 %vm847_vm1, %v4341_v58 }
 0x1e5   : > { %3463 = vmatmul.msk.bf16.gmra.mxu3 %vm847_vm1, %v4350_v62 }
 0x1f4   : > { %3481 = vmatmul.msk.bf16.gmra.mxu0 %vm847_vm1, %v4350_v62 }
 0x1f5   : > { %3473 = vmatmul.msk.bf16.vlgmr.msrb.gmra.mxu3 %vm847_vm1, %v4341_v58 }
 0x205   : > { %3474 = vmatmul.msk.bf16.gmra.mxu3 %vm847_vm1, %v4350_v62 }
 0x251   : > { %v960_v46 = vpop.f32.mrf.mxu0 }
 0x252   : > { %v961_v48 = vadd.f32 %v3751_v39, %v960_v46 }
 0x257   : > { %v988_v63 = vpop.f32.mrf.mxu2 }
 0x258   : > { %v1016_v0 = vpop.f32.mrf.mxu3  ;;  %v989_v22 = vadd.f32 %v3752_v7, %v988_v63 }
 0x259   : > { %v962_v1 = vpop.f32.mrf.mxu0  ;;  %v965_v2 = vpop.f32.mrf.mxu1  ;;  %v1017_v23 = vadd.f32 %v3753_v8, %v1016_v0 }
 0x25a   : > { %v963_v43 = vadd.f32 %v3751_v39, %v962_v1  ;;  %v966_v36 = vadd.f32 %v3751_v39, %v965_v2 }
 0x25c   : > { %v1025_v52 = vpack.c.bf16 %v963_v43, %v961_v48  ;;  %v1026_v57 = vpack.c.bf16 %v966_v36, %v966_v36  ;;  %v3500_v36 = vld [vmem:[%s5524_s0 + $0x50] sm:$0xff] }
 0x25f   : > { %v990_v3 = vpop.f32.mrf.mxu2 }
 0x260   : > { %v1018_v4 = vpop.f32.mrf.mxu3  ;;  %v991_v17 = vadd.f32 %v3752_v7, %v990_v3 }
 0x261   : > { %v967_v5 = vpop.f32.mrf.mxu1  ;;  %v1187_v6 = vpop.f32.mrf.mxu0  ;;  %v1019_v18 = vadd.f32 %v3753_v8, %v1018_v4 }
 0x262   : > { %v1027_v29 = vpack.c.bf16 %v991_v17, %v989_v22  ;;  %v1188_v49 = vadd.f32 %v3754_v26, %v1187_v6 }
 0x263   : > { %v1102_v28 = vpack.c.bf16 %v1019_v18, %v1017_v23 }
 0x264   : > { %v1037_v42 = vsel %vm1029_vm13, %v1027_v29, 0 }
 0x267   : > { %v993_v9 = vpop.f32.mrf.mxu2 }
 0x268   : > { %v994_v10 = vadd.f32 %v3752_v7, %v993_v9  ;;  %v1021_v11 = vpop.f32.mrf.mxu3 }
 0x269   : > { %v1022_v12 = vadd.f32 %v3753_v8, %v1021_v11  ;;  %v1189_v13 = vpop.f32.mrf.mxu0 }
 0x26a   : > { %v1028_v14 = vpack.c.bf16 %v994_v10, %v994_v10  ;;  %v1190_v44 = vadd.f32 %v3754_v26, %v1189_v13 }
 0x26b   : > { %v1103_v15 = vpack.c.bf16 %v1022_v12, %v1022_v12  ;;  %v3756_v12 = vld [vmem:[%s5532_s29 + $0x1] ss:$0 sm:$0xff] }
 0x26c   : > { %v1040_v19 = vsel %vm1029_vm13, %v1028_v14, 0  ;;  %v1228_v53 = vpack.c.bf16 %v1190_v44, %v1188_v49 }
 0x26d   : > { %1048 = vmatpush.bf16.xpose.msrb.mxu1 %v1040_v19  ;;  %v1112_v21 = vsel %vm1110_vm12, %v1103_v15, 0 }
 0x26e   : > { %1120 = vmatpush.bf16.msrb.mxu2 %v1112_v21  ;;  %v1237_v54 = vsel %vm1029_vm13, %v1228_v53, 0 }
 0x26f   : > { %v995_v25 = vpop.f32.mrf.mxu2 }
 0x270   : > { %v1023_v27 = vpop.f32.mrf.mxu3 }
 0x271   : > { %v1192_v32 = vpop.f32.mrf.mxu0 }
 0x272   : > { %1121 = vmatpush.bf16.msrb.mxu2 %v1102_v28  ;;  %v1193_v34 = vadd.f32 %v3754_v26, %v1192_v32 }
 0x274   : > { %v1229_v40 = vpack.c.bf16 %v1193_v34, %v1193_v34 }
 0x275   : > { %1049 = vmatpush.bf16.xpose.msrb.mxu1 %v1037_v42 }
 0x276   : > { %v1240_v45 = vsel %vm1029_vm13, %v1229_v40, 0 }
 0x277   : > { %1248 = vmatpush.bf16.xpose.msra.mxu2 %v1240_v45 }
 0x278   : > { %v4394_v50 = vpop.f32.mrf.mxu3 }
 0x279   : > { %v1194_v51 = vpop.f32.mrf.mxu0 }
 0x27c   : > { %3464 = vmatmul.msk.bf16.vlgmr.msrb.gmra.mxu1 %vm1029_vm13, %v1025_v52 }
 0x27d   : > { %1214 = vmatpush.bf16.msra.mxu1 %v1202_v35 }
 0x27f   : > { %1249 = vmatpush.bf16.xpose.msra.mxu2 %v1237_v54 }
 0x280   : > { %v4398_v55 = vpop.f32.mrf.mxu3 }
 0x281   : > { %1215 = vmatpush.bf16.msra.mxu1 %v1201_v47 }
 0x288   : > { %v4400_v56 = vpop.f32.mrf.mxu3 }
 0x28c   : > { %3465 = vmatmul.msk.bf16.gmra.mxu1 %vm1029_vm13, %v1026_v57  ;;  %v3501_v57 = vld [vmem:[%s5524_s0 + $0x58] sm:$0xff] }
 0x28d   : > { %v1395_v60 = vpack.c.bf16 %v3501_v57, %v3500_v36  ;;  %v3507_v57 = vld [vmem:[%s5526_s5 + $0x50] sm:$0xff] }
 0x290   : > { %v1164_v59 = vpop.f32.mrf.mxu3 }
 0x291   : > { %v3498_v59 = vld [vmem:[%s5524_s0 + $0x40] sm:$0xff] }
 0x29c   : > { %3487 = vmatmul.msk.bf16.vlgmr.msra.gmra.mxu1 %vm847_vm1, %v4341_v58 }
 0x2ac   : > { %3488 = vmatmul.msk.bf16.gmra.mxu1 %vm847_vm1, %v4350_v62 }
 0x2f9   : > { %v1051_v61 = vpop.f32.mrf.mxu1 }
 0x2fa   : > { %v1060_v46 = vmul.f32 0.35355338, %v1051_v61  ;;  %v3499_v61 = vld [vmem:[%s5524_s0 + $0x48] sm:$0xff] }
 0x2fc   : > { %v1063_v63 = vsel %vm844_vm14, %v1060_v46, -1e+30  ;;  %v1394_v46 = vpack.c.bf16 %v3499_v61, %v3498_v59  ;;  %v3508_v59 = vld [vmem:[%s5526_s5 + $0x58] sm:$0xff] }
 0x2fd   : > { %v1067_v0 = vsel %vm1066_vm15, %v1063_v63, -inf  ;;  %v1425_v61 = vpack.c.bf16 %v3508_v59, %v3507_v57  ;;  %v3533_v57 = vld [vmem:[%s5526_s5 + $0x60] sm:$0xff]  ;;  %v3534_v59 = vld [vmem:[%s5526_s5 + $0x68] sm:$0xff] }
 0x2fe   : > { %1068 = vmax.xlane.f32.xlu0 %v1067_v0 }
 0x301   : > { %v1053_v1 = vpop.f32.mrf.mxu1 }
 0x302   : > { %v1061_v2 = vmul.f32 0.35355338, %v1053_v1 }
 0x304   : > { %v1064_v3 = vsel %vm844_vm14, %v1061_v2, -1e+30 }
 0x305   : > { %v1070_v4 = vsel %vm1066_vm15, %v1064_v3, -inf }
 0x306   : > { %1071 = vmax.xlane.f32.xlu1 %v1070_v4 }
 0x309   : > { %v1056_v5 = vpop.f32.mrf.mxu1 }
 0x30a   : > { %v1062_v6 = vmul.f32 0.35355338, %v1056_v5 }
 0x30c   : > { %v1065_v7 = vsel %vm844_vm14, %v1062_v6, -1e+30 }
 0x30d   : > { %v1073_v8 = vsel %vm1066_vm15, %v1065_v7, -inf }
 0x30e   : > { %1074 = vmax.xlane.f32.xlu2 %v1073_v8 }
 0x311   : > { %v1058_v9 = vpop.f32.mrf.mxu1 }
 0x319   : > { %v1217_v10 = vpop.f32.mrf.mxu1 }
 0x31a   : > { %v1218_v19 = vadd.f32 %v3756_v12, %v1217_v10 }
 0x321   : > { %v1219_v11 = vpop.f32.mrf.mxu1 }
 0x322   : > { %v1220_v17 = vadd.f32 %v3756_v12, %v1219_v11 }
 0x324   : > { %v1301_v21 = vpack.c.bf16 %v1220_v17, %v1218_v19 }
 0x329   : > { %v1222_v13 = vpop.f32.mrf.mxu1 }
 0x32a   : > { %v1223_v14 = vadd.f32 %v3756_v12, %v1222_v13 }
 0x32c   : > { %v1302_v15 = vpack.c.bf16 %v1223_v14, %v1223_v14 }
 0x32e   : > { %v1310_v18 = vsel %vm1110_vm12, %v1302_v15, 0 }
 0x32f   : > { %1318 = vmatpush.bf16.msra.mxu3 %v1310_v18 }
 0x331   : > { %v1224_v22 = vpop.f32.mrf.mxu1 }
 0x333   : > { %1319 = vmatpush.bf16.msra.mxu3 %v1301_v21 }
 0x337   : > { %1437 = vmatpush.bf16.msrb.mxu3 %v1425_v61 }
 0x371   : > { %v1069_v23 = vpop.xlane.xlu0 %1068 }
 0x372   : > { %v1076_v25 = vsub.f32 %v1063_v63, %v1069_v23  ;;  %v3755_v63 = vld [vmem:[%s5534_s8 + $0x1] ss:$0 sm:$0xff] }
 0x373   : > { %v1160_v0 = vadd.f32 %v3755_v63, %v4398_v55  ;;  %v1158_v1 = vadd.f32 %v3755_v63, %v4394_v50  ;;  %v1132_v55 = vld [vmem:[%s5535_s11] sm:$0xff] }
 0x374   : > { %v1079_v26 = vmul.f32 1.442695, %v1076_v25  ;;  %v1135_v5 = vpack.c.bf16 %v1132_v55, %v1132_v55 }
 0x375   : > { %v1226_v2 = vpack.c.bf16 %v1160_v0, %v1158_v1 }
 0x376   : > { %3795 = vpow2.f32 %v1079_v26  ;;  %v1369_v50 = vsel %vm1110_vm12, %v1135_v5, 0 }
 0x377   : > { %1378 = vmatpush.bf16.msrb.mxu1 %v1369_v50 }
 0x379   : > { %v1072_v27 = vpop.xlane.xlu1 %1071 }
 0x37a   : > { %v1077_v28 = vsub.f32 %v1064_v3, %v1072_v27  ;;  %v1163_v3 = vadd.f32 %v3755_v63, %v4400_v56 }
 0x37c   : > { %v3796_v29 = vpop.eup %3795  ;;  %v1081_v30 = vmul.f32 1.442695, %v1077_v28  ;;  %v1227_v4 = vpack.c.bf16 %v1163_v3, %v1163_v3 }
 0x37d   : > { %v1085_v31 = vsel %vm1066_vm15, %v3796_v29, 0.0 }
 0x37e   : > { %3797 = vpow2.f32 %v1081_v30  ;;  %1086 = vadd.xlane.f32.xlu0 %v1085_v31 }
 0x381   : > { %v1075_v32 = vpop.xlane.xlu2 %1074 }
 0x382   : > { %v1078_v34 = vsub.f32 %v1065_v7, %v1075_v32 }
 0x384   : > { %v3798_v35 = vpop.eup %3797  ;;  %v1083_v37 = vmul.f32 1.442695, %v1078_v34 }
 0x385   : > { %v1088_v38 = vsel %vm1066_vm15, %v3798_v35, 0.0 }
 0x386   : > { %3799 = vpow2.f32 %v1083_v37  ;;  %1089 = vadd.xlane.f32.xlu1 %v1088_v38 }
 0x38c   : > { %v3800_v39 = vpop.eup %3799 }
 0x38d   : > { %v1091_v40 = vsel %vm1066_vm15, %v3800_v39, 0.0 }
 0x38e   : > { %1092 = vadd.xlane.f32.xlu2 %v1091_v40 }
 0x3f1   : > { %v1087_v42 = vpop.xlane.xlu0 %1086 }
 0x3f2   : > { %3801 = vrcp.f32 %v1087_v42 }
 0x3f8   : > { %v3802_v44 = vpop.eup %3801 }
 0x3f9   : > { %v1090_v43 = vpop.xlane.xlu1 %1089  ;;  %v1097_v47 = vmul.f32 %v3802_v44, %v3796_v29 }
 0x3fa   : > { %3803 = vrcp.f32 %v1090_v43 }
 0x400   : > { %v3804_v45 = vpop.eup %3803 }
 0x401   : > { %v1098_v48 = vmul.f32 %v3804_v45, %v3798_v35  ;;  %v1093_v49 = vpop.xlane.xlu2 %1092 }
 0x402   : > { %3805 = vrcp.f32 %v1093_v49 }
 0x403   : > { %v1100_v51 = vpack.c.bf16 %v1098_v48, %v1097_v47 }
 0x405   : > { %3466 = vmatmul.msk.bf16.vlgmr.msrb.gmra.mxu2 %vm1066_vm15, %v1100_v51 }
 0x406   : > { %1407 = vmatpush.bf16.msrb.mxu2 %v1395_v60  ;;  %v3505_v60 = vld [vmem:[%s5526_s5 + $0x40] sm:$0xff] }
 0x408   : > { %v3806_v52 = vpop.eup %3805 }
 0x409   : > { %v1099_v53 = vmul.f32 %v3806_v52, %v3800_v39 }
 0x40a   : > { %1408 = vmatpush.bf16.msrb.mxu2 %v1394_v46  ;;  %v3506_v46 = vld [vmem:[%s5526_s5 + $0x48] sm:$0xff] }
 0x40b   : > { %v1101_v54 = vpack.c.bf16 %v1099_v53, %v1099_v53  ;;  %v1424_v63 = vpack.c.bf16 %v3506_v46, %v3505_v60  ;;  %v3757_v60 = vld [vmem:[%s5534_s8 + $0x2] ss:$0 sm:$0xff] }
 0x40d   : > { %1438 = vmatpush.bf16.msrb.mxu3 %v1424_v63  ;;  %v1653_v63 = vpack.c.bf16 %v3534_v59, %v3533_v57 }
 0x415   : > { %3467 = vmatmul.msk.bf16.gmra.mxu2 %vm1066_vm15, %v1101_v54 }
 0x425   : > { %3489 = vmatmul.msk.bf16.vlgmr.msra.gmra.mxu2 %vm1029_vm13, %v1226_v2 }
 0x435   : > { %3490 = vmatmul.msk.bf16.gmra.mxu2 %vm1029_vm13, %v1227_v4 }
 0x445   : > { %3503 = vmatmul.msk.bf16.vlgmr.msrb.gmra.mxu2 %vm847_vm1, %v4341_v58 }
 0x455   : > { %3504 = vmatmul.msk.bf16.gmra.mxu2 %vm847_vm1, %v4350_v62 }
 0x488   : > { %v1123_v6 = vpop.f32.mrf.mxu2 }
 0x490   : > { %v1125_v7 = vpop.f32.mrf.mxu2 }
 0x491   : > { %v1133_v56 = vpack.c.bf16 %v1125_v7, %v1123_v6 }
 0x493   : > { %3496 = vmatmul.msk.bf16.vlgmr.msrb.gmra.mxu1 %vm1029_vm13, %v1133_v56  ;;  %v3493_v56 = vld [vmem:[%s5535_s11 + $0x8] sm:$0xff] }
 0x498   : > { %v1128_v8 = vpop.f32.mrf.mxu2 }
 0x499   : > { %v1134_v10 = vpack.c.bf16 %v1128_v8, %v1128_v8  ;;  %v1334_v8 = vpack.c.bf16 %v3493_v56, %v3493_v56 }
 0x4a0   : > { %v1130_v9 = vpop.f32.mrf.mxu2 }
 0x4a1   : > { %v1342_v9 = vsel %vm1110_vm12, %v1334_v8, 0 }
 0x4a2   : > { %1351 = vmatpush.bf16.msrb.mxu0 %v1342_v9 }
 0x4a3   : > { %3497 = vmatmul.msk.bf16.gmra.mxu1 %vm1029_vm13, %v1134_v10 }
 0x4a8   : > { %v1251_v11 = vpop.f32.mrf.mxu2 }
 0x4a9   : > { %v1260_v12 = vmul.f32 0.35355338, %v1251_v11  ;;  %v3514_v11 = vld [vmem:[%s5527_s26 + $0x50] sm:$0xff] }
 0x4ab   : > { %v1263_v13 = vsel %vm844_vm14, %v1260_v12, -1e+30  ;;  %v3515_v12 = vld [vmem:[%s5527_s26 + $0x58] sm:$0xff] }
 0x4ac   : > { %v1266_v14 = vsel %vm1066_vm15, %v1263_v13, -inf }
 0x4ad   : > { %1267 = vmax.xlane.f32.xlu0 %v1266_v14  ;;  %v3512_v14 = vld [vmem:[%s5527_s26 + $0x40] sm:$0xff] }
 0x4b0   : > { %v1253_v15 = vpop.f32.mrf.mxu2 }
 0x4b1   : > { %v1261_v17 = vmul.f32 0.35355338, %v1253_v15  ;;  %v3513_v15 = vld [vmem:[%s5527_s26 + $0x48] sm:$0xff] }
 0x4b3   : > { %v1264_v18 = vsel %vm844_vm14, %v1261_v17, -1e+30  ;;  %v1454_v17 = vpack.c.bf16 %v3513_v15, %v3512_v14 }
 0x4b4   : > { %v1269_v19 = vsel %vm1066_vm15, %v1264_v18, -inf }
 0x4b5   : > { %1270 = vmax.xlane.f32.xlu1 %v1269_v19 }
 0x4b8   : > { %v1256_v21 = vpop.f32.mrf.mxu2 }
 0x4b9   : > { %v1262_v22 = vmul.f32 0.35355338, %v1256_v21 }
 0x4bb   : > { %v1265_v23 = vsel %vm844_vm14, %v1262_v22, -1e+30 }
 0x4bc   : > { %v1272_v25 = vsel %vm1066_vm15, %v1265_v23, -inf }
 0x4bd   : > { %1273 = vmax.xlane.f32.xlu2 %v1272_v25  ;;  %v3528_v25 = vld [vmem:[%s5524_s0 + $0x70] sm:$0xff] }
 0x4c0   : > { %v1258_v26 = vpop.f32.mrf.mxu2 }
 0x4c1   : > { %v3529_v26 = vld [vmem:[%s5524_s0 + $0x78] sm:$0xff] }
 0x4c8   : > { %v4467_v27 = vpop.f32.mrf.mxu2 }
 0x4d0   : > { %v4469_v28 = vpop.f32.mrf.mxu2 }
 0x4d1   : > { %v1413_v46 = vadd.f32 %v3757_v60, %v4469_v28 }
 0x4d8   : > { %v4471_v29 = vpop.f32.mrf.mxu2 }
 0x4e0   : > { %v1417_v30 = vpop.f32.mrf.mxu2 }
 0x4e1   : > { %v1624_v30 = vpack.c.bf16 %v3529_v26, %v3528_v25 }
 0x510   : > { %v4473_v31 = vpop.f32.mrf.mxu1 }
 0x518   : > { %v4475_v32 = vpop.f32.mrf.mxu1 }
 0x520   : > { %v1268_v34 = vpop.xlane.xlu0 %1267  ;;  %v4477_v35 = vpop.f32.mrf.mxu1 }
 0x521   : > { %v1275_v37 = vsub.f32 %v1263_v13, %v1268_v34  ;;  %v1455_v13 = vpack.c.bf16 %v3515_v12, %v3514_v11 }
 0x523   : > { %v1278_v38 = vmul.f32 1.442695, %v1275_v37  ;;  %1467 = vmatpush.bf16.msra.mxu0 %v1455_v13  ;;  %v3526_v37 = vld [vmem:[%s5524_s0 + $0x60] sm:$0xff] }
 0x525   : > { %3807 = vpow2.f32 %v1278_v38  ;;  %v3527_v38 = vld [vmem:[%s5524_s0 + $0x68] sm:$0xff] }
 0x527   : > { %1468 = vmatpush.bf16.msra.mxu0 %v1454_v17 }
 0x528   : > { %v1271_v39 = vpop.xlane.xlu1 %1270  ;;  %v1387_v40 = vpop.f32.mrf.mxu1 }
 0x529   : > { %v1276_v42 = vsub.f32 %v1264_v18, %v1271_v39  ;;  %v1623_v39 = vpack.c.bf16 %v3527_v38, %v3526_v37 }
 0x52b   : > { %v3808_v43 = vpop.eup %3807  ;;  %v1280_v44 = vmul.f32 1.442695, %v1276_v42  ;;  %v3758_v42 = vld [vmem:[%s5531_s30 + $0x2] ss:$0 sm:$0xff] }
 0x52c   : > { %v1284_v45 = vsel %vm1066_vm15, %v3808_v43, 0.0 }
 0x52d   : > { %3809 = vpow2.f32 %v1280_v44  ;;  %1285 = vadd.xlane.f32.xlu0 %v1284_v45 }
 0x530   : > { %v1274_v47 = vpop.xlane.xlu2 %1273 }
 0x531   : > { %v1277_v48 = vsub.f32 %v1265_v23, %v1274_v47 }
 0x533   : > { %v3810_v49 = vpop.eup %3809  ;;  %v1282_v51 = vmul.f32 1.442695, %v1277_v48 }
 0x534   : > { %v1287_v52 = vsel %vm1066_vm15, %v3810_v49, 0.0 }
 0x535   : > { %3811 = vpow2.f32 %v1282_v51  ;;  %1288 = vadd.xlane.f32.xlu1 %v1287_v52 }
 0x53b   : > { %v3812_v53 = vpop.eup %3811 }
 0x53c   : > { %v1290_v54 = vsel %vm1066_vm15, %v3812_v53, 0.0 }
 0x53d   : > { %1291 = vadd.xlane.f32.xlu2 %v1290_v54  ;;  %v3536_v54 = vld [vmem:[%s5526_s5 + $0x78] sm:$0xff] }
 0x5a0   : > { %v1286_v36 = vpop.xlane.xlu0 %1285 }
 0x5a1   : > { %3813 = vrcp.f32 %v1286_v36 }
 0x5a7   : > { %v3814_v1 = vpop.eup %3813 }
 0x5a8   : > { %v1289_v0 = vpop.xlane.xlu1 %1288  ;;  %v1296_v3 = vmul.f32 %v3814_v1, %v3808_v43 }
 0x5a9   : > { %3815 = vrcp.f32 %v1289_v0  ;;  %v1411_v0 = vadd.f32 %v3757_v60, %v4467_v27 }
 0x5ab   : > { %v1479_v1 = vpack.c.bf16 %v1413_v46, %v1411_v0 }
 0x5af   : > { %v3816_v2 = vpop.eup %3815 }
 0x5b0   : > { %v1297_v4 = vmul.f32 %v3816_v2, %v3810_v49  ;;  %v1292_v5 = vpop.xlane.xlu2 %1291  ;;  %v1416_v2 = vadd.f32 %v3757_v60, %v4471_v29 }
 0x5b1   : > { %3817 = vrcp.f32 %v1292_v5 }
 0x5b2   : > { %v1299_v55 = vpack.c.bf16 %v1297_v4, %v1296_v3  ;;  %v1480_v3 = vpack.c.bf16 %v1416_v2, %v1416_v2 }
 0x5b4   : > { %3491 = vmatmul.msk.bf16.vlgmr.msra.gmra.mxu3 %vm1066_vm15, %v1299_v55 }
 0x5b7   : > { %v3818_v50 = vpop.eup %3817 }
 0x5b8   : > { %v1298_v6 = vmul.f32 %v3818_v50, %v3812_v53  ;;  %v3535_v53 = vld [vmem:[%s5526_s5 + $0x70] sm:$0xff]  ;;  %v3759_v50 = vld [vmem:[%s5532_s29 + $0x2] ss:$0 sm:$0xff] }
 0x5b9   : > { %v1654_v36 = vpack.c.bf16 %v3536_v54, %v3535_v53 }
 0x5ba   : > { %v1300_v7 = vpack.c.bf16 %v1298_v6, %v1298_v6 }
 0x5c4   : > { %3492 = vmatmul.msk.bf16.gmra.mxu3 %vm1066_vm15, %v1300_v7 }
 0x5d4   : > { %3510 = vmatmul.msk.bf16.vlgmr.msrb.gmra.mxu3 %vm847_vm1, %v4341_v58 }
 0x5e4   : > { %3511 = vmatmul.msk.bf16.gmra.mxu3 %vm847_vm1, %v4350_v62 }
 0x637   : > { %v1321_v10 = vpop.f32.mrf.mxu3 }
 0x63f   : > { %v1323_v18 = vpop.f32.mrf.mxu3 }
 0x640   : > { %v1332_v19 = vpack.c.bf16 %v1323_v18, %v1321_v10 }
 0x642   : > { %3494 = vmatmul.msk.bf16.vlgmr.msrb.gmra.mxu0 %vm1029_vm13, %v1332_v19 }
 0x643   : > { %1636 = vmatpush.bf16.msrb.mxu0 %v1624_v30 }
 0x647   : > { %v1326_v21 = vpop.f32.mrf.mxu3  ;;  %1637 = vmatpush.bf16.msrb.mxu0 %v1623_v39 }
 0x648   : > { %v1333_v23 = vpack.c.bf16 %v1326_v21, %v1326_v21 }
 0x64f   : > { %v1328_v22 = vpop.f32.mrf.mxu3 }
 0x652   : > { %3495 = vmatmul.msk.bf16.gmra.mxu0 %vm1029_vm13, %v1333_v23 }
 0x657   : > { %v1440_v34 = vpop.f32.mrf.mxu3 }
 0x658   : > { %v1441_v49 = vadd.f32 %v3758_v42, %v1440_v34  ;;  %v3523_v34 = vld [vmem:[%s5535_s11 + $0x10] sm:$0xff] }
 0x659   : > { %v1587_v38 = vpack.c.bf16 %v3523_v34, %v3523_v34 }
 0x65f   : > { %v1442_v40 = vpop.f32.mrf.mxu3 }
 0x660   : > { %v1443_v47 = vadd.f32 %v3758_v42, %v1442_v40  ;;  %v1595_v40 = vsel %vm1110_vm12, %v1587_v38, 0 }
 0x661   : > { %1604 = vmatpush.bf16.msra.mxu3 %v1595_v40 }
 0x662   : > { %3517 = vmatmul.msk.bf16.vlgmr.msra.gmra.mxu0 %vm847_vm1, %v4341_v58  ;;  %v1481_v52 = vpack.c.bf16 %v1443_v47, %v1441_v49 }
 0x664   : > { %v1490_v61 = vsel %vm1029_vm13, %v1481_v52, 0 }
 0x667   : > { %v1445_v43 = vpop.f32.mrf.mxu3 }
 0x668   : > { %v1446_v44 = vadd.f32 %v3758_v42, %v1445_v43 }
 0x66a   : > { %v1482_v45 = vpack.c.bf16 %v1446_v44, %v1446_v44 }
 0x66c   : > { %v1493_v48 = vsel %vm1029_vm13, %v1482_v45, 0 }
 0x66d   : > { %1501 = vmatpush.bf16.xpose.msra.mxu1 %v1493_v48  ;;  %v3761_v48 = vld [vmem:[%s5531_s30 + $0x3] ss:$0 sm:$0xff] }
 0x66f   : > { %v1447_v51 = vpop.f32.mrf.mxu3 }
 0x672   : > { %3518 = vmatmul.msk.bf16.gmra.mxu0 %vm847_vm1, %v4350_v62 }
 0x675   : > { %1502 = vmatpush.bf16.xpose.msra.mxu1 %v1490_v61 }
 0x67c   : > { %3519 = vmatmul.msk.bf16.vlgmr.msra.gmra.mxu1 %vm1029_vm13, %v1479_v1 }
 0x67d   : > { %1666 = vmatpush.bf16.msrb.mxu1 %v1654_v36 }
 0x681   : > { %1667 = vmatpush.bf16.msrb.mxu1 %v1653_v63 }
 0x682   : > { %3531 = vmatmul.msk.bf16.vlgmr.msrb.gmra.mxu0 %vm847_vm1, %v4341_v58 }
 0x68c   : > { %3520 = vmatmul.msk.bf16.gmra.mxu1 %vm1029_vm13, %v1480_v3 }
 0x692   : > { %3532 = vmatmul.msk.bf16.gmra.mxu0 %vm847_vm1, %v4350_v62 }
 0x69c   : > { %3538 = vmatmul.msk.bf16.vlgmr.msrb.gmra.mxu1 %vm847_vm1, %v4341_v58 }
 0x6ac   : > { %3539 = vmatmul.msk.bf16.gmra.mxu1 %vm847_vm1, %v4350_v62 }
 0x6bf   : > { %v4567_v27 = vpop.f32.mrf.mxu0 }
 0x6c7   : > { %v4569_v28 = vpop.f32.mrf.mxu0 }
 0x6cf   : > { %v4571_v4 = vpop.f32.mrf.mxu0 }
 0x6d7   : > { %v1360_v55 = vpop.f32.mrf.mxu0 }
 0x6df   : > { %v1470_v29 = vpop.f32.mrf.mxu0 }
 0x6e0   : > { %v1471_v10 = vadd.f32 %v3759_v50, %v1470_v29 }
 0x6e7   : > { %v1472_v5 = vpop.f32.mrf.mxu0 }
 0x6e8   : > { %v1473_v8 = vadd.f32 %v3759_v50, %v1472_v5 }
 0x6ea   : > { %v1554_v11 = vpack.c.bf16 %v1473_v8, %v1471_v10  ;;  %v3542_v10 = vld [vmem:[%s5527_s26 + $0x70] sm:$0xff] }
 0x6ef   : > { %v1475_v6 = vpop.f32.mrf.mxu0 }
 0x6f0   : > { %v1476_v7 = vadd.f32 %v3759_v50, %v1475_v6 }
 0x6f2   : > { %v1555_v56 = vpack.c.bf16 %v1476_v7, %v1476_v7 }
 0x6f4   : > { %v1563_v9 = vsel %vm1110_vm12, %v1555_v56, 0 }
 0x6f5   : > { %1571 = vmatpush.bf16.msra.mxu2 %v1563_v9 }
 0x6f7   : > { %v1477_v12 = vpop.f32.mrf.mxu0 }
 0x6f8   : > { %v3540_v12 = vld [vmem:[%s5527_s26 + $0x60] sm:$0xff] }
 0x6f9   : > { %v1504_v13 = vpop.f32.mrf.mxu1  ;;  %1572 = vmatpush.bf16.msra.mxu2 %v1554_v11  ;;  %v3543_v11 = vld [vmem:[%s5527_s26 + $0x78] sm:$0xff] }
 0x6fa   : > { %v1513_v14 = vmul.f32 0.35355338, %v1504_v13  ;;  %v1684_v13 = vpack.c.bf16 %v3543_v11, %v3542_v10 }
 0x6fc   : > { %v1516_v15 = vsel %vm844_vm14, %v1513_v14, -1e+30  ;;  %v3541_v14 = vld [vmem:[%s5527_s26 + $0x68] sm:$0xff] }
 0x6fd   : > { %v1519_v17 = vsel %vm1066_vm15, %v1516_v15, -inf  ;;  %1696 = vmatpush.bf16.msrb.mxu2 %v1684_v13 }
 0x6fe   : > { %1520 = vmax.xlane.f32.xlu0 %v1519_v17 }
 0x6ff   : > { %v4580_v18 = vpop.f32.mrf.mxu0 }
 0x701   : > { %v1506_v19 = vpop.f32.mrf.mxu1 }
 0x702   : > { %v1514_v21 = vmul.f32 0.35355338, %v1506_v19 }
 0x704   : > { %v1517_v22 = vsel %vm844_vm14, %v1514_v21, -1e+30 }
 0x705   : > { %v1522_v23 = vsel %vm1066_vm15, %v1517_v22, -inf }
 0x706   : > { %1523 = vmax.xlane.f32.xlu1 %v1522_v23 }
 0x707   : > { %v4585_v25 = vpop.f32.mrf.mxu0 }
 0x709   : > { %v1509_v26 = vpop.f32.mrf.mxu1 }
 0x70a   : > { %v1515_v30 = vmul.f32 0.35355338, %v1509_v26 }
 0x70c   : > { %v1518_v37 = vsel %vm844_vm14, %v1515_v30, -1e+30 }
 0x70d   : > { %v1525_v39 = vsel %vm1066_vm15, %v1518_v37, -inf }
 0x70e   : > { %1526 = vmax.xlane.f32.xlu2 %v1525_v39 }
 0x70f   : > { %v4594_v42 = vpop.f32.mrf.mxu0 }
 0x711   : > { %v1511_v43 = vpop.f32.mrf.mxu1 }
 0x717   : > { %v1646_v44 = vpop.f32.mrf.mxu0 }
 0x719   : > { %v1669_v45 = vpop.f32.mrf.mxu1 }
 0x71a   : > { %v1670_v36 = vadd.f32 %v3761_v48, %v1669_v45 }
 0x721   : > { %v1671_v47 = vpop.f32.mrf.mxu1 }
 0x722   : > { %v1672_v53 = vadd.f32 %v3761_v48, %v1671_v47 }
 0x724   : > { %v1710_v59 = vpack.c.bf16 %v1672_v53, %v1670_v36  ;;  %v3762_v53 = vld [vmem:[%s5532_s29 + $0x3] ss:$0 sm:$0xff] }
 0x726   : > { %v1719_v60 = vsel %vm1029_vm13, %v1710_v59, 0 }
 0x729   : > { %v1674_v49 = vpop.f32.mrf.mxu1 }
 0x72a   : > { %v1675_v51 = vadd.f32 %v3761_v48, %v1674_v49  ;;  %v3760_v49 = vld [vmem:[%s5534_s8 + $0x3] ss:$0 sm:$0xff] }
 0x72c   : > { %v1711_v52 = vpack.c.bf16 %v1675_v51, %v1675_v51  ;;  %v1640_v51 = vadd.f32 %v3760_v49, %v4580_v18 }
 0x72e   : > { %v1722_v54 = vsel %vm1029_vm13, %v1711_v52, 0 }
 0x72f   : > { %1730 = vmatpush.bf16.xpose.msrb.mxu3 %v1722_v54 }
 0x731   : > { %v1676_v57 = vpop.f32.mrf.mxu1 }
 0x737   : > { %1731 = vmatpush.bf16.xpose.msrb.mxu3 %v1719_v60  ;;  %v1645_v60 = vadd.f32 %v3760_v49, %v4594_v42  ;;  %v1386_v42 = vadd.f32 %v4477_v35, %v4571_v4 }
 0x771   : > { %v1521_v61 = vpop.xlane.xlu0 %1520 }
 0x772   : > { %v1528_v46 = vsub.f32 %v1516_v15, %v1521_v61  ;;  %v1683_v15 = vpack.c.bf16 %v3541_v14, %v3540_v12 }
 0x774   : > { %v1531_v63 = vmul.f32 1.442695, %v1528_v46  ;;  %1697 = vmatpush.bf16.msrb.mxu2 %v1683_v15 }
 0x776   : > { %3819 = vpow2.f32 %v1531_v63  ;;  %v1709_v63 = vpack.c.bf16 %v1645_v60, %v1645_v60 }
 0x779   : > { %v1524_v0 = vpop.xlane.xlu1 %1523 }
 0x77a   : > { %v1529_v1 = vsub.f32 %v1517_v22, %v1524_v0  ;;  %v1381_v0 = vadd.f32 %v4473_v31, %v4567_v27 }
 0x77c   : > { %v3820_v2 = vpop.eup %3819  ;;  %v1533_v3 = vmul.f32 1.442695, %v1529_v1 }
 0x77d   : > { %v1537_v55 = vsel %vm1066_vm15, %v3820_v2, 0.0 }
 0x77e   : > { %3821 = vpow2.f32 %v1533_v3  ;;  %1538 = vadd.xlane.f32.xlu0 %v1537_v55 }
 0x781   : > { %v1527_v29 = vpop.xlane.xlu2 %1526 }
 0x782   : > { %v1530_v5 = vsub.f32 %v1518_v37, %v1527_v29 }
 0x784   : > { %v3822_v50 = vpop.eup %3821  ;;  %v1535_v6 = vmul.f32 1.442695, %v1530_v5 }
 0x785   : > { %v1540_v7 = vsel %vm1066_vm15, %v3822_v50, 0.0 }
 0x786   : > { %3823 = vpow2.f32 %v1535_v6  ;;  %1541 = vadd.xlane.f32.xlu1 %v1540_v7 }
 0x78c   : > { %v3824_v56 = vpop.eup %3823 }
 0x78d   : > { %v1543_v8 = vsel %vm1066_vm15, %v3824_v56, 0.0 }
 0x78e   : > { %1544 = vadd.xlane.f32.xlu2 %v1543_v8 }
 0x7f1   : > { %v1539_v9 = vpop.xlane.xlu0 %1538 }
 0x7f2   : > { %3825 = vrcp.f32 %v1539_v9 }
 0x7f8   : > { %v3826_v19 = vpop.eup %3825 }
 0x7f9   : > { %v1542_v17 = vpop.xlane.xlu1 %1541  ;;  %v1549_v22 = vmul.f32 %v3826_v19, %v3820_v2 }
 0x7fa   : > { %3827 = vrcp.f32 %v1542_v17 }
 0x800   : > { %v3828_v21 = vpop.eup %3827 }
 0x801   : > { %v1550_v23 = vmul.f32 %v3828_v21, %v3822_v50  ;;  %v1545_v30 = vpop.xlane.xlu2 %1544 }
 0x802   : > { %3829 = vrcp.f32 %v1545_v30 }
 0x803   : > { %v1552_v26 = vpack.c.bf16 %v1550_v23, %v1549_v22 }
 0x805   : > { %3521 = vmatmul.msk.bf16.vlgmr.msra.gmra.mxu2 %vm1066_vm15, %v1552_v26 }
 0x808   : > { %v3830_v34 = vpop.eup %3829 }
 0x809   : > { %v1551_v37 = vmul.f32 %v3830_v34, %v3824_v56 }
 0x80b   : > { %v1553_v38 = vpack.c.bf16 %v1551_v37, %v1551_v37 }
 0x815   : > { %3522 = vmatmul.msk.bf16.gmra.mxu2 %vm1066_vm15, %v1553_v38 }
 0x825   : > { %3545 = vmatmul.msk.bf16.vlgmr.msrb.gmra.mxu2 %vm847_vm1, %v4341_v58  ;;  %v1642_v58 = vadd.f32 %v3760_v49, %v4585_v25 }
 0x827   : > { %v1708_v52 = vpack.c.bf16 %v1642_v58, %v1640_v51 }
 0x835   : > { %3546 = vmatmul.msk.bf16.gmra.mxu2 %vm847_vm1, %v4350_v62 }
 0x888   : > { %v1574_v39 = vpop.f32.mrf.mxu2 }
 0x890   : > { %v1576_v40 = vpop.f32.mrf.mxu2 }
 0x891   : > { %v1585_v43 = vpack.c.bf16 %v1576_v40, %v1574_v39 }
 0x893   : > { %3524 = vmatmul.msk.bf16.vlgmr.msra.gmra.mxu3 %vm1029_vm13, %v1585_v43 }
 0x898   : > { %v1579_v44 = vpop.f32.mrf.mxu2 }
 0x899   : > { %v1586_v47 = vpack.c.bf16 %v1579_v44, %v1579_v44  ;;  %v3551_v44 = vld [vmem:[%s5535_s11 + $0x18] sm:$0xff] }
 0x8a0   : > { %v1581_v45 = vpop.f32.mrf.mxu2 }
 0x8a1   : > { %v1816_v45 = vpack.c.bf16 %v3551_v44, %v3551_v44 }
 0x8a3   : > { %3525 = vmatmul.msk.bf16.gmra.mxu3 %vm1029_vm13, %v1586_v47  ;;  %v1824_v47 = vsel %vm1110_vm12, %v1816_v45, 0 }
 0x8a4   : > { %1833 = vmatpush.bf16.msra.mxu1 %v1824_v47 }
 0x8a8   : > { %v1699_v48 = vpop.f32.mrf.mxu2 }
 0x8a9   : > { %v1700_v46 = vadd.f32 %v3762_v53, %v1699_v48 }
 0x8b0   : > { %v1701_v62 = vpop.f32.mrf.mxu2 }
 0x8b1   : > { %v1702_v59 = vadd.f32 %v3762_v53, %v1701_v62 }
 0x8b3   : > { %3547 = vmatmul.msk.bf16.vlgmr.msrb.gmra.mxu3 %vm1029_vm13, %v1708_v52  ;;  %v1783_v25 = vpack.c.bf16 %v1702_v59, %v1700_v46 }
 0x8b8   : > { %v1704_v54 = vpop.f32.mrf.mxu2 }
 0x8b9   : > { %v1705_v36 = vadd.f32 %v3762_v53, %v1704_v54 }
 0x8bb   : > { %v1784_v57 = vpack.c.bf16 %v1705_v36, %v1705_v36 }
 0x8bd   : > { %v1792_v61 = vsel %vm1110_vm12, %v1784_v57, 0 }
 0x8be   : > { %1800 = vmatpush.bf16.msra.mxu0 %v1792_v61 }
 0x8c0   : > { %v1706_v18 = vpop.f32.mrf.mxu2 }
 0x8c2   : > { %1801 = vmatpush.bf16.msra.mxu0 %v1783_v25 }
 0x8c3   : > { %3548 = vmatmul.msk.bf16.gmra.mxu3 %vm1029_vm13, %v1709_v63 }
 0x916   : > { %v1606_v1 = vpop.f32.mrf.mxu3 }
 0x917   : > { %v4638_v2 = vadd.f32 %v1606_v1, %v1381_v0  ;;  %v3763_v1 = vld [vmem:[%s5536_s12] ss:$0 sm:$0xff] }
 0x91e   : > { %v4640_v3 = vpop.f32.mrf.mxu3 }
 0x926   : > { %v1611_v55 = vpop.f32.mrf.mxu3 }
 0x927   : > { %v4644_v29 = vadd.f32 %v1611_v55, %v1386_v42  ;;  %v1383_v55 = vadd.f32 %v4475_v32, %v4569_v28 }
 0x92e   : > { %v1613_v5 = vpop.f32.mrf.mxu3 }
 0x936   : > { %v1733_v50 = vpop.f32.mrf.mxu3 }
 0x937   : > { %v1742_v6 = vmul.f32 0.35355338, %v1733_v50  ;;  %v1616_v50 = vadd.f32 %v4640_v3, %v1383_v55 }
 0x939   : > { %v1745_v7 = vsel %vm844_vm14, %v1742_v6, -1e+30 }
 0x93a   : > { %v1748_v56 = vsel %vm1066_vm15, %v1745_v7, -inf }
 0x93b   : > { %1749 = vmax.xlane.f32.xlu0 %v1748_v56 }
 0x93e   : > { %v1735_v31 = vpop.f32.mrf.mxu3 }
 0x93f   : > { %v1743_v27 = vmul.f32 0.35355338, %v1735_v31 }
 0x941   : > { %v1746_v8 = vsel %vm844_vm14, %v1743_v27, -1e+30 }
 0x942   : > { %v1751_v9 = vsel %vm1066_vm15, %v1746_v8, -inf }
 0x943   : > { %1752 = vmax.xlane.f32.xlu1 %v1751_v9 }
 0x946   : > { %v1738_v35 = vpop.f32.mrf.mxu3 }
 0x947   : > { %v1744_v4 = vmul.f32 0.35355338, %v1738_v35 }
 0x949   : > { %v1747_v10 = vsel %vm844_vm14, %v1744_v4, -1e+30 }
 0x94a   : > { %v1754_v11 = vsel %vm1066_vm15, %v1747_v10, -inf }
 0x94b   : > { %1755 = vmax.xlane.f32.xlu2 %v1754_v11 }
 0x94e   : > { %v1740_v12 = vpop.f32.mrf.mxu3 }
 0x9ae   : > { %v1750_v13 = vpop.xlane.xlu0 %1749 }
 0x9af   : > { %v1757_v14 = vsub.f32 %v1745_v7, %v1750_v13 }
 0x9b1   : > { %v1760_v15 = vmul.f32 1.442695, %v1757_v14 }
 0x9b3   : > { %3831 = vpow2.f32 %v1760_v15 }
 0x9b6   : > { %v1753_v17 = vpop.xlane.xlu1 %1752 }
 0x9b7   : > { %v1758_v19 = vsub.f32 %v1746_v8, %v1753_v17 }
 0x9b9   : > { %v3832_v21 = vpop.eup %3831  ;;  %v1762_v22 = vmul.f32 1.442695, %v1758_v19 }
 0x9ba   : > { %v1766_v23 = vsel %vm1066_vm15, %v3832_v21, 0.0 }
 0x9bb   : > { %3833 = vpow2.f32 %v1762_v22  ;;  %1767 = vadd.xlane.f32.xlu0 %v1766_v23  ;;  %v1939_v23 = vld [vmem:[%s5537_s15 + $0x10] sm:$0xff] }
 0x9be   : > { %v1756_v26 = vpop.xlane.xlu2 %1755 }
 0x9bf   : > { %v1759_v30 = vsub.f32 %v1747_v10, %v1756_v26  ;;  %v1940_v26 = vld [vmem:[%s5537_s15 + $0x18] sm:$0xff] }
 0x9c1   : > { %v3834_v34 = vpop.eup %3833  ;;  %v1764_v37 = vmul.f32 1.442695, %v1759_v30  ;;  %v1944_v30 = vpack.c.bf16 %v1940_v26, %v1939_v23  ;;  %v2009_v23 = vld [vmem:[%s5452_s17 + $0x48] sm:$0xff] }
 0x9c2   : > { %v1769_v38 = vsel %vm1066_vm15, %v3834_v34, 0.0 }
 0x9c3   : > { %3835 = vpow2.f32 %v1764_v37  ;;  %1770 = vadd.xlane.f32.xlu1 %v1769_v38  ;;  %1961 = vmatpush.bf16.msra.mxu2 %v1944_v30  ;;  %v1937_v38 = vld [vmem:[%s5537_s15] sm:$0xff]  ;;  %v2006_v30 = vld [vmem:[%s5452_s17 + $0x30] sm:$0xff] }
 0x9c9   : > { %v3836_v39 = vpop.eup %3835 }
 0x9ca   : > { %v1772_v40 = vsel %vm1066_vm15, %v3836_v39, 0.0 }
 0x9cb   : > { %1773 = vadd.xlane.f32.xlu2 %v1772_v40 }
 0xa2e   : > { %v1768_v43 = vpop.xlane.xlu0 %1767 }
 0xa2f   : > { %3837 = vrcp.f32 %v1768_v43 }
 0xa35   : > { %v3838_v49 = vpop.eup %3837 }
 0xa36   : > { %v1771_v48 = vpop.xlane.xlu1 %1770  ;;  %v1778_v51 = vmul.f32 %v3838_v49, %v3832_v21 }
 0xa37   : > { %3839 = vrcp.f32 %v1771_v48 }
 0xa3d   : > { %v3840_v58 = vpop.eup %3839 }
 0xa3e   : > { %v1779_v62 = vmul.f32 %v3840_v58, %v3834_v34  ;;  %v1774_v53 = vpop.xlane.xlu2 %1773 }
 0xa3f   : > { %3841 = vrcp.f32 %v1774_v53 }
 0xa40   : > { %v1781_v52 = vpack.c.bf16 %v1779_v62, %v1778_v51 }
 0xa42   : > { %3549 = vmatmul.msk.bf16.vlgmr.msra.gmra.mxu0 %vm1066_vm15, %v1781_v52 }
 0xa45   : > { %v3842_v54 = vpop.eup %3841 }
 0xa46   : > { %v1780_v36 = vmul.f32 %v3842_v54, %v3836_v39  ;;  %v1938_v39 = vld [vmem:[%s5537_s15 + $0x8] sm:$0xff] }
 0xa47   : > { %v1943_v43 = vpack.c.bf16 %v1938_v39, %v1937_v38  ;;  %v2004_v38 = vld [vmem:[%s5452_s17 + $0x20] sm:$0xff]  ;;  %v2005_v39 = vld [vmem:[%s5452_s17 + $0x28] sm:$0xff] }
 0xa48   : > { %v1782_v57 = vpack.c.bf16 %v1780_v36, %v1780_v36 }
 0xa49   : > { %1962 = vmatpush.bf16.msra.mxu2 %v1943_v43  ;;  %v2002_v43 = vld [vmem:[%s5452_s17 + $0x10] sm:$0xff] }
 0xa52   : > { %3550 = vmatmul.msk.bf16.gmra.mxu0 %vm1066_vm15, %v1782_v57 }
 0xabf   : > { %v1803_v59 = vpop.f32.mrf.mxu0 }
 0xac7   : > { %v1805_v60 = vpop.f32.mrf.mxu0 }
 0xac8   : > { %v1814_v61 = vpack.c.bf16 %v1805_v60, %v1803_v59 }
 0xaca   : > { %3552 = vmatmul.msk.bf16.vlgmr.msra.gmra.mxu1 %vm1029_vm13, %v1814_v61 }
 0xacf   : > { %v1808_v46 = vpop.f32.mrf.mxu0 }
 0xad0   : > { %v1815_v18 = vpack.c.bf16 %v1808_v46, %v1808_v46 }
 0xad7   : > { %v1810_v25 = vpop.f32.mrf.mxu0 }
 0xada   : > { %3553 = vmatmul.msk.bf16.gmra.mxu1 %vm1029_vm13, %v1815_v18 }
 0xb47   : > { %v1835_v63 = vpop.f32.mrf.mxu1 }
 0xb48   : > { %v1844_v0 = vadd.f32 %v1835_v63, %v4638_v2  ;;  %v3764_v63 = vld [vmem:[%s5538_s13] ss:$0 sm:$0xff] }
 0xb4a   : > { %v1847_v42 = vadd.f32 %v1844_v0, %v4229_v16 }
 0xb4c   : > { %v4673_v5 = vadd.f32 %v3763_v1, %v1847_v42 }
 0xb4e   : > { %v1859_v6 = vsel %vm847_vm1, %v4673_v5, 0.0 }
 0xb4f   : > { %1860 = vadd.xlane.f32.xlu0 %v1859_v6  ;;  %v1837_v7 = vpop.f32.mrf.mxu1  ;;  %v3765_v6 = vld [vmem:[%s5539_s14] ss:$0 sm:$0xff] }
 0xb50   : > { %v1845_v56 = vadd.f32 %v1837_v7, %v1616_v50 }
 0xb52   : > { %v1848_v2 = vadd.f32 %v1845_v56, %v4236_v20 }
 0xb54   : > { %v4679_v31 = vadd.f32 %v3763_v1, %v1848_v2 }
 0xb56   : > { %v1862_v16 = vsel %vm847_vm1, %v4679_v31, 0.0 }
 0xb57   : > { %1863 = vadd.xlane.f32.xlu1 %v1862_v16  ;;  %v1840_v27 = vpop.f32.mrf.mxu1 }
 0xb58   : > { %v1846_v32 = vadd.f32 %v1840_v27, %v4644_v29 }
 0xb5a   : > { %v1849_v28 = vadd.f32 %v1846_v32, %v4243_v24 }
 0xb5c   : > { %v4685_v3 = vadd.f32 %v3763_v1, %v1849_v28 }
 0xb5e   : > { %v1865_v8 = vsel %vm847_vm1, %v4685_v3, 0.0 }
 0xb5f   : > { %1866 = vadd.xlane.f32.xlu2 %v1865_v8  ;;  %v1842_v9 = vpop.f32.mrf.mxu1 }
 0xbc2   : > { %v1861_v35 = vpop.xlane.xlu0 %1860 }
 0xbc3   : > { %v1868_v20 = vmul.f32 %v1861_v35, %v4247_v33 }
 0xbc5   : > { %v1871_v4 = vsub.f32 %v4673_v5, %v1868_v20 }
 0xbc7   : > { %v1874_v10 = vmul.f32 %v1871_v4, %v1871_v4 }
 0xbc9   : > { %v1877_v11 = vsel %vm847_vm1, %v1874_v10, 0.0 }
 0xbca   : > { %1878 = vadd.xlane.f32.xlu0 %v1877_v11  ;;  %v1864_v12 = vpop.xlane.xlu1 %1863 }
 0xbcb   : > { %v1869_v29 = vmul.f32 %v1864_v12, %v4247_v33  ;;  %v2014_v12 = vld [vmem:[%s5452_s17 + $0x70] sm:$0xff] }
 0xbcd   : > { %v1872_v24 = vsub.f32 %v4679_v31, %v1869_v29  ;;  %v2015_v29 = vld [vmem:[%s5452_s17 + $0x78] sm:$0xff] }
 0xbcf   : > { %v1875_v13 = vmul.f32 %v1872_v24, %v1872_v24 }
 0xbd1   : > { %v1880_v14 = vsel %vm847_vm1, %v1875_v13, 0.0  ;;  %v2012_v13 = vld [vmem:[%s5452_s17 + $0x60] sm:$0xff] }
 0xbd2   : > { %1881 = vadd.xlane.f32.xlu1 %v1880_v14  ;;  %v1867_v15 = vpop.xlane.xlu2 %1866  ;;  %v2013_v14 = vld [vmem:[%s5452_s17 + $0x68] sm:$0xff] }
 0xbd3   : > { %v1870_v17 = vmul.f32 %v1867_v15, %v4247_v33  ;;  %v2024_v15 = vpack.c.bf16 %v2013_v14, %v2012_v13 }
 0xbd5   : > { %v4697_v19 = vsub.f32 %v4685_v3, %v1870_v17  ;;  %v2010_v17 = vld [vmem:[%s5452_s17 + $0x50] sm:$0xff] }
 0xbd7   : > { %v1876_v21 = vmul.f32 %v4697_v19, %v4697_v19 }
 0xbd9   : > { %v1883_v22 = vsel %vm847_vm1, %v1876_v21, 0.0 }
 0xbda   : > { %1884 = vadd.xlane.f32.xlu2 %v1883_v22  ;;  %v2008_v22 = vld [vmem:[%s5452_s17 + $0x40] sm:$0xff] }
 0xbdb   : > { %v2022_v26 = vpack.c.bf16 %v2009_v23, %v2008_v22 }
 0xc3d   : > { %v1879_v34 = vpop.xlane.xlu0 %1878 }
 0xc3e   : > { %v1886_v37 = vmul.f32 %v1879_v34, %v4247_v33  ;;  %v2007_v34 = vld [vmem:[%s5452_s17 + $0x38] sm:$0xff] }
 0xc40   : > { %v1889_v40 = vadd.f32 1e-06, %v1886_v37  ;;  %v2021_v37 = vpack.c.bf16 %v2007_v34, %v2006_v30 }
 0xc42   : > { %3843 = vrsqrt.f32 %v1889_v40  ;;  %vm1898_vm2 = vweird.f32 %v1889_v40 }
 0xc45   : > { %v1882_v44 = vpop.xlane.xlu1 %1881 }
 0xc46   : > { %v1887_v45 = vmul.f32 %v1882_v44, %v4247_v33  ;;  %v2003_v44 = vld [vmem:[%s5452_s17 + $0x18] sm:$0xff] }
 0xc48   : > { %v3844_v47 = vpop.eup %3843  ;;  %v1890_v48 = vadd.f32 1e-06, %v1887_v45  ;;  %v2019_v45 = vpack.c.bf16 %v2003_v44, %v2002_v43 }
 0xc49   : > { %v1893_v49 = vmul.f32 %v3844_v47, %v1889_v40  ;;  %vm1899_vm0 = vweird.f32 %v3844_v47  ;;  %v2020_v40 = vpack.c.bf16 %v2005_v39, %v2004_v38 }
 0xc4a   : > { %3845 = vrsqrt.f32 %v1890_v48  ;;  %vm1900_vm3 = vmor %vm1898_vm2, %vm1899_vm0  ;;  %vm1908_vm5 = vweird.f32 %v1890_v48 }
 0xc4b   : > { %v1894_v58 = vmul.f32 %v3844_v47, %v1893_v49  ;;  %v2001_v49 = vld [vmem:[%s5452_s17 + $0x8] sm:$0xff] }
 0xc4d   : > { %v1895_v51 = vmul.f32 0.5, %v1894_v58  ;;  %v1885_v62 = vpop.xlane.xlu2 %1884 }
 0xc4e   : > { %v1888_v52 = vmul.f32 %v1885_v62, %v4247_v33 }
 0xc4f   : > { %v1896_v53 = vsub.f32 1.5, %v1895_v51 }
 0xc50   : > { %v3846_v54 = vpop.eup %3845  ;;  %v1891_v36 = vadd.f32 1e-06, %v1888_v52 }
 0xc51   : > { %v1897_v57 = vmul.f32 %v3844_v47, %v1896_v53  ;;  %v1903_v59 = vmul.f32 %v3846_v54, %v1890_v48  ;;  %vm1909_vm4 = vweird.f32 %v3846_v54  ;;  %v2000_v48 = vld [vmem:[%s5452_s17] sm:$0xff] }
 0xc52   : > { %3847 = vrsqrt.f32 %v1891_v36  ;;  %vm1910_vm6 = vmor %vm1908_vm5, %vm1909_vm4  ;;  %vm1918_vm8 = vweird.f32 %v1891_v36  ;;  %v2018_v51 = vpack.c.bf16 %v2001_v49, %v2000_v48 }
 0xc53   : > { %v1904_v60 = vmul.f32 %v3846_v54, %v1903_v59  ;;  %v1901_v61 = vsel %vm1900_vm3, %v3844_v47, %v1897_v57  ;;  %v3766_v47 = vld [vmem:[%s5451_s16] ss:$0 sm:$0xff] }
 0xc54   : > { %v1922_v0 = vmul.f32 %v1901_v61, %v1871_v4 }
 0xc55   : > { %v1905_v46 = vmul.f32 0.5, %v1904_v60 }
 0xc56   : > { %v1928_v7 = vmul.f32 %v3764_v63, %v1922_v0 }
 0xc57   : > { %v1906_v25 = vsub.f32 1.5, %v1905_v46 }
 0xc58   : > { %v3848_v18 = vpop.eup %3847  ;;  %v1934_v32 = vadd.f32 %v3765_v6, %v1928_v7 }
 0xc59   : > { %v1907_v1 = vmul.f32 %v3846_v54, %v1906_v25  ;;  %v1913_v42 = vmul.f32 %v3848_v18, %v1891_v36  ;;  %vm1919_vm7 = vweird.f32 %v3848_v18 }
 0xc5a   : > { %vm1920_vm9 = vmor %vm1918_vm8, %vm1919_vm7 }
 0xc5b   : > { %v1911_v55 = vsel %vm1910_vm6, %v3846_v54, %v1907_v1  ;;  %v1914_v50 = vmul.f32 %v3848_v18, %v1913_v42 }
 0xc5c   : > { %v1923_v56 = vmul.f32 %v1911_v55, %v1872_v24  ;;  %v2025_v24 = vpack.c.bf16 %v2015_v29, %v2014_v12 }
 0xc5d   : > { %v1915_v2 = vmul.f32 0.5, %v1914_v50 }
 0xc5e   : > { %v1929_v16 = vmul.f32 %v3764_v63, %v1923_v56  ;;  %2026 = vmatpush.bf16.msra.mxu3 %v2025_v24  ;;  %v3767_v24 = vld [vmem:[%s5453_s18] ss:$0 sm:$0xff] }
 0xc5f   : > { %v1916_v27 = vsub.f32 1.5, %v1915_v2 }
 0xc60   : > { %v1935_v28 = vadd.f32 %v3765_v6, %v1929_v16 }
 0xc61   : > { %v1917_v8 = vmul.f32 %v3848_v18, %v1916_v27 }
 0xc62   : > { %v1941_v9 = vpack.c.bf16 %v1935_v28, %v1934_v32  ;;  %2027 = vmatpush.bf16.msra.mxu3 %v2024_v15 }
 0xc63   : > { %v1921_v35 = vsel %vm1920_vm9, %v3848_v18, %v1917_v8 }
 0xc64   : > { %3554 = vmatmul.msk.bf16.vlgmr.msra.gmra.mxu2 %vm847_vm1, %v1941_v9  ;;  %v1924_v20 = vmul.f32 %v1921_v35, %v4697_v19  ;;  %v2011_v19 = vld [vmem:[%s5452_s17 + $0x58] sm:$0xff] }
 0xc65   : > { %v2023_v21 = vpack.c.bf16 %v2011_v19, %v2010_v17 }
 0xc66   : > { %v1930_v4 = vmul.f32 %v3764_v63, %v1924_v20 }
 0xc67   : > { %2028 = vmatpush.bf16.msra.mxu3 %v2023_v21 }
 0xc68   : > { %v1936_v10 = vadd.f32 %v3765_v6, %v1930_v4 }
 0xc6a   : > { %v1942_v11 = vpack.c.bf16 %v1936_v10, %v1936_v10 }
 0xc6b   : > { %2029 = vmatpush.bf16.msra.mxu3 %v2022_v26 }
 0xc6f   : > { %2030 = vmatpush.bf16.msra.mxu3 %v2021_v37 }
 0xc73   : > { %2031 = vmatpush.bf16.msra.mxu3 %v2020_v40 }
 0xc74   : > { %3555 = vmatmul.msk.bf16.gmra.mxu2 %vm847_vm1, %v1942_v11 }
 0xc77   : > { %2032 = vmatpush.bf16.msra.mxu3 %v2019_v45 }
 0xc7b   : > { %2033 = vmatpush.bf16.msra.mxu3 %v2018_v51 }
 0xce7   : > { %v1964_v58 = vpop.f32.mrf.mxu2 }
 0xce8   : > { %v1965_v62 = vadd.f32 %v3766_v47, %v1964_v58 }
 0xcea   : > { %v1973_v52 = vmul.f32 %v1965_v62, %v1965_v62 }
 0xcec   : > { %v1976_v53 = vmul.f32 %v1973_v52, %v1965_v62 }
 0xcee   : > { %v1979_v54 = vmul.f32 0.044715, %v1976_v53  ;;  %v3567_v53 = vld [vmem:[%s5526_s5 + $0x90] sm:$0xff] }
 0xcef   : > { %v1966_v36 = vpop.f32.mrf.mxu2 }
 0xcf0   : > { %v1982_v57 = vadd.f32 %v1979_v54, %v1965_v62  ;;  %v1967_v59 = vadd.f32 %v3766_v47, %v1966_v36  ;;  %v3568_v54 = vld [vmem:[%s5526_s5 + $0x98] sm:$0xff]  ;;  %v3560_v36 = vld [vmem:[%s5524_s0 + $0x90] sm:$0xff] }
 0xcf2   : > { %v1985_v60 = vmul.f32 0.7978846, %v1982_v57  ;;  %v1974_v61 = vmul.f32 %v1967_v59, %v1967_v59  ;;  %v2180_v57 = vpack.c.bf16 %v3568_v54, %v3567_v53 }
 0xcf4   : > { %v1977_v46 = vmul.f32 %v1974_v61, %v1967_v59  ;;  %3849 = vtanh.f32 %v1985_v60  ;;  %v3574_v60 = vld [vmem:[%s5527_s26 + $0x90] sm:$0xff]  ;;  %v3575_v61 = vld [vmem:[%s5527_s26 + $0x98] sm:$0xff]  ;;  %2192 = vmatpush.bf16.msrb.mxu1 %v2180_v57  ;;  %v3769_v57 = vld [vmem:[%s5530_s10 + $0x1] ss:$0 sm:$0xff]  ;;  %s3339_s10 = scalar_lea.sflag [#allocation3], %s5372_s22 }
 0xcf6   : > { %v1980_v25 = vmul.f32 0.044715, %v1977_v46 }
 0xcf7   : > { %v1969_v18 = vpop.f32.mrf.mxu2 }
 0xcf8   : > { %v1983_v63 = vadd.f32 %v1980_v25, %v1967_v59  ;;  %v1970_v0 = vadd.f32 %v3766_v47, %v1969_v18  ;;  %v2210_v18 = vpack.c.bf16 %v3575_v61, %v3574_v60 }
 0xcfa   : > { %v1986_v1 = vmul.f32 0.7978846, %v1983_v63  ;;  %v1975_v42 = vmul.f32 %v1970_v0, %v1970_v0  ;;  %v3850_v55 = vpop.eup %3849  ;;  %2222 = vmatpush.bf16.msrb.mxu2 %v2210_v18 }
 0xcfb   : > { %v1991_v7 = vadd.f32 1.0, %v3850_v55 }
 0xcfc   : > { %3851 = vtanh.f32 %v1986_v1  ;;  %v1978_v50 = vmul.f32 %v1975_v42, %v1970_v0  ;;  %v3559_v1 = vld [vmem:[%s5524_s0 + $0x88] sm:$0xff]  ;;  %v3565_v42 = vld [vmem:[%s5526_s5 + $0x80] sm:$0xff] }
 0xcfd   : > { %v1994_v32 = vmul.f32 0.5, %v1991_v7  ;;  %v3572_v7 = vld [vmem:[%s5527_s26 + $0x80] sm:$0xff] }
 0xcfe   : > { %v1981_v6 = vmul.f32 0.044715, %v1978_v50 }
 0xcff   : > { %v1971_v56 = vpop.f32.mrf.mxu2  ;;  %v1997_v9 = vmul.f32 %v1994_v32, %v1965_v62 }
 0xd00   : > { %v1984_v2 = vadd.f32 %v1981_v6, %v1970_v0  ;;  %v3566_v6 = vld [vmem:[%s5526_s5 + $0x88] sm:$0xff] }
 0xd01   : > { %v3573_v56 = vld [vmem:[%s5527_s26 + $0x88] sm:$0xff] }
 0xd02   : > { %v3852_v16 = vpop.eup %3851  ;;  %v1987_v27 = vmul.f32 0.7978846, %v1984_v2  ;;  %v2179_v2 = vpack.c.bf16 %v3566_v6, %v3565_v42 }
 0xd03   : > { %v1992_v28 = vadd.f32 1.0, %v3852_v16  ;;  %v2209_v16 = vpack.c.bf16 %v3573_v56, %v3572_v7 }
 0xd04   : > { %3853 = vtanh.f32 %v1987_v27  ;;  %2193 = vmatpush.bf16.msrb.mxu1 %v2179_v2 }
 0xd05   : > { %v1995_v8 = vmul.f32 0.5, %v1992_v28  ;;  %2223 = vmatpush.bf16.msrb.mxu2 %v2209_v16  ;;  %v3771_v16 = vld [vmem:[%s5531_s30 + $0x4] ss:$0 sm:$0xff] }
 0xd07   : > { %v1998_v35 = vmul.f32 %v1995_v8, %v1967_v59  ;;  %v3561_v59 = vld [vmem:[%s5524_s0 + $0x98] sm:$0xff] }
 0xd08   : > { %v2144_v25 = vpack.c.bf16 %v3561_v59, %v3560_v36 }
 0xd09   : > { %v2016_v20 = vpack.c.bf16 %v1998_v35, %v1997_v9 }
 0xd0a   : > { %v3854_v4 = vpop.eup %3853  ;;  %2162 = vmatpush.bf16.msrb.mxu0 %v2144_v25 }
 0xd0b   : > { %2034 = vmatmul.bf16.vlgmr.msra.gmra.mxu3 %v2016_v20  ;;  %v1993_v10 = vadd.f32 1.0, %v3854_v4 }
 0xd0d   : > { %v1996_v11 = vmul.f32 0.5, %v1993_v10 }
 0xd0f   : > { %v1999_v12 = vmul.f32 %v1996_v11, %v1970_v0  ;;  %v3558_v0 = vld [vmem:[%s5524_s0 + $0x80] sm:$0xff] }
 0xd10   : > { %v2143_v50 = vpack.c.bf16 %v3559_v1, %v3558_v0 }
 0xd11   : > { %v2017_v29 = vpack.c.bf16 %v1999_v12, %v1999_v12 }
 0xd12   : > { %2163 = vmatpush.bf16.msrb.mxu0 %v2143_v50 }
 0xd1b   : > { %2039 = vmatmul.bf16.gmra.mxu3 %v2017_v29 }
 0xd8e   : > { %v2035_v13 = vpop.f32.mrf.mxu3 }
 0xd8f   : > { %v2044_v14 = vadd.f32 %v2035_v13, %v4673_v5 }
 0xd91   : > { %v4781_v15 = vadd.f32 %v3767_v24, %v2044_v14 }
 0xd93   : > { %v2058_v17 = vsel %vm847_vm1, %v4781_v15, 0.0 }
 0xd94   : > { %2059 = vadd.xlane.f32.xlu0 %v2058_v17 }
 0xd96   : > { %v2037_v19 = vpop.f32.mrf.mxu3 }
 0xd97   : > { %v2045_v21 = vadd.f32 %v2037_v19, %v4679_v31 }
 0xd99   : > { %v4786_v22 = vadd.f32 %v3767_v24, %v2045_v21 }
 0xd9b   : > { %v2061_v23 = vsel %vm847_vm1, %v4786_v22, 0.0 }
 0xd9c   : > { %2062 = vadd.xlane.f32.xlu1 %v2061_v23  ;;  %v3586_v23 = vld [vmem:[%s5524_s0 + $0xb0] sm:$0xff] }
 0xd9e   : > { %v2040_v26 = vpop.f32.mrf.mxu3 }
 0xd9f   : > { %v2046_v30 = vadd.f32 %v2040_v26, %v4685_v3  ;;  %v3587_v26 = vld [vmem:[%s5524_s0 + $0xb8] sm:$0xff] }
 0xda1   : > { %v4791_v34 = vadd.f32 %v3767_v24, %v2046_v30  ;;  %v3593_v30 = vld [vmem:[%s5526_s5 + $0xb0] sm:$0xff] }
 0xda3   : > { %v2064_v5 = vsel %vm847_vm1, %v4791_v34, 0.0 }
 0xda4   : > { %2065 = vadd.xlane.f32.xlu2 %v2064_v5  ;;  %v2349_v5 = vpack.c.bf16 %v3587_v26, %v3586_v23  ;;  %v3601_v23 = vld [vmem:[%s5527_s26 + $0xb8] sm:$0xff]  ;;  %v3770_v26 = vld [vmem:[%s5534_s8 + $0x4] ss:$0 sm:$0xff] }
 0xda6   : > { %v2042_v37 = vpop.f32.mrf.mxu3  ;;  %2361 = vmatpush.bf16.msra.mxu1 %v2349_v5 }
 0xda7   : > { %v3594_v37 = vld [vmem:[%s5526_s5 + $0xb8] sm:$0xff] }
 0xe07   : > { %v2060_v38 = vpop.xlane.xlu0 %2059 }
 0xe08   : > { %v2067_v39 = vmul.f32 %v2060_v38, %v4247_v33  ;;  %v3584_v38 = vld [vmem:[%s5524_s0 + $0xa0] sm:$0xff] }
 0xe0a   : > { %v4797_v31 = vsub.f32 %v4781_v15, %v2067_v39  ;;  %v3585_v39 = vld [vmem:[%s5524_s0 + $0xa8] sm:$0xff] }
 0xe0c   : > { %v2073_v40 = vmul.f32 %v4797_v31, %v4797_v31 }
 0xe0e   : > { %v2076_v43 = vsel %vm847_vm1, %v2073_v40, 0.0 }
 0xe0f   : > { %2077 = vadd.xlane.f32.xlu0 %v2076_v43  ;;  %v2063_v3 = vpop.xlane.xlu1 %2062  ;;  %v2379_v43 = vpack.c.bf16 %v3594_v37, %v3593_v30 }
 0xe10   : > { %v2068_v44 = vmul.f32 %v2063_v3, %v4247_v33  ;;  %v3591_v3 = vld [vmem:[%s5526_s5 + $0xa0] sm:$0xff] }
 0xe11   : > { %2391 = vmatpush.bf16.msra.mxu2 %v2379_v43  ;;  %v3598_v43 = vld [vmem:[%s5527_s26 + $0xa0] sm:$0xff] }
 0xe12   : > { %v4804_v45 = vsub.f32 %v4786_v22, %v2068_v44  ;;  %v3592_v44 = vld [vmem:[%s5526_s5 + $0xa8] sm:$0xff] }
 0xe13   : > { %v2378_v53 = vpack.c.bf16 %v3592_v44, %v3591_v3  ;;  %v3599_v3 = vld [vmem:[%s5527_s26 + $0xa8] sm:$0xff] }
 0xe14   : > { %v2074_v47 = vmul.f32 %v4804_v45, %v4804_v45 }
 0xe15   : > { %2392 = vmatpush.bf16.msra.mxu2 %v2378_v53 }
 0xe16   : > { %v2079_v48 = vsel %vm847_vm1, %v2074_v47, 0.0 }
 0xe17   : > { %2080 = vadd.xlane.f32.xlu1 %v2079_v48  ;;  %v2066_v49 = vpop.xlane.xlu2 %2065  ;;  %v3768_v48 = vld [vmem:[%s5529_s24 + $0x1] ss:$0 sm:$0xff] }
 0xe18   : > { %v2069_v58 = vmul.f32 %v2066_v49, %v4247_v33 }
 0xe1a   : > { %v4811_v51 = vsub.f32 %v4791_v34, %v2069_v58  ;;  %v2348_v58 = vpack.c.bf16 %v3585_v39, %v3584_v38 }
 0xe1c   : > { %v2075_v62 = vmul.f32 %v4811_v51, %v4811_v51  ;;  %2362 = vmatpush.bf16.msra.mxu1 %v2348_v58  ;;  %v4945_v58 = vld [vmem:[%s5534_s8 + $0x5] ss:$0 sm:$0xff] }
 0xe1e   : > { %v2082_v52 = vsel %vm847_vm1, %v2075_v62, 0.0 }
 0xe1f   : > { %2083 = vadd.xlane.f32.xlu2 %v2082_v52 }
 0xe82   : > { %v2078_v46 = vpop.xlane.xlu0 %2077 }
 0xe83   : > { %v2085_v63 = vmul.f32 %v2078_v46, %v4247_v33 }
 0xe85   : > { %v2088_v55 = vadd.f32 1e-06, %v2085_v63 }
 0xe87   : > { %3855 = vrsqrt.f32 %v2088_v55  ;;  %vm2097_vm11 = vweird.f32 %v2088_v55 }
 0xe8a   : > { %v2081_v27 = vpop.xlane.xlu1 %2080 }
 0xe8b   : > { %v2086_v32 = vmul.f32 %v2081_v27, %v4247_v33 }
 0xe8d   : > { %v3856_v28 = vpop.eup %3855  ;;  %v2089_v8 = vadd.f32 1e-06, %v2086_v32 }
 0xe8e   : > { %v2092_v9 = vmul.f32 %v3856_v28, %v2088_v55  ;;  %vm2098_vm10 = vweird.f32 %v3856_v28 }
 0xe8f   : > { %3857 = vrsqrt.f32 %v2089_v8  ;;  %vm4855_vm0 = vmor %vm2097_vm11, %vm2098_vm10  ;;  %vm2107_vm3 = vweird.f32 %v2089_v8 }
 0xe90   : > { %v2093_v35 = vmul.f32 %v3856_v28, %v2092_v9 }
 0xe92   : > { %v2094_v20 = vmul.f32 0.5, %v2093_v35  ;;  %v2084_v4 = vpop.xlane.xlu2 %2083 }
 0xe93   : > { %v2087_v10 = vmul.f32 %v2084_v4, %v4247_v33  ;;  %v3772_v4 = vld [vmem:[%s5532_s29 + $0x4] ss:$0 sm:$0xff] }
 0xe94   : > { %v2095_v11 = vsub.f32 1.5, %v2094_v20 }
 0xe95   : > { %v3858_v12 = vpop.eup %3857  ;;  %v2090_v29 = vadd.f32 1e-06, %v2087_v10 }
 0xe96   : > { %v2096_v24 = vmul.f32 %v3856_v28, %v2095_v11  ;;  %v2102_v13 = vmul.f32 %v3858_v12, %v2089_v8  ;;  %vm2108_vm2 = vweird.f32 %v3858_v12 }
 0xe97   : > { %3859 = vrsqrt.f32 %v2090_v29  ;;  %vm2109_vm4 = vmor %vm2107_vm3, %vm2108_vm2  ;;  %vm2117_vm6 = vweird.f32 %v2090_v29  ;;  %vm3264_vm2 = vcmask 253952  }
 0xe98   : > { %v2103_v14 = vmul.f32 %v3858_v12, %v2102_v13  ;;  %v2100_v19 = vsel %vm4855_vm0, %v3856_v28, %v2096_v24 }
 0xe99   : > { %v2121_v49 = vmul.f32 %v2100_v19, %v4797_v31 }
 0xe9a   : > { %v2104_v21 = vmul.f32 0.5, %v2103_v14 }
 0xe9b   : > { %v2127_v59 = vmul.f32 %v3768_v48, %v2121_v49 }
 0xe9c   : > { %v2105_v40 = vsub.f32 1.5, %v2104_v21  ;;  %v3600_v21 = vld [vmem:[%s5527_s26 + $0xb0] sm:$0xff] }
 0xe9d   : > { %v3860_v47 = vpop.eup %3859  ;;  %v2133_v25 = vadd.f32 %v3769_v57, %v2127_v59  ;;  %v2409_v37 = vpack.c.bf16 %v3601_v23, %v3600_v21 }
 0xe9e   : > { %v2106_v62 = vmul.f32 %v3858_v12, %v2105_v40  ;;  %v2112_v52 = vmul.f32 %v3860_v47, %v2090_v29  ;;  %vm2118_vm5 = vweird.f32 %v3860_v47 }
 0xe9f   : > { %vm2119_vm7 = vmor %vm2117_vm6, %vm2118_vm5  ;;  %vm3320_vm6 = vcmask 130048  }
 0xea0   : > { %v2110_v54 = vsel %vm2109_vm4, %v3858_v12, %v2106_v62  ;;  %v2113_v36 = vmul.f32 %v3860_v47, %v2112_v52 }
 0xea1   : > { %v2122_v60 = vmul.f32 %v2110_v54, %v4804_v45 }
 0xea2   : > { %v2114_v61 = vmul.f32 0.5, %v2113_v36 }
 0xea3   : > { %v2128_v31 = vmul.f32 %v3768_v48, %v2122_v60 }
 0xea4   : > { %v2115_v46 = vsub.f32 1.5, %v2114_v61 }
 0xea5   : > { %v2134_v18 = vadd.f32 %v3769_v57, %v2128_v31  ;;  %v3774_v31 = vld [vmem:[%s5531_s30 + $0x5] ss:$0 sm:$0xff] }
 0xea6   : > { %v2116_v63 = vmul.f32 %v3860_v47, %v2115_v46 }
 0xea7   : > { %v4893_v0 = vpack.c.bf16 %v2134_v18, %v2133_v25 }
 0xea8   : > { %v2120_v1 = vsel %vm2119_vm7, %v3860_v47, %v2116_v63  ;;  %v2408_v47 = vpack.c.bf16 %v3599_v3, %v3598_v43 }
 0xea9   : > { %3563 = vmatmul.msk.bf16.vlgmr.msrb.gmra.mxu0 %vm847_vm1, %v4893_v0  ;;  %3570 = vmatmul.msk.bf16.vlgmr.msrb.gmra.mxu1 %vm847_vm1, %v4893_v0  ;;  %v2123_v45 = vmul.f32 %v2120_v1, %v4811_v51 }
 0xeaa   : > { %3577 = vmatmul.msk.bf16.vlgmr.msrb.gmra.mxu2 %vm847_vm1, %v4893_v0 }
 0xeab   : > { %v2129_v42 = vmul.f32 %v3768_v48, %v2123_v45 }
 0xead   : > { %v2135_v55 = vadd.f32 %v3769_v57, %v2129_v42 }
 0xeaf   : > { %v4902_v50 = vpack.c.bf16 %v2135_v55, %v2135_v55 }
 0xeb9   : > { %3564 = vmatmul.msk.bf16.gmra.mxu0 %vm847_vm1, %v4902_v50  ;;  %3571 = vmatmul.msk.bf16.gmra.mxu1 %vm847_vm1, %v4902_v50 }
 0xeba   : > { %3578 = vmatmul.msk.bf16.gmra.mxu2 %vm847_vm1, %v4902_v50 }
 0xec9   : > { %3589 = vmatmul.msk.bf16.vlgmr.msra.gmra.mxu1 %vm847_vm1, %v4893_v0 }
 0xeca   : > { %3596 = vmatmul.msk.bf16.vlgmr.msra.gmra.mxu2 %vm847_vm1, %v4893_v0 }
 0xed9   : > { %3590 = vmatmul.msk.bf16.gmra.mxu1 %vm847_vm1, %v4902_v50 }
 0xeda   : > { %3597 = vmatmul.msk.bf16.gmra.mxu2 %vm847_vm1, %v4902_v50 }
 0xf26   : > { %v2165_v51 = vpop.f32.mrf.mxu0  ;;  %v2195_v6 = vpop.f32.mrf.mxu1 }
 0xf27   : > { %v2196_v10 = vadd.f32 %v3771_v16, %v2195_v6  ;;  %v2166_v48 = vadd.f32 %v3770_v26, %v2165_v51 }
 0xf2d   : > { %v2225_v7 = vpop.f32.mrf.mxu2 }
 0xf2e   : > { %v2167_v56 = vpop.f32.mrf.mxu0  ;;  %v2197_v2 = vpop.f32.mrf.mxu1  ;;  %v2226_v30 = vadd.f32 %v3772_v4, %v2225_v7 }
 0xf2f   : > { %v2198_v35 = vadd.f32 %v3771_v16, %v2197_v2  ;;  %v2168_v38 = vadd.f32 %v3770_v26, %v2167_v56 }
 0xf31   : > { %v2236_v13 = vpack.c.bf16 %v2198_v35, %v2196_v10  ;;  %v2234_v49 = vpack.c.bf16 %v2168_v38, %v2166_v48 }
 0xf33   : > { %v2245_v5 = vsel %vm1029_vm13, %v2236_v13, 0 }
 0xf35   : > { %v2227_v27 = vpop.f32.mrf.mxu2 }
 0xf36   : > { %v2170_v32 = vpop.f32.mrf.mxu0  ;;  %v2200_v28 = vpop.f32.mrf.mxu1  ;;  %v2228_v17 = vadd.f32 %v3772_v4, %v2227_v27 }
 0xf37   : > { %v2201_v8 = vadd.f32 %v3771_v16, %v2200_v28  ;;  %v2171_v57 = vadd.f32 %v3770_v26, %v2170_v32 }
 0xf38   : > { %v2309_v39 = vpack.c.bf16 %v2228_v17, %v2226_v30 }
 0xf39   : > { %v2237_v9 = vpack.c.bf16 %v2201_v8, %v2201_v8  ;;  %v2235_v61 = vpack.c.bf16 %v2171_v57, %v2171_v57 }
 0xf3b   : > { %v2248_v20 = vsel %vm1029_vm13, %v2237_v9, 0 }
 0xf3c   : > { %2256 = vmatpush.bf16.xpose.msrb.mxu3 %v2248_v20 }
 0xf3d   : > { %v2230_v11 = vpop.f32.mrf.mxu2 }
 0xf3e   : > { %v2231_v12 = vadd.f32 %v3772_v4, %v2230_v11  ;;  %v2172_v29 = vpop.f32.mrf.mxu0  ;;  %v2202_v24 = vpop.f32.mrf.mxu1 }
 0xf3f   : > { %v3775_v29 = vld [vmem:[%s5532_s29 + $0x5] ss:$0 sm:$0xff] }
 0xf40   : > { %v2310_v14 = vpack.c.bf16 %v2231_v12, %v2231_v12 }
 0xf42   : > { %v2318_v19 = vsel %vm1110_vm12, %v2310_v14, 0 }
 0xf43   : > { %2326 = vmatpush.bf16.msra.mxu0 %v2318_v19 }
 0xf44   : > { %2257 = vmatpush.bf16.xpose.msrb.mxu3 %v2245_v5 }
 0xf45   : > { %v2232_v40 = vpop.f32.mrf.mxu2 }
 0xf46   : > { %v2364_v44 = vpop.f32.mrf.mxu1 }
 0xf47   : > { %2327 = vmatpush.bf16.msra.mxu0 %v2309_v39  ;;  %v4949_v53 = vadd.f32 %v4945_v58, %v2364_v44 }
 0xf4b   : > { %3579 = vmatmul.msk.bf16.vlgmr.msrb.gmra.mxu3 %vm1029_vm13, %v2234_v49 }
 0xf4c   : > { %2421 = vmatpush.bf16.msra.mxu3 %v2409_v37 }
 0xf4d   : > { %v2394_v62 = vpop.f32.mrf.mxu2 }
 0xf4e   : > { %v2366_v52 = vpop.f32.mrf.mxu1  ;;  %v2395_v42 = vadd.f32 %v3774_v31, %v2394_v62 }
 0xf4f   : > { %v4952_v54 = vadd.f32 %v4945_v58, %v2366_v52 }
 0xf50   : > { %2422 = vmatpush.bf16.msra.mxu3 %v2408_v47 }
 0xf51   : > { %v2433_v36 = vpack.c.bf16 %v4952_v54, %v4949_v53 }
 0xf55   : > { %v2396_v59 = vpop.f32.mrf.mxu2 }
 0xf56   : > { %v4956_v60 = vpop.f32.mrf.mxu1  ;;  %v2397_v1 = vadd.f32 %v3774_v31, %v2396_v59 }
 0xf58   : > { %v2435_v51 = vpack.c.bf16 %v2397_v1, %v2395_v42 }
 0xf5a   : > { %v2444_v6 = vsel %vm1029_vm13, %v2435_v51, 0  ;;  %v3616_v51 = vld [vmem:[%s5524_s0 + $0xd0] sm:$0xff] }
 0xf5b   : > { %3580 = vmatmul.msk.bf16.gmra.mxu3 %vm1029_vm13, %v2235_v61 }
 0xf5d   : > { %v2399_v46 = vpop.f32.mrf.mxu2 }
 0xf5e   : > { %v2400_v25 = vadd.f32 %v3774_v31, %v2399_v46  ;;  %v2371_v18 = vpop.f32.mrf.mxu1 }
 0xf60   : > { %v2436_v63 = vpack.c.bf16 %v2400_v25, %v2400_v25 }
 0xf62   : > { %v2447_v45 = vsel %vm1029_vm13, %v2436_v63, 0 }
 0xf63   : > { %2455 = vmatpush.bf16.xpose.msrb.mxu0 %v2447_v45 }
 0xf65   : > { %v2401_v55 = vpop.f32.mrf.mxu2 }
 0xf6b   : > { %2456 = vmatpush.bf16.xpose.msrb.mxu0 %v2444_v6  ;;  %3603 = vmatmul.msk.bf16.vlgmr.msra.gmra.mxu3 %vm847_vm1, %v4893_v0  ;;  %v3617_v6 = vld [vmem:[%s5524_s0 + $0xd8] sm:$0xff] }
 0xf7b   : > { %3604 = vmatmul.msk.bf16.gmra.mxu3 %vm847_vm1, %v4902_v50 }
 0xfce   : > { %v2259_v7 = vpop.f32.mrf.mxu3 }
 0xfcf   : > { %v2268_v56 = vmul.f32 0.35355338, %v2259_v7  ;;  %v3614_v7 = vld [vmem:[%s5524_s0 + $0xc0] sm:$0xff] }
 0xfd1   : > { %v2271_v2 = vsel %vm844_vm14, %v2268_v56, -1e+30  ;;  %v2602_v56 = vpack.c.bf16 %v3617_v6, %v3616_v51  ;;  %v3623_v6 = vld [vmem:[%s5526_s5 + $0xd0] sm:$0xff] }
 0xfd2   : > { %v2274_v16 = vsel %vm1066_vm15, %v2271_v2, -inf }
 0xfd3   : > { %2275 = vmax.xlane.f32.xlu0 %v2274_v16 }
 0xfd6   : > { %v2261_v27 = vpop.f32.mrf.mxu3 }
 0xfd7   : > { %v2269_v32 = vmul.f32 0.35355338, %v2261_v27  ;;  %v2370_v27 = vadd.f32 %v4945_v58, %v4956_v60 }
 0xfd9   : > { %v2272_v28 = vsel %vm844_vm14, %v2269_v32, -1e+30  ;;  %v2434_v32 = vpack.c.bf16 %v2370_v27, %v2370_v27 }
 0xfda   : > { %v2277_v8 = vsel %vm1066_vm15, %v2272_v28, -inf }
 0xfdb   : > { %2278 = vmax.xlane.f32.xlu1 %v2277_v8 }
 0xfde   : > { %v2264_v9 = vpop.f32.mrf.mxu3 }
 0xfdf   : > { %v2270_v35 = vmul.f32 0.35355338, %v2264_v9 }
 0xfe1   : > { %v2273_v20 = vsel %vm844_vm14, %v2270_v35, -1e+30 }
 0xfe2   : > { %v2280_v4 = vsel %vm1066_vm15, %v2273_v20, -inf }
 0xfe3   : > { %2281 = vmax.xlane.f32.xlu2 %v2280_v4 }
 0xfe6   : > { %v2266_v10 = vpop.f32.mrf.mxu3 }
 0xfee   : > { %v2424_v11 = vpop.f32.mrf.mxu3 }
 0xfef   : > { %v2425_v21 = vadd.f32 %v3775_v29, %v2424_v11 }
 0xff6   : > { %v2426_v12 = vpop.f32.mrf.mxu3 }
 0xff7   : > { %v2427_v17 = vadd.f32 %v3775_v29, %v2426_v12 }
 0xff9   : > { %v2508_v23 = vpack.c.bf16 %v2427_v17, %v2425_v21 }
 0xffe   : > { %v2429_v24 = vpop.f32.mrf.mxu3 }
 0xfff   : > { %v2430_v13 = vadd.f32 %v3775_v29, %v2429_v24 }
0x1001   : > { %v2509_v14 = vpack.c.bf16 %v2430_v13, %v2430_v13 }
0x1003   : > { %v2517_v19 = vsel %vm1110_vm12, %v2509_v14, 0 }
0x1004   : > { %2525 = vmatpush.bf16.msrb.mxu1 %v2517_v19 }
0x1006   : > { %v2431_v26 = vpop.f32.mrf.mxu3 }
0x1008   : > { %2526 = vmatpush.bf16.msrb.mxu1 %v2508_v23 }
0x1046   : > { %v2276_v30 = vpop.xlane.xlu0 %2275 }
0x1047   : > { %v2283_v5 = vsub.f32 %v2271_v2, %v2276_v30  ;;  %v3615_v2 = vld [vmem:[%s5524_s0 + $0xc8] sm:$0xff]  ;;  %v5027_v30 = vld [vmem:[%s5534_s8 + $0x6] ss:$0 sm:$0xff] }
0x1048   : > { %v2601_v16 = vpack.c.bf16 %v3615_v2, %v3614_v7  ;;  %v3624_v7 = vld [vmem:[%s5526_s5 + $0xd8] sm:$0xff] }
0x1049   : > { %v2286_v37 = vmul.f32 1.442695, %v2283_v5  ;;  %v2632_v2 = vpack.c.bf16 %v3624_v7, %v3623_v6  ;;  %v3652_v6 = vld [vmem:[%s5526_s5 + $0xf8] sm:$0xff] }
0x104b   : > { %3861 = vpow2.f32 %v2286_v37  ;;  %2644 = vmatpush.bf16.msra.mxu1 %v2632_v2  ;;  %v3650_v2 = vld [vmem:[%s5526_s5 + $0xe8] sm:$0xff] }
0x104e   : > { %v2279_v38 = vpop.xlane.xlu1 %2278 }
0x104f   : > { %v2284_v39 = vsub.f32 %v2272_v28, %v2279_v38  ;;  %v3583_v28 = vld [vmem:[%s5535_s11 + $0x20] sm:$0xff] }
0x1050   : > { %v2342_v8 = vpack.c.bf16 %v3583_v28, %v3583_v28 }
0x1051   : > { %v3862_v40 = vpop.eup %3861  ;;  %v2288_v43 = vmul.f32 1.442695, %v2284_v39 }
0x1052   : > { %v2292_v3 = vsel %vm1066_vm15, %v3862_v40, 0.0  ;;  %v2576_v53 = vsel %vm1110_vm12, %v2342_v8, 0 }
0x1053   : > { %3863 = vpow2.f32 %v2288_v43  ;;  %2293 = vadd.xlane.f32.xlu0 %v2292_v3  ;;  %2585 = vmatpush.bf16.msrb.mxu3 %v2576_v53 }
0x1056   : > { %v2282_v44 = vpop.xlane.xlu2 %2281 }
0x1057   : > { %v2285_v47 = vsub.f32 %v2273_v20, %v2282_v44 }
0x1059   : > { %v3864_v48 = vpop.eup %3863  ;;  %v2290_v49 = vmul.f32 1.442695, %v2285_v47 }
0x105a   : > { %v2295_v62 = vsel %vm1066_vm15, %v3864_v48, 0.0 }
0x105b   : > { %3865 = vpow2.f32 %v2290_v49  ;;  %2296 = vadd.xlane.f32.xlu1 %v2295_v62 }
0x1061   : > { %v3866_v52 = vpop.eup %3865 }
0x1062   : > { %v2298_v57 = vsel %vm1066_vm15, %v3866_v52, 0.0 }
0x1063   : > { %2299 = vadd.xlane.f32.xlu2 %v2298_v57 }
0x10c6   : > { %v2294_v59 = vpop.xlane.xlu0 %2293 }
0x10c7   : > { %3867 = vrcp.f32 %v2294_v59 }
0x10cd   : > { %v3868_v31 = vpop.eup %3867 }
0x10ce   : > { %v2297_v61 = vpop.xlane.xlu1 %2296  ;;  %v2304_v25 = vmul.f32 %v3868_v31, %v3862_v40 }
0x10cf   : > { %3869 = vrcp.f32 %v2297_v61 }
0x10d5   : > { %v3870_v46 = vpop.eup %3869 }
0x10d6   : > { %v2305_v18 = vmul.f32 %v3870_v46, %v3864_v48  ;;  %v2300_v1 = vpop.xlane.xlu2 %2299 }
0x10d7   : > { %3871 = vrcp.f32 %v2300_v1 }
0x10d8   : > { %v2307_v63 = vpack.c.bf16 %v2305_v18, %v2304_v25 }
0x10da   : > { %3581 = vmatmul.msk.bf16.vlgmr.msra.gmra.mxu0 %vm1066_vm15, %v2307_v63 }
0x10db   : > { %2614 = vmatpush.bf16.msra.mxu0 %v2602_v56  ;;  %v3621_v56 = vld [vmem:[%s5526_s5 + $0xc0] sm:$0xff] }
0x10dd   : > { %v3872_v45 = vpop.eup %3871 }
0x10de   : > { %v2306_v42 = vmul.f32 %v3872_v45, %v3866_v52 }
0x10df   : > { %2615 = vmatpush.bf16.msra.mxu0 %v2601_v16  ;;  %v3622_v16 = vld [vmem:[%s5526_s5 + $0xc8] sm:$0xff] }
0x10e0   : > { %v2308_v55 = vpack.c.bf16 %v2306_v42, %v2306_v42  ;;  %v2631_v27 = vpack.c.bf16 %v3622_v16, %v3621_v56  ;;  %v3649_v56 = vld [vmem:[%s5526_s5 + $0xe0] sm:$0xff] }
0x10e2   : > { %2645 = vmatpush.bf16.msra.mxu1 %v2631_v27  ;;  %v2860_v27 = vpack.c.bf16 %v3650_v2, %v3649_v56 }
0x10ea   : > { %3582 = vmatmul.msk.bf16.gmra.mxu0 %vm1066_vm15, %v2308_v55 }
0x10fa   : > { %3605 = vmatmul.msk.bf16.vlgmr.msrb.gmra.mxu0 %vm1029_vm13, %v2433_v36 }
0x110a   : > { %3606 = vmatmul.msk.bf16.gmra.mxu0 %vm1029_vm13, %v2434_v32 }
0x111a   : > { %3619 = vmatmul.msk.bf16.vlgmr.msra.gmra.mxu0 %vm847_vm1, %v4893_v0 }
0x112a   : > { %3620 = vmatmul.msk.bf16.gmra.mxu0 %vm847_vm1, %v4902_v50 }
0x1157   : > { %v2329_v54 = vpop.f32.mrf.mxu0 }
0x115f   : > { %v2331_v36 = vpop.f32.mrf.mxu0 }
0x1160   : > { %v2340_v58 = vpack.c.bf16 %v2331_v36, %v2329_v54 }
0x1162   : > { %3612 = vmatmul.msk.bf16.vlgmr.msrb.gmra.mxu3 %vm1029_vm13, %v2340_v58 }
0x1167   : > { %v2334_v60 = vpop.f32.mrf.mxu0 }
0x1168   : > { %v2341_v35 = vpack.c.bf16 %v2334_v60, %v2334_v60 }
0x116f   : > { %v2336_v9 = vpop.f32.mrf.mxu0 }
0x1172   : > { %3613 = vmatmul.msk.bf16.gmra.mxu3 %vm1029_vm13, %v2341_v35 }
0x1177   : > { %v2458_v20 = vpop.f32.mrf.mxu0 }
0x1178   : > { %v2467_v4 = vmul.f32 0.35355338, %v2458_v20  ;;  %v3609_v20 = vld [vmem:[%s5535_s11 + $0x28] sm:$0xff] }
0x117a   : > { %v2470_v10 = vsel %vm844_vm14, %v2467_v4, -1e+30  ;;  %v2541_v4 = vpack.c.bf16 %v3609_v20, %v3609_v20 }
0x117b   : > { %v2473_v11 = vsel %vm1066_vm15, %v2470_v10, -inf }
0x117c   : > { %2474 = vmax.xlane.f32.xlu0 %v2473_v11 }
0x117f   : > { %v2460_v12 = vpop.f32.mrf.mxu0 }
0x1180   : > { %v2468_v29 = vmul.f32 0.35355338, %v2460_v12  ;;  %v3630_v12 = vld [vmem:[%s5527_s26 + $0xd0] sm:$0xff] }
0x1182   : > { %v2471_v24 = vsel %vm844_vm14, %v2468_v29, -1e+30  ;;  %v3631_v29 = vld [vmem:[%s5527_s26 + $0xd8] sm:$0xff] }
0x1183   : > { %v2476_v13 = vsel %vm1066_vm15, %v2471_v24, -inf }
0x1184   : > { %2477 = vmax.xlane.f32.xlu1 %v2476_v13  ;;  %v3628_v13 = vld [vmem:[%s5527_s26 + $0xc0] sm:$0xff] }
0x1187   : > { %v2463_v14 = vpop.f32.mrf.mxu0 }
0x1188   : > { %v2469_v17 = vmul.f32 0.35355338, %v2463_v14  ;;  %v3629_v14 = vld [vmem:[%s5527_s26 + $0xc8] sm:$0xff] }
0x118a   : > { %v2472_v19 = vsel %vm844_vm14, %v2469_v17, -1e+30  ;;  %v2661_v17 = vpack.c.bf16 %v3629_v14, %v3628_v13 }
0x118b   : > { %v2479_v21 = vsel %vm1066_vm15, %v2472_v19, -inf }
0x118c   : > { %2480 = vmax.xlane.f32.xlu2 %v2479_v21 }
0x118f   : > { %v2465_v23 = vpop.f32.mrf.mxu0 }
0x1197   : > { %v2617_v26 = vpop.f32.mrf.mxu0 }
0x1198   : > { %v5030_v37 = vadd.f32 %v5027_v30, %v2617_v26 }
0x119f   : > { %v2619_v5 = vpop.f32.mrf.mxu0 }
0x11a0   : > { %v5033_v38 = vadd.f32 %v5027_v30, %v2619_v5 }
0x11a2   : > { %v2686_v39 = vpack.c.bf16 %v5033_v38, %v5030_v37 }
0x11a7   : > { %v5037_v40 = vpop.f32.mrf.mxu0 }
0x11af   : > { %v2624_v43 = vpop.f32.mrf.mxu0 }
0x11b0   : > { %v3644_v43 = vld [vmem:[%s5524_s0 + $0xf0] sm:$0xff] }
0x11e5   : > { %v5039_v3 = vpop.f32.mrf.mxu3 }
0x11ed   : > { %v5041_v44 = vpop.f32.mrf.mxu3 }
0x11ef   : > { %v2475_v47 = vpop.xlane.xlu0 %2474 }
0x11f0   : > { %v2482_v48 = vsub.f32 %v2470_v10, %v2475_v47  ;;  %v2549_v10 = vsel %vm1110_vm12, %v2541_v4, 0  ;;  %v3645_v47 = vld [vmem:[%s5524_s0 + $0xf8] sm:$0xff] }
0x11f1   : > { %2558 = vmatpush.bf16.msrb.mxu2 %v2549_v10 }
0x11f2   : > { %v2485_v49 = vmul.f32 1.442695, %v2482_v48  ;;  %v2831_v48 = vpack.c.bf16 %v3645_v47, %v3644_v43 }
0x11f4   : > { %3873 = vpow2.f32 %v2485_v49 }
0x11f5   : > { %v5043_v62 = vpop.f32.mrf.mxu3 }
0x11f7   : > { %v2478_v52 = vpop.xlane.xlu1 %2477 }
0x11f8   : > { %v2483_v57 = vsub.f32 %v2471_v24, %v2478_v52  ;;  %v2662_v24 = vpack.c.bf16 %v3631_v29, %v3630_v12  ;;  %v3642_v52 = vld [vmem:[%s5524_s0 + $0xe0] sm:$0xff] }
0x11fa   : > { %v3874_v59 = vpop.eup %3873  ;;  %v2487_v61 = vmul.f32 1.442695, %v2483_v57  ;;  %2674 = vmatpush.bf16.msra.mxu2 %v2662_v24  ;;  %v3643_v57 = vld [vmem:[%s5524_s0 + $0xe8] sm:$0xff]  ;;  %s3351_s0 = scalar_lea.hbm %s5546_s28, %s5543_s4 }
0x11fb   : > { %v2491_v31 = vsel %vm1066_vm15, %v3874_v59, 0.0 }
0x11fc   : > { %3875 = vpow2.f32 %v2487_v61  ;;  %2492 = vadd.xlane.f32.xlu0 %v2491_v31  ;;  %v3777_v31 = vld [vmem:[%s5531_s30 + $0x6] ss:$0 sm:$0xff] }
0x11fd   : > { %v2594_v46 = vpop.f32.mrf.mxu3 }
0x11fe   : > { %2675 = vmatpush.bf16.msra.mxu2 %v2661_v17  ;;  %v5148_v17 = vld [vmem:[%s5534_s8 + $0x7] ss:$0 sm:$0xff]  ;;  %s3355_s8 = sshll.u32 %s3351_s0, 4  ;;  %s3356_s8 = int_to_ptr.hbm [resolvable:$true] %s3355_s8 }
0x11ff   : > { %v2481_v25 = vpop.xlane.xlu2 %2480 }
0x1200   : > { %v2484_v18 = vsub.f32 %v2472_v19, %v2481_v25 }
0x1202   : > { %v3876_v63 = vpop.eup %3875  ;;  %v2489_v1 = vmul.f32 1.442695, %v2484_v18 }
0x1203   : > { %v2494_v45 = vsel %vm1066_vm15, %v3876_v63, 0.0 }
0x1204   : > { %3877 = vpow2.f32 %v2489_v1  ;;  %2495 = vadd.xlane.f32.xlu1 %v2494_v45 }
0x120a   : > { %v3878_v42 = vpop.eup %3877 }
0x120b   : > { %v2497_v55 = vsel %vm1066_vm15, %v3878_v42, 0.0 }
0x120c   : > { %2498 = vadd.xlane.f32.xlu2 %v2497_v55 }
0x126f   : > { %v2493_v51 = vpop.xlane.xlu0 %2492 }
0x1270   : > { %3879 = vrcp.f32 %v2493_v51  ;;  %v3651_v51 = vld [vmem:[%s5526_s5 + $0xf0] sm:$0xff]  ;;  %s3353_s5 = sshll.u32 %s787_s9, 4  ;;  %s3354_s5 = int_to_ptr.vmem [resolvable:$true] %s3353_s5 }
0x1271   : > { %v2861_v7 = vpack.c.bf16 %v3652_v6, %v3651_v51 }
0x1276   : > { %v3880_v28 = vpop.eup %3879 }
0x1277   : > { %v2496_v32 = vpop.xlane.xlu1 %2495  ;;  %v2503_v53 = vmul.f32 %v3880_v28, %v3874_v59  ;;  %v2830_v59 = vpack.c.bf16 %v3643_v57, %v3642_v52 }
0x1278   : > { %3881 = vrcp.f32 %v2496_v32  ;;  %v2623_v32 = vadd.f32 %v5027_v30, %v5037_v40 }
0x127a   : > { %v2687_v28 = vpack.c.bf16 %v2623_v32, %v2623_v32 }
0x127e   : > { %v3882_v8 = vpop.eup %3881 }
0x127f   : > { %v2504_v54 = vmul.f32 %v3882_v8, %v3876_v63  ;;  %v2499_v58 = vpop.xlane.xlu2 %2498 }
0x1280   : > { %3883 = vrcp.f32 %v2499_v58 }
0x1281   : > { %v2506_v36 = vpack.c.bf16 %v2504_v54, %v2503_v53  ;;  %v3778_v53 = vld [vmem:[%s5532_s29 + $0x6] ss:$0 sm:$0xff] }
0x1283   : > { %3607 = vmatmul.msk.bf16.vlgmr.msrb.gmra.mxu1 %vm1066_vm15, %v2506_v36 }
0x1286   : > { %v3884_v60 = vpop.eup %3883 }
0x1287   : > { %v2505_v9 = vmul.f32 %v3884_v60, %v3878_v42 }
0x1289   : > { %v2507_v35 = vpack.c.bf16 %v2505_v9, %v2505_v9 }
0x1293   : > { %3608 = vmatmul.msk.bf16.gmra.mxu1 %vm1066_vm15, %v2507_v35 }
0x12a3   : > { %3626 = vmatmul.msk.bf16.vlgmr.msra.gmra.mxu1 %vm847_vm1, %v4893_v0 }
0x12b3   : > { %3627 = vmatmul.msk.bf16.gmra.mxu1 %vm847_vm1, %v4902_v50 }
0x1300   : > { %v2528_v11 = vpop.f32.mrf.mxu1 }
0x1308   : > { %v2530_v19 = vpop.f32.mrf.mxu1 }
0x1309   : > { %v2539_v21 = vpack.c.bf16 %v2530_v19, %v2528_v11 }
0x130b   : > { %3610 = vmatmul.msk.bf16.vlgmr.msrb.gmra.mxu2 %vm1029_vm13, %v2539_v21 }
0x130c   : > { %2843 = vmatpush.bf16.msrb.mxu2 %v2831_v48 }
0x1310   : > { %v2533_v23 = vpop.f32.mrf.mxu1  ;;  %2844 = vmatpush.bf16.msrb.mxu2 %v2830_v59 }
0x1311   : > { %v2540_v5 = vpack.c.bf16 %v2533_v23, %v2533_v23 }
0x1318   : > { %v2535_v26 = vpop.f32.mrf.mxu1 }
0x131b   : > { %3611 = vmatmul.msk.bf16.gmra.mxu2 %vm1029_vm13, %v2540_v5 }
0x1320   : > { %v2647_v49 = vpop.f32.mrf.mxu1 }
0x1321   : > { %v2648_v45 = vadd.f32 %v3777_v31, %v2647_v49  ;;  %v3639_v49 = vld [vmem:[%s5535_s11 + $0x30] sm:$0xff] }
0x1322   : > { %v2794_v57 = vpack.c.bf16 %v3639_v49, %v3639_v49 }
0x1328   : > { %v2649_v61 = vpop.f32.mrf.mxu1 }
0x1329   : > { %v2650_v63 = vadd.f32 %v3777_v31, %v2649_v61  ;;  %v2802_v61 = vsel %vm1110_vm12, %v2794_v57, 0 }
0x132a   : > { %2811 = vmatpush.bf16.msrb.mxu1 %v2802_v61 }
0x132b   : > { %3633 = vmatmul.msk.bf16.vlgmr.msra.gmra.mxu2 %vm847_vm1, %v4893_v0  ;;  %v2688_v55 = vpack.c.bf16 %v2650_v63, %v2648_v45 }
0x132d   : > { %v2697_v16 = vsel %vm1029_vm13, %v2688_v55, 0 }
0x1330   : > { %v2652_v46 = vpop.f32.mrf.mxu1 }
0x1331   : > { %v2653_v25 = vadd.f32 %v3777_v31, %v2652_v46 }
0x1333   : > { %v2689_v18 = vpack.c.bf16 %v2653_v25, %v2653_v25 }
0x1335   : > { %v2700_v1 = vsel %vm1029_vm13, %v2689_v18, 0 }
0x1336   : > { %2708 = vmatpush.bf16.xpose.msra.mxu3 %v2700_v1  ;;  %v3780_v1 = vld [vmem:[%s5531_s30 + $0x7] ss:$0 sm:$0xff] }
0x1338   : > { %v2654_v42 = vpop.f32.mrf.mxu1 }
0x133b   : > { %3634 = vmatmul.msk.bf16.gmra.mxu2 %vm847_vm1, %v4902_v50 }
0x133e   : > { %2709 = vmatpush.bf16.xpose.msra.mxu3 %v2697_v16 }
0x1345   : > { %3635 = vmatmul.msk.bf16.vlgmr.msra.gmra.mxu3 %vm1029_vm13, %v2686_v39 }
0x1346   : > { %2873 = vmatpush.bf16.msrb.mxu3 %v2861_v7 }
0x134a   : > { %2874 = vmatpush.bf16.msrb.mxu3 %v2860_v27 }
0x134b   : > { %3647 = vmatmul.msk.bf16.vlgmr.msrb.gmra.mxu2 %vm847_vm1, %v4893_v0 }
0x1355   : > { %3636 = vmatmul.msk.bf16.gmra.mxu3 %vm1029_vm13, %v2687_v28 }
0x135b   : > { %3648 = vmatmul.msk.bf16.gmra.mxu2 %vm847_vm1, %v4902_v50 }
0x1365   : > { %3654 = vmatmul.msk.bf16.vlgmr.msrb.gmra.mxu3 %vm847_vm1, %v4893_v0 }
0x1375   : > { %3655 = vmatmul.msk.bf16.gmra.mxu3 %vm847_vm1, %v4902_v50 }
0x138e   : > { %v5132_v37 = vpop.f32.mrf.mxu2 }
0x1396   : > { %v5134_v38 = vpop.f32.mrf.mxu2 }
0x139e   : > { %v5136_v39 = vpop.f32.mrf.mxu2 }
0x13a6   : > { %v2567_v8 = vpop.f32.mrf.mxu2 }
0x13ae   : > { %v2677_v30 = vpop.f32.mrf.mxu2 }
0x13af   : > { %v2678_v35 = vadd.f32 %v3778_v53, %v2677_v30 }
0x13b6   : > { %v2679_v40 = vpop.f32.mrf.mxu2 }
0x13b7   : > { %v2680_v60 = vadd.f32 %v3778_v53, %v2679_v40 }
0x13b9   : > { %v2761_v20 = vpack.c.bf16 %v2680_v60, %v2678_v35 }
0x13be   : > { %v2682_v54 = vpop.f32.mrf.mxu2 }
0x13bf   : > { %v2683_v36 = vadd.f32 %v3778_v53, %v2682_v54 }
0x13c1   : > { %v2762_v58 = vpack.c.bf16 %v2683_v36, %v2683_v36 }
0x13c3   : > { %v2770_v9 = vsel %vm1110_vm12, %v2762_v58, 0 }
0x13c4   : > { %2778 = vmatpush.bf16.msrb.mxu0 %v2770_v9 }
0x13c6   : > { %v2684_v4 = vpop.f32.mrf.mxu2 }
0x13c8   : > { %v2711_v10 = vpop.f32.mrf.mxu3  ;;  %2779 = vmatpush.bf16.msrb.mxu0 %v2761_v20 }
0x13c9   : > { %v2720_v11 = vmul.f32 0.35355338, %v2711_v10 }
0x13cb   : > { %v2723_v12 = vsel %vm844_vm14, %v2720_v11, -1e+30  ;;  %v3658_v11 = vld [vmem:[%s5527_s26 + $0xf0] sm:$0xff] }
0x13cc   : > { %v2726_v29 = vsel %vm1066_vm15, %v2723_v12, -inf }
0x13cd   : > { %2727 = vmax.xlane.f32.xlu0 %v2726_v29  ;;  %v3656_v29 = vld [vmem:[%s5527_s26 + $0xe0] sm:$0xff] }
0x13ce   : > { %v2846_v24 = vpop.f32.mrf.mxu2 }
0x13cf   : > { %v5154_v26 = vadd.f32 %v5148_v17, %v2846_v24 }
0x13d0   : > { %v2713_v13 = vpop.f32.mrf.mxu3 }
0x13d1   : > { %v2721_v14 = vmul.f32 0.35355338, %v2713_v13  ;;  %v3657_v13 = vld [vmem:[%s5527_s26 + $0xe8] sm:$0xff] }
0x13d3   : > { %v2724_v19 = vsel %vm844_vm14, %v2721_v14, -1e+30  ;;  %v2890_v14 = vpack.c.bf16 %v3657_v13, %v3656_v29 }
0x13d4   : > { %v2729_v21 = vsel %vm1066_vm15, %v2724_v19, -inf }
0x13d5   : > { %2730 = vmax.xlane.f32.xlu1 %v2729_v21 }
0x13d6   : > { %v2848_v23 = vpop.f32.mrf.mxu2 }
0x13d7   : > { %v5157_v5 = vadd.f32 %v5148_v17, %v2848_v23 }
0x13d8   : > { %v2716_v43 = vpop.f32.mrf.mxu3 }
0x13d9   : > { %v2915_v47 = vpack.c.bf16 %v5157_v5, %v5154_v26  ;;  %v2722_v48 = vmul.f32 0.35355338, %v2716_v43  ;;  %v2588_v5 = vadd.f32 %v5039_v3, %v5132_v37 }
0x13db   : > { %v2725_v52 = vsel %vm844_vm14, %v2722_v48, -1e+30 }
0x13dc   : > { %v2732_v59 = vsel %vm1066_vm15, %v2725_v52, -inf }
0x13dd   : > { %2733 = vmax.xlane.f32.xlu2 %v2732_v59 }
0x13de   : > { %v5168_v31 = vpop.f32.mrf.mxu2 }
0x13e0   : > { %v2718_v46 = vpop.f32.mrf.mxu3 }
0x13e6   : > { %v2853_v25 = vpop.f32.mrf.mxu2 }
0x13e8   : > { %v2876_v18 = vpop.f32.mrf.mxu3 }
0x13e9   : > { %v2877_v7 = vadd.f32 %v3780_v1, %v2876_v18 }
0x13f0   : > { %v2878_v63 = vpop.f32.mrf.mxu3 }
0x13f1   : > { %v2879_v51 = vadd.f32 %v3780_v1, %v2878_v63 }
0x13f3   : > { %v2917_v2 = vpack.c.bf16 %v2879_v51, %v2877_v7 }
0x13f5   : > { %v2926_v16 = vsel %vm1029_vm13, %v2917_v2, 0 }
0x13f8   : > { %v2881_v45 = vpop.f32.mrf.mxu3 }
0x13f9   : > { %v2882_v42 = vadd.f32 %v3780_v1, %v2881_v45 }
0x13fb   : > { %v2918_v55 = vpack.c.bf16 %v2882_v42, %v2882_v42 }
0x13fd   : > { %v2929_v6 = vsel %vm1029_vm13, %v2918_v55, 0 }
0x13fe   : > { %2937 = vmatpush.bf16.xpose.msra.mxu1 %v2929_v6 }
0x1400   : > { %v2883_v56 = vpop.f32.mrf.mxu3 }
0x1401   : > { %v2852_v56 = vadd.f32 %v5148_v17, %v5168_v31 }
0x1403   : > { %v2916_v26 = vpack.c.bf16 %v2852_v56, %v2852_v56 }
0x1406   : > { %2938 = vmatpush.bf16.xpose.msra.mxu1 %v2926_v16 }
0x1440   : > { %v2728_v27 = vpop.xlane.xlu0 %2727 }
0x1441   : > { %v2735_v32 = vsub.f32 %v2723_v12, %v2728_v27  ;;  %v3659_v12 = vld [vmem:[%s5527_s26 + $0xf8] sm:$0xff] }
0x1442   : > { %v2891_v24 = vpack.c.bf16 %v3659_v12, %v3658_v11 }
0x1443   : > { %v2738_v28 = vmul.f32 1.442695, %v2735_v32 }
0x1444   : > { %2903 = vmatpush.bf16.msra.mxu0 %v2891_v24 }
0x1445   : > { %3885 = vpow2.f32 %v2738_v28 }
0x1448   : > { %v2731_v8 = vpop.xlane.xlu1 %2730  ;;  %2904 = vmatpush.bf16.msra.mxu0 %v2890_v14 }
0x1449   : > { %v2736_v30 = vsub.f32 %v2724_v19, %v2731_v8  ;;  %v2590_v8 = vadd.f32 %v5041_v44, %v5134_v38 }
0x144b   : > { %v3886_v40 = vpop.eup %3885  ;;  %v2740_v53 = vmul.f32 1.442695, %v2736_v30  ;;  %v2593_v30 = vadd.f32 %v5043_v62, %v5136_v39 }
0x144c   : > { %v2744_v54 = vsel %vm1066_vm15, %v3886_v40, 0.0 }
0x144d   : > { %3887 = vpow2.f32 %v2740_v53  ;;  %2745 = vadd.xlane.f32.xlu0 %v2744_v54 }
0x1450   : > { %v2734_v36 = vpop.xlane.xlu2 %2733 }
0x1451   : > { %v2737_v58 = vsub.f32 %v2725_v52, %v2734_v36 }
0x1453   : > { %v3888_v60 = vpop.eup %3887  ;;  %v2742_v9 = vmul.f32 1.442695, %v2737_v58 }
0x1454   : > { %v2747_v35 = vsel %vm1066_vm15, %v3888_v60, 0.0 }
0x1455   : > { %3889 = vpow2.f32 %v2742_v9  ;;  %2748 = vadd.xlane.f32.xlu1 %v2747_v35 }
0x145b   : > { %v3890_v20 = vpop.eup %3889 }
0x145c   : > { %v2750_v4 = vsel %vm1066_vm15, %v3890_v20, 0.0 }
0x145d   : > { %2751 = vadd.xlane.f32.xlu2 %v2750_v4 }
0x14c0   : > { %v2746_v10 = vpop.xlane.xlu0 %2745 }
0x14c1   : > { %3891 = vrcp.f32 %v2746_v10 }
0x14c7   : > { %v3892_v21 = vpop.eup %3891 }
0x14c8   : > { %v2749_v19 = vpop.xlane.xlu1 %2748  ;;  %v2756_v43 = vmul.f32 %v3892_v21, %v3886_v40 }
0x14c9   : > { %3893 = vrcp.f32 %v2749_v19 }
0x14cf   : > { %v3894_v23 = vpop.eup %3893 }
0x14d0   : > { %v2757_v48 = vmul.f32 %v3894_v23, %v3888_v60  ;;  %v2752_v52 = vpop.xlane.xlu2 %2751 }
0x14d1   : > { %3895 = vrcp.f32 %v2752_v52 }
0x14d2   : > { %v2759_v49 = vpack.c.bf16 %v2757_v48, %v2756_v43 }
0x14d4   : > { %3637 = vmatmul.msk.bf16.vlgmr.msrb.gmra.mxu0 %vm1066_vm15, %v2759_v49 }
0x14d7   : > { %v3896_v57 = vpop.eup %3895 }
0x14d8   : > { %v2758_v59 = vmul.f32 %v3896_v57, %v3890_v20 }
0x14da   : > { %v2760_v61 = vpack.c.bf16 %v2758_v59, %v2758_v59 }
0x14e4   : > { %3638 = vmatmul.msk.bf16.gmra.mxu0 %vm1066_vm15, %v2760_v61 }
0x14f4   : > { %3661 = vmatmul.msk.bf16.vlgmr.msra.gmra.mxu0 %vm847_vm1, %v4893_v0  ;;  %v3781_v0 = vld [vmem:[%s5532_s29 + $0x7] ss:$0 sm:$0xff] }
0x1504   : > { %3662 = vmatmul.msk.bf16.gmra.mxu0 %vm847_vm1, %v4902_v50 }
0x1551   : > { %v2781_v46 = vpop.f32.mrf.mxu0 }
0x1559   : > { %v2783_v25 = vpop.f32.mrf.mxu0 }
0x155a   : > { %v2792_v18 = vpack.c.bf16 %v2783_v25, %v2781_v46 }
0x155c   : > { %3640 = vmatmul.msk.bf16.vlgmr.msrb.gmra.mxu1 %vm1029_vm13, %v2792_v18 }
0x1561   : > { %v2786_v63 = vpop.f32.mrf.mxu0 }
0x1562   : > { %v2793_v45 = vpack.c.bf16 %v2786_v63, %v2786_v63 }
0x1569   : > { %v2788_v1 = vpop.f32.mrf.mxu0 }
0x156a   : > { %v3667_v1 = vld [vmem:[%s5535_s11 + $0x38] sm:$0xff]  ;;  %s3937_s11 = sshra.s32 %s3356_s8, 4  ;;  %s3938_s11 = int_to_ptr.hbm [resolvable:$true] %s3937_s11 }
0x156b   : > { %s3939_s1 = scalar_lea.hbm %s3938_s11, 1 }
0x156c   : > { %3641 = vmatmul.msk.bf16.gmra.mxu1 %vm1029_vm13, %v2793_v45  ;;  %v3023_v45 = vpack.c.bf16 %v3667_v1, %v3667_v1  ;;  %p3940_p11 = scmp.ne.s32.totalorder %s3938_s11, %s3939_s1 }
0x156e   : > { %p3941_p12 = pnand %p3940_p11, %p4193_p5 }
0x1570   : > { %p3942_p13 = pneg %p3941_p12 }
0x1571   : > { %v2906_v42 = vpop.f32.mrf.mxu0 }
0x1572   : > { %v2907_v16 = vadd.f32 %v3781_v0, %v2906_v42  ;;  %v3031_v42 = vsel %vm1110_vm12, %v3023_v45, 0 }
0x1573   : > { %3040 = vmatpush.bf16.msra.mxu3 %v3031_v42 }
0x1579   : > { %v2908_v55 = vpop.f32.mrf.mxu0 }
0x157a   : > { %v2909_v7 = vadd.f32 %v3781_v0, %v2908_v55 }
0x157c   : > { %3663 = vmatmul.msk.bf16.vlgmr.msra.gmra.mxu1 %vm1029_vm13, %v2915_v47  ;;  %v2990_v27 = vpack.c.bf16 %v2909_v7, %v2907_v16 }
0x1581   : > { %v2911_v50 = vpop.f32.mrf.mxu0 }
0x1582   : > { %v2912_v51 = vadd.f32 %v3781_v0, %v2911_v50 }
0x1584   : > { %v2991_v6 = vpack.c.bf16 %v2912_v51, %v2912_v51 }
0x1586   : > { %v2999_v2 = vsel %vm1110_vm12, %v2991_v6, 0 }
0x1587   : > { %3007 = vmatpush.bf16.msra.mxu2 %v2999_v2 }
0x1589   : > { %v2913_v32 = vpop.f32.mrf.mxu0 }
0x158b   : > { %3008 = vmatpush.bf16.msra.mxu2 %v2990_v27 }
0x158c   : > { %3664 = vmatmul.msk.bf16.gmra.mxu1 %vm1029_vm13, %v2916_v26  ;;  %v3782_v26 = vld [vmem:[%s5536_s12 + $0x1] ss:$0 sm:$0xff] }
0x15d9   : > { %v2813_v47 = vpop.f32.mrf.mxu1 }
0x15da   : > { %v5211_v28 = vadd.f32 %v2813_v47, %v2588_v5 }
0x15e1   : > { %v2815_v17 = vpop.f32.mrf.mxu1 }
0x15e2   : > { %v5215_v31 = vadd.f32 %v2815_v17, %v2590_v8 }
0x15e9   : > { %v2818_v40 = vpop.f32.mrf.mxu1 }
0x15ea   : > { %v5219_v53 = vadd.f32 %v2818_v40, %v2593_v30 }
0x15f1   : > { %v2820_v54 = vpop.f32.mrf.mxu1 }
0x15f9   : > { %v2940_v36 = vpop.f32.mrf.mxu1 }
0x15fa   : > { %v2949_v58 = vmul.f32 0.35355338, %v2940_v36 }
0x15fc   : > { %v2952_v3 = vsel %vm844_vm14, %v2949_v58, -1e+30 }
0x15fd   : > { %v2955_v37 = vsel %vm1066_vm15, %v2952_v3, -inf }
0x15fe   : > { %2956 = vmax.xlane.f32.xlu0 %v2955_v37 }
0x1601   : > { %v2942_v60 = vpop.f32.mrf.mxu1 }
0x1602   : > { %v2950_v44 = vmul.f32 0.35355338, %v2942_v60 }
0x1604   : > { %v2953_v38 = vsel %vm844_vm14, %v2950_v44, -1e+30 }
0x1605   : > { %v2958_v9 = vsel %vm1066_vm15, %v2953_v38, -inf }
0x1606   : > { %2959 = vmax.xlane.f32.xlu1 %v2958_v9 }
0x1609   : > { %v2945_v62 = vpop.f32.mrf.mxu1 }
0x160a   : > { %v2951_v19 = vmul.f32 0.35355338, %v2945_v62 }
0x160c   : > { %v2954_v21 = vsel %vm844_vm14, %v2951_v19, -1e+30 }
0x160d   : > { %v2961_v23 = vsel %vm1066_vm15, %v2954_v21, -inf }
0x1611   : > { %v2947_v39 = vpop.f32.mrf.mxu1 }
0x1671   : > { %v2957_v35 = vpop.xlane.xlu0 %2956 }
0x1672   : > { %v2964_v20 = vsub.f32 %v2952_v3, %v2957_v35 }
0x1674   : > { %v2967_v4 = vmul.f32 1.442695, %v2964_v20 }
0x1676   : > { %3897 = vpow2.f32 %v2967_v4 }
0x1679   : > { %v2960_v10 = vpop.xlane.xlu1 %2959 }
0x167a   : > { %v2965_v11 = vsub.f32 %v2953_v38, %v2960_v10 }
0x167c   : > { %v3898_v12 = vpop.eup %3897  ;;  %v2969_v29 = vmul.f32 1.442695, %v2965_v11 }
0x167d   : > { %v2973_v24 = vsel %vm1066_vm15, %v3898_v12, 0.0 }
0x167e   : > { %3899 = vpow2.f32 %v2969_v29  ;;  %2974 = vadd.xlane.f32.xlu2 %v2973_v24  ;;  %v3673_v24 = vld [vmem:[%s5537_s15 + $0x20] sm:$0xff] }
0x1684   : > { %v3900_v13 = vpop.eup %3899 }
0x1685   : > { %v2976_v14 = vsel %vm1066_vm15, %v3900_v13, 0.0 }
0x1686   : > { %2977 = vadd.xlane.f32.xlu0 %v2976_v14 }
0x168e   : > { %2962 = vmax.xlane.f32.xlu0 %v2961_v23 }
0x16f1   : > { %v2975_v43 = vpop.xlane.xlu2 %2974 }
0x16f2   : > { %3901 = vrcp.f32 %v2975_v43 }
0x16f8   : > { %v3902_v49 = vpop.eup %3901 }
0x16f9   : > { %v2978_v48 = vpop.xlane.xlu0 %2977  ;;  %v2985_v57 = vmul.f32 %v3902_v49, %v3898_v12 }
0x16fa   : > { %3903 = vrcp.f32 %v2978_v48 }
0x1700   : > { %v3904_v52 = vpop.eup %3903 }
0x1701   : > { %v2986_v59 = vmul.f32 %v3904_v52, %v3900_v13  ;;  %v2963_v61 = vpop.xlane.xlu0 %2962  ;;  %v3674_v13 = vld [vmem:[%s5537_s15 + $0x28] sm:$0xff] }
0x1702   : > { %v2966_v46 = vsub.f32 %v2954_v21, %v2963_v61  ;;  %v3154_v19 = vpack.c.bf16 %v3674_v13, %v3673_v24  ;;  %v3685_v24 = vld [vmem:[%s5452_s17 + $0xa8] sm:$0xff] }
0x1703   : > { %v2988_v25 = vpack.c.bf16 %v2986_v59, %v2985_v57 }
0x1704   : > { %v2971_v18 = vmul.f32 1.442695, %v2966_v46 }
0x1705   : > { %3665 = vmatmul.msk.bf16.vlgmr.msra.gmra.mxu2 %vm1066_vm15, %v2988_v25 }
0x1706   : > { %3905 = vpow2.f32 %v2971_v18 }
0x170c   : > { %v3906_v41 = vpop.eup %3905 }
0x170d   : > { %v2979_v63 = vsel %vm1066_vm15, %v3906_v41, 0.0 }
0x170e   : > { %2980 = vadd.xlane.f32.xlu0 %v2979_v63 }
0x1781   : > { %v2981_v55 = vpop.xlane.xlu0 %2980 }
0x1782   : > { %3907 = vrcp.f32 %v2981_v55 }
0x1788   : > { %v3908_v0 = vpop.eup %3907  ;;  %v3010_v50 = vpop.f32.mrf.mxu2 }
0x1789   : > { %v2987_v51 = vmul.f32 %v3908_v0, %v3906_v41 }
0x178b   : > { %v2989_v6 = vpack.c.bf16 %v2987_v51, %v2987_v51  ;;  %v3783_v51 = vld [vmem:[%s5538_s13 + $0x1] ss:$0 sm:$0xff] }
0x178d   : > { %3666 = vmatmul.msk.bf16.gmra.mxu2 %vm1066_vm15, %v2989_v6 }
0x1790   : > { %v3012_v7 = vpop.f32.mrf.mxu2 }
0x1791   : > { %v3021_v56 = vpack.c.bf16 %v3012_v7, %v3010_v50 }
0x1793   : > { %3668 = vmatmul.msk.bf16.vlgmr.msra.gmra.mxu3 %vm1029_vm13, %v3021_v56 }
0x1810   : > { %v3015_v2 = vpop.f32.mrf.mxu2 }
0x1811   : > { %v3022_v16 = vpack.c.bf16 %v3015_v2, %v3015_v2  ;;  %v3784_v2 = vld [vmem:[%s5539_s14 + $0x1] ss:$0 sm:$0xff] }
0x1813   : > { %3669 = vmatmul.msk.bf16.gmra.mxu3 %vm1029_vm13, %v3022_v16 }
0x1816   : > { %v3042_v27 = vpop.f32.mrf.mxu3 }
0x1817   : > { %v3051_v32 = vadd.f32 %v3042_v27, %v5211_v28 }
0x1818   : > { %v3017_v5 = vpop.f32.mrf.mxu2 }
0x1819   : > { %v3054_v47 = vadd.f32 %v3051_v32, %v4781_v15 }
0x181b   : > { %v5246_v8 = vadd.f32 %v3782_v26, %v3054_v47 }
0x181d   : > { %v3069_v17 = vsel %vm847_vm1, %v5246_v8, 0.0 }
0x181e   : > { %3070 = vadd.xlane.f32.xlu1 %v3069_v17  ;;  %v3044_v30 = vpop.f32.mrf.mxu3 }
0x181f   : > { %v3052_v40 = vadd.f32 %v3044_v30, %v5215_v31 }
0x1821   : > { %v3055_v54 = vadd.f32 %v3052_v40, %v4786_v22 }
0x1823   : > { %v3063_v36 = vadd.f32 %v3782_v26, %v3055_v54  ;;  %v3694_v54 = vld [vmem:[%s5452_s17 + $0xf0] sm:$0xff] }
0x1825   : > { %v3072_v28 = vsel %vm847_vm1, %v3063_v36, 0.0 }
0x1826   : > { %3073 = vadd.xlane.f32.xlu2 %v3072_v28 }
0x1891   : > { %v3071_v58 = vpop.xlane.xlu1 %3070 }
0x1892   : > { %v3078_v3 = vmul.f32 %v3071_v58, %v4247_v33  ;;  %v3692_v58 = vld [vmem:[%s5452_s17 + $0xe0] sm:$0xff] }
0x1894   : > { %v3081_v15 = vsub.f32 %v5246_v8, %v3078_v3  ;;  %v3693_v3 = vld [vmem:[%s5452_s17 + $0xe8] sm:$0xff] }
0x1896   : > { %v3047_v37 = vpop.f32.mrf.mxu3  ;;  %v3084_v60 = vmul.f32 %v3081_v15, %v3081_v15 }
0x1897   : > { %v3053_v44 = vadd.f32 %v3047_v37, %v5219_v53  ;;  %v3675_v53 = vld [vmem:[%s5537_s15 + $0x30] sm:$0xff] }
0x1898   : > { %v3087_v38 = vsel %vm847_vm1, %v3084_v60, 0.0 }
0x1899   : > { %v3056_v9 = vadd.f32 %v3053_v44, %v4791_v34  ;;  %3088 = vadd.xlane.f32.xlu1 %v3087_v38  ;;  %v3074_v31 = vpop.xlane.xlu2 %3073  ;;  %v3676_v34 = vld [vmem:[%s5537_s15 + $0x38] sm:$0xff]  ;;  %v3690_v44 = vld [vmem:[%s5452_s17 + $0xd0] sm:$0xff] }
0x189a   : > { %v3079_v22 = vmul.f32 %v3074_v31, %v4247_v33  ;;  %v3155_v11 = vpack.c.bf16 %v3676_v34, %v3675_v53  ;;  %v3691_v38 = vld [vmem:[%s5452_s17 + $0xd8] sm:$0xff] }
0x189b   : > { %v3064_v39 = vadd.f32 %v3782_v26, %v3056_v9  ;;  %v3236_v9 = vpack.c.bf16 %v3691_v38, %v3690_v44  ;;  %v3687_v53 = vld [vmem:[%s5452_s17 + $0xb8] sm:$0xff] }
0x189c   : > { %v3082_v62 = vsub.f32 %v3063_v36, %v3079_v22  ;;  %3173 = vmatpush.bf16.msrb.mxu0 %v3155_v11  ;;  %v3695_v36 = vld [vmem:[%s5452_s17 + $0xf8] sm:$0xff] }
0x189d   : > { %v3075_v10 = vsel %vm847_vm1, %v3064_v39, 0.0  ;;  %v3238_v28 = vpack.c.bf16 %v3695_v36, %v3694_v54 }
0x189e   : > { %v3049_v35 = vpop.f32.mrf.mxu3  ;;  %v3085_v20 = vmul.f32 %v3082_v62, %v3082_v62 }
0x189f   : > { %3239 = vmatpush.bf16.msrb.mxu1 %v3238_v28 }
0x18a0   : > { %v3090_v4 = vsel %vm847_vm1, %v3085_v20, 0.0  ;;  %3174 = vmatpush.bf16.msrb.mxu0 %v3154_v19 }
0x18a1   : > { %3091 = vadd.xlane.f32.xlu2 %v3090_v4  ;;  %3076 = vadd.xlane.f32.xlu1 %v3075_v10  ;;  %v3686_v10 = vld [vmem:[%s5452_s17 + $0xb0] sm:$0xff] }
0x18a2   : > { %v3234_v34 = vpack.c.bf16 %v3687_v53, %v3686_v10 }
0x190c   : > { %v3089_v12 = vpop.xlane.xlu1 %3088 }
0x190d   : > { %v3096_v29 = vmul.f32 %v3089_v12, %v4247_v33 }
0x190f   : > { %v3099_v14 = vadd.f32 1e-06, %v3096_v29  ;;  %v3684_v29 = vld [vmem:[%s5452_s17 + $0xa0] sm:$0xff] }
0x1911   : > { %3909 = vrsqrt.f32 %v3099_v14  ;;  %vm3108_vm13 = vweird.f32 %v3099_v14 }
0x1914   : > { %v3092_v21 = vpop.xlane.xlu2 %3091  ;;  %v3077_v23 = vpop.xlane.xlu1 %3076 }
0x1915   : > { %v3097_v43 = vmul.f32 %v3092_v21, %v4247_v33  ;;  %v3080_v48 = vmul.f32 %v3077_v23, %v4247_v33  ;;  %v3682_v21 = vld [vmem:[%s5452_s17 + $0x90] sm:$0xff]  ;;  %v3683_v23 = vld [vmem:[%s5452_s17 + $0x98] sm:$0xff] }
0x1917   : > { %v3910_v49 = vpop.eup %3909  ;;  %v3100_v52 = vadd.f32 1e-06, %v3097_v43  ;;  %v5276_v57 = vsub.f32 %v3064_v39, %v3080_v48  ;;  %v3689_v39 = vld [vmem:[%s5452_s17 + $0xc8] sm:$0xff]  ;;  %v3232_v48 = vpack.c.bf16 %v3683_v23, %v3682_v21  ;;  %v3315_v21 = vld [vmem:[%s5458_s23] sm:$0xff] }
0x1918   : > { %v3103_v59 = vmul.f32 %v3910_v49, %v3099_v14  ;;  %vm3109_vm12 = vweird.f32 %v3910_v49  ;;  %v3233_v14 = vpack.c.bf16 %v3685_v24, %v3684_v29  ;;  %v3293_v29 = vld [vmem:[%s5456_s21 + $0x18] sm:$0xff]  ;;  %v3316_v23 = vld [vmem:[%s5458_s23 + $0x8] sm:$0xff] }
0x1919   : > { %3911 = vrsqrt.f32 %v3100_v52  ;;  %v3086_v61 = vmul.f32 %v5276_v57, %v5276_v57  ;;  %vm3110_vm14 = vmor %vm3108_vm13, %vm3109_vm12  ;;  %vm3118_vm8 = vweird.f32 %v3100_v52 }
0x191a   : > { %v3104_v46 = vmul.f32 %v3910_v49, %v3103_v59 }
0x191b   : > { %v3093_v25 = vsel %vm847_vm1, %v3086_v61, 0.0 }
0x191c   : > { %v3105_v18 = vmul.f32 0.5, %v3104_v46  ;;  %3094 = vadd.xlane.f32.xlu0 %v3093_v25 }
0x191e   : > { %v3106_v41 = vsub.f32 1.5, %v3105_v18 }
0x191f   : > { %v3912_v63 = vpop.eup %3911 }
0x1920   : > { %v3107_v1 = vmul.f32 %v3910_v49, %v3106_v41  ;;  %v3113_v45 = vmul.f32 %v3912_v63, %v3100_v52  ;;  %vm3119_vm15 = vweird.f32 %v3912_v63  ;;  %v3680_v52 = vld [vmem:[%s5452_s17 + $0x80] sm:$0xff] }
0x1921   : > { %vm3120_vm9 = vmor %vm3118_vm8, %vm3119_vm15 }
0x1922   : > { %v3114_v42 = vmul.f32 %v3912_v63, %v3113_v45  ;;  %v3111_v55 = vsel %vm3110_vm14, %v3910_v49, %v3107_v1  ;;  %v3785_v49 = vld [vmem:[%s5451_s16 + $0x1] ss:$0 sm:$0xff] }
0x1923   : > { %v3132_v6 = vmul.f32 %v3111_v55, %v3081_v15  ;;  %v3237_v15 = vpack.c.bf16 %v3693_v3, %v3692_v58 }
0x1924   : > { %v3115_v0 = vmul.f32 0.5, %v3114_v42 }
0x1925   : > { %v3138_v16 = vmul.f32 %v3783_v51, %v3132_v6  ;;  %3240 = vmatpush.bf16.msrb.mxu1 %v3237_v15 }
0x1926   : > { %v3116_v50 = vsub.f32 1.5, %v3115_v0 }
0x1927   : > { %v3144_v26 = vadd.f32 %v3784_v2, %v3138_v16 }
0x1928   : > { %v3117_v7 = vmul.f32 %v3912_v63, %v3116_v50 }
0x1929   : > { %3241 = vmatpush.bf16.msrb.mxu1 %v3236_v9  ;;  %v3786_v9 = vld [vmem:[%s5453_s18 + $0x1] ss:$0 sm:$0xff] }
0x192a   : > { %v3121_v56 = vsel %vm3120_vm9, %v3912_v63, %v3117_v7 }
0x192b   : > { %v3133_v27 = vmul.f32 %v3121_v56, %v3082_v62  ;;  %v3688_v62 = vld [vmem:[%s5452_s17 + $0xc0] sm:$0xff] }
0x192c   : > { %v3235_v35 = vpack.c.bf16 %v3689_v39, %v3688_v62 }
0x192d   : > { %v3139_v32 = vmul.f32 %v3783_v51, %v3133_v27 }
0x192e   : > { %3242 = vmatpush.bf16.msrb.mxu1 %v3235_v35 }
0x192f   : > { %v3145_v5 = vadd.f32 %v3784_v2, %v3139_v32 }
0x1931   : > { %v3152_v47 = vpack.c.bf16 %v3145_v5, %v3144_v26 }
0x1932   : > { %3243 = vmatpush.bf16.msrb.mxu1 %v3234_v34 }
0x1933   : > { %3678 = vmatmul.msk.bf16.vlgmr.msrb.gmra.mxu0 %vm847_vm1, %v3152_v47 }
0x1936   : > { %3244 = vmatpush.bf16.msrb.mxu1 %v3233_v14  ;;  %v3291_v14 = vld [vmem:[%s5456_s21 + $0x8] sm:$0xff] }
0x193a   : > { %3245 = vmatpush.bf16.msrb.mxu1 %v3232_v48  ;;  %v3318_v48 = vpack.c.bf16 %v3316_v23, %v3315_v21 }
0x193c   : > { %3331 = vmatpush.bf16.msrb.mxu3 %v3318_v48 }
0x198f   : > { %v3095_v17 = vpop.xlane.xlu0 %3094 }
0x1990   : > { %v3098_v30 = vmul.f32 %v3095_v17, %v4247_v33 }
0x1992   : > { %v3101_v40 = vadd.f32 1e-06, %v3098_v30 }
0x1994   : > { %3913 = vrsqrt.f32 %v3101_v40  ;;  %vm3128_vm11 = vweird.f32 %v3101_v40 }
0x199a   : > { %v3914_v37 = vpop.eup %3913 }
0x199b   : > { %v3123_v60 = vmul.f32 %v3914_v37, %v3101_v40  ;;  %vm3129_vm10 = vweird.f32 %v3914_v37 }
0x199c   : > { %vm3130_vm0 = vmor %vm3128_vm11, %vm3129_vm10 }
0x199d   : > { %v3124_v31 = vmul.f32 %v3914_v37, %v3123_v60 }
0x199f   : > { %v3125_v22 = vmul.f32 0.5, %v3124_v31 }
0x19a1   : > { %v3126_v20 = vsub.f32 1.5, %v3125_v22 }
0x19a3   : > { %v3127_v4 = vmul.f32 %v3914_v37, %v3126_v20 }
0x19a5   : > { %v3131_v11 = vsel %vm3130_vm0, %v3914_v37, %v3127_v4 }
0x19a6   : > { %v3134_v12 = vmul.f32 %v3131_v11, %v5276_v57  ;;  %v3681_v57 = vld [vmem:[%s5452_s17 + $0x88] sm:$0xff] }
0x19a7   : > { %v3231_v61 = vpack.c.bf16 %v3681_v57, %v3680_v52 }
0x19a8   : > { %v3140_v13 = vmul.f32 %v3783_v51, %v3134_v12 }
0x19a9   : > { %3246 = vmatpush.bf16.msrb.mxu1 %v3231_v61 }
0x19aa   : > { %v3146_v19 = vadd.f32 %v3784_v2, %v3140_v13  ;;  %v3290_v13 = vld [vmem:[%s5456_s21] sm:$0xff] }
0x19ac   : > { %v3153_v43 = vpack.c.bf16 %v3146_v19, %v3146_v19  ;;  %v3295_v19 = vpack.c.bf16 %v3291_v14, %v3290_v13 }
0x19ae   : > { %3679 = vmatmul.msk.bf16.gmra.mxu0 %vm847_vm1, %v3153_v43 }
0x19b0   : > { %v3176_v59 = vpop.f32.mrf.mxu0 }
0x19b1   : > { %v3177_v46 = vadd.f32 %v3785_v49, %v3176_v59 }
0x19b3   : > { %v3185_v25 = vmul.f32 %v3177_v46, %v3177_v46 }
0x19b5   : > { %v3188_v18 = vmul.f32 %v3185_v25, %v3177_v46 }
0x19b7   : > { %v3191_v41 = vmul.f32 0.044715, %v3188_v18 }
0x19b8   : > { %v3178_v63 = vpop.f32.mrf.mxu0 }
0x19b9   : > { %v3194_v1 = vadd.f32 %v3191_v41, %v3177_v46  ;;  %v3179_v45 = vadd.f32 %v3785_v49, %v3178_v63  ;;  %v3262_v41 = vld [vmem:[%s5454_s19] sm:$0x1] }
0x19bb   : > { %v3197_v42 = vmul.f32 0.7978846, %v3194_v1  ;;  %v3186_v55 = vmul.f32 %v3179_v45, %v3179_v45 }
0x19bd   : > { %v3189_v0 = vmul.f32 %v3186_v55, %v3179_v45  ;;  %3915 = vtanh.f32 %v3197_v42 }
0x19bf   : > { %v3192_v50 = vmul.f32 0.044715, %v3189_v0  ;;  %v3297_v0 = vld [vmem:[%s5544_s27] sm:$0x1] }
0x19c1   : > { %v3195_v51 = vadd.f32 %v3192_v50, %v3179_v45 }
0x19c3   : > { %v3198_v6 = vmul.f32 0.7978846, %v3195_v51  ;;  %v3916_v7 = vpop.eup %3915 }
0x19c4   : > { %v3203_v56 = vadd.f32 1.0, %v3916_v7 }
0x19c5   : > { %3917 = vtanh.f32 %v3198_v6 }
0x19c6   : > { %v3206_v16 = vmul.f32 0.5, %v3203_v56 }
0x19c8   : > { %v3209_v26 = vmul.f32 %v3206_v16, %v3177_v46 }
0x19cb   : > { %v3918_v2 = vpop.eup %3917 }
0x19cc   : > { %v3204_v27 = vadd.f32 1.0, %v3918_v2 }
0x19ce   : > { %v3207_v32 = vmul.f32 0.5, %v3204_v27 }
0x19d0   : > { %v3210_v5 = vmul.f32 %v3207_v32, %v3179_v45 }
0x19d2   : > { %v3229_v47 = vpack.c.bf16 %v3210_v5, %v3209_v26 }
0x19d4   : > { %3247 = vmatmul.bf16.vlgmr.msrb.gmra.mxu1 %v3229_v47 }
0x1a2b   : > { %v3181_v17 = vpop.f32.mrf.mxu0 }
0x1a2c   : > { %v3182_v30 = vadd.f32 %v3785_v49, %v3181_v17 }
0x1a2e   : > { %v3187_v40 = vmul.f32 %v3182_v30, %v3182_v30 }
0x1a30   : > { %v3190_v54 = vmul.f32 %v3187_v40, %v3182_v30 }
0x1a32   : > { %v3193_v36 = vmul.f32 0.044715, %v3190_v54 }
0x1a33   : > { %v3183_v28 = vpop.f32.mrf.mxu0 }
0x1a34   : > { %v3196_v58 = vadd.f32 %v3193_v36, %v3182_v30 }
0x1a36   : > { %v3199_v3 = vmul.f32 0.7978846, %v3196_v58 }
0x1a38   : > { %3919 = vtanh.f32 %v3199_v3 }
0x1a3e   : > { %v3920_v15 = vpop.eup %3919 }
0x1a3f   : > { %v3205_v37 = vadd.f32 1.0, %v3920_v15 }
0x1a41   : > { %v3208_v60 = vmul.f32 0.5, %v3205_v37 }
0x1a43   : > { %v3211_v44 = vmul.f32 %v3208_v60, %v3182_v30 }
0x1a45   : > { %v3230_v38 = vpack.c.bf16 %v3211_v44, %v3211_v44 }
0x1a47   : > { %3251 = vmatmul.bf16.gmra.mxu1 %v3230_v38 }
0x1a51   : > { %v3248_v31 = vpop.f32.mrf.mxu1 }
0x1a52   : > { %v3255_v22 = vadd.f32 %v3248_v31, %v5246_v8  ;;  %v3292_v8 = vld [vmem:[%s5456_s21 + $0x10] sm:$0xff] }
0x1a53   : > { %v3296_v24 = vpack.c.bf16 %v3293_v29, %v3292_v8 }
0x1a54   : > { %v3261_v62 = vadd.f32 %v3786_v9, %v3255_v22 }
0x1a55   : > { %3307 = vmatpush.bf16.msrb.mxu2 %v3296_v24 }
0x1a56   : > { %v3265_v39 = vsel %vm3264_vm2, %v3261_v62, 0.0 }
0x1a57   : > { %3266 = vadd.xlane.f32.xlu2 %v3265_v39 }
0x1a59   : > { %v3250_v35 = vpop.f32.mrf.mxu1  ;;  %3308 = vmatpush.bf16.msrb.mxu2 %v3295_v19 }
0x1ac4   : > { %v3252_v20 = vpop.f32.mrf.mxu1 }
0x1aca   : > { %v3267_v4 = vpop.xlane.xlu2 %3266 }
0x1acb   : > { %v3268_v10 = vmul.f32 %v3267_v4, %v4247_v33 }
0x1acc   : > { %v3253_v53 = vpop.f32.mrf.mxu1 }
0x1acd   : > { %v3269_v34 = vsub.f32 %v3261_v62, %v3268_v10 }
0x1acf   : > { %v3270_v11 = vmul.f32 %v3269_v34, %v3269_v34 }
0x1ad1   : > { %v3271_v12 = vsel %vm3264_vm2, %v3270_v11, 0.0 }
0x1ad2   : > { %3272 = vadd.xlane.f32.xlu1 %v3271_v12 }
0x1b45   : > { %v3273_v43 = vpop.xlane.xlu1 %3272 }
0x1b46   : > { %v3274_v49 = vmul.f32 %v3273_v43, %v4247_v33  ;;  %v3263_v33 = vld [vmem:[%s5542_s6] sm:$0x1]  ;;  %s5547_s6 = smov %s5546_s28 }
0x1b47   : > { %s3943_s12 = scalar_lea.hbm %s5547_s6, 2  ;;  %p3944_p0 = scmp.lt.s32.totalorder %s3938_s11, %s5547_s6 }
0x1b48   : > { %v3275_v52 = vadd.f32 1e-06, %v3274_v49  ;;  %p3945_p1 = scmp.lt.s32.totalorder %s3943_s12, %s3939_s1 }
0x1b4a   : > { %3921 = vrsqrt.f32 %v3275_v52  ;;  %vm3282_vm4 = vweird.f32 %v3275_v52  ;;  %p3946_p2 = por %p3945_p1, %p3944_p0 }
0x1b4c   : > { %p3947_p3 = pnand %p3946_p2, %p3942_p13 }
0x1b50   : > { %v3922_v57 = vpop.eup %3921 }
0x1b51   : > { %v3277_v59 = vmul.f32 %v3922_v57, %v3275_v52  ;;  %vm3283_vm3 = vweird.f32 %v3922_v57 }
0x1b52   : > { %vm3284_vm5 = vmor %vm3282_vm4, %vm3283_vm3 }
0x1b53   : > { %v3278_v61 = vmul.f32 %v3922_v57, %v3277_v59 }
0x1b55   : > { %v3279_v46 = vmul.f32 0.5, %v3278_v61 }
0x1b57   : > { %v3280_v25 = vsub.f32 1.5, %v3279_v46 }
0x1b59   : > { %v3281_v18 = vmul.f32 %v3922_v57, %v3280_v25 }
0x1b5b   : > { %v3285_v63 = vsel %vm3284_vm5, %v3922_v57, %v3281_v18 }
0x1b5c   : > { %v3286_v1 = vmul.f32 %v3285_v63, %v3269_v34 }
0x1b5e   : > { %v3287_v45 = vmul.f32 %v3286_v1, %v3262_v41 }
0x1b60   : > { %v3288_v42 = vadd.f32 %v3287_v45, %v3263_v33 }
0x1b62   : > { %v3294_v55 = vpack.c.bf16 %v3288_v42, %v3288_v42  ;;  %3289 = vst.msk [vmem:[%s787_s9] sm:$0x1] %vm3264_vm2, %v3288_v42 }
0x1b64   : > { %3697 = vmatmul.msk.bf16.vlgmr.msrb.gmra.mxu2 %vm847_vm1, %v3294_v55 }
0x1be7   : > { %v3310_v50 = vpop.f32.mrf.mxu2 }
0x1be8   : > { %v3311_v51 = vadd.f32 %v3310_v50, %v3297_v0 }
0x1bea   : > { %v3314_v6 = vmax.f32 %v3311_v51, 0.0 }
0x1bec   : > { %v3317_v7 = vpack.c.bf16 %v3314_v6, %v3314_v6 }
0x1bee   : > { %3698 = vmatmul.msk.bf16.vlgmr.msrb.gmra.mxu3 %vm3320_vm6, %v3317_v7 }
0x1bef   : > { %v3312_v56 = vpop.f32.mrf.mxu2 }
0x1bf0   : > { %3950 = shalt.err (!%p3947_p3)
}
0x1bf1   : > { %3704 = dma.vmem_to_hbm [thread:$0]  (%p4193_p5), %s3354_s5, 16, %s3356_s8, %s3339_s10  }
0x1bf2   : > { %s5548_s7 = sld [smem:[#allocation36_spill]]  ;;  %s793_s11 = scalar_lea.vmem [#allocation4], %s5372_s22 }
0x1bf3   : > { %s5550_s15 = sld [smem:[#allocation34_spill]]  ;;  %s3366_s12 = sshll.u32 %s793_s11, 4  ;;  %s3367_s12 = int_to_ptr.vmem [resolvable:$true] %s3366_s12 }
0x1bf4   : > { %s3343_s14 = scalar_lea.sflag [#allocation5], %s5372_s22 }
0x1bf8   : > { %s5549_s2 = smov %s5548_s7  ;;  %s3364_s28 = scalar_lea.hbm %s5548_s7, %s5543_s4 }
0x1bf9   : > { %v3319_v2 = vld [vmem:[%s5550_s15] sm:$0x1]  ;;  %s3368_s13 = sshll.u32 %s3364_s28, 4  ;;  %s3971_s15 = scalar_lea.hbm %s5549_s2, 2  ;;  %s3369_s13 = int_to_ptr.hbm [resolvable:$true] %s3368_s13 }
0x1bfa   : > { %s3965_s8 = sshra.s32 %s3369_s13, 4  ;;  %s3966_s8 = int_to_ptr.hbm [resolvable:$true] %s3965_s8 }
0x1bfb   : > { %s3967_s5 = scalar_lea.hbm %s3966_s8, 1  ;;  %p3972_p9 = scmp.lt.s32.totalorder %s3966_s8, %s5549_s2 }
0x1bfc   : > { %p3968_p4 = scmp.ne.s32.totalorder %s3966_s8, %s3967_s5  ;;  %p3973_p10 = scmp.lt.s32.totalorder %s3971_s15, %s3967_s5 }
0x1bfe   : > { %p3969_p7 = pnand %p3968_p4, %p4193_p5  ;;  %p3974_p11 = por %p3973_p10, %p3972_p9 }
0x1c00   : > { %p3970_p8 = pneg %p3969_p7 }
0x1c02   : > { %p3975_p12 = pnand %p3974_p11, %p3970_p8 }
0x1c71   : > { %v3333_v16 = vpop.f32.mrf.mxu3 }
0x1c72   : > { %v3334_v27 = vadd.f32 %v3333_v16, %v3319_v2 }
0x1c74   : > { %3337 = vst.msk [vmem:[%s793_s11] sm:$0x1] %vm3264_vm2, %v3334_v27 }
0x1c75   : > { %3978 = shalt.err (!%p3975_p12)
}
0x1c76   : > { %3705 = dma.vmem_to_hbm [thread:$0]  (%p4193_p5), %s3367_s12, 16, %s3369_s13, %s3343_s14  }
0x1c79   : > { %v3335_v32 = vpop.f32.mrf.mxu3 }
0x1c7a PF: > { %s5551_s22 = sld [smem:[#allocation10_spill]] }
0x1c7b   : > { %s5552_s9 = sld [smem:[#allocation8_spill]] }
0x1c80   : > { %p3715_p13 = scmp.ge.s32.totalorder %s5551_s22, 2 }
0x1c81   : > { %s3380_s28 = sand.u32 1, %s5552_s9  }
0x1c82   : > { %p3709_p0 = pnand %p3715_p13, %p4197_p6  ;;  %s3381_s25 = scalar_lea.sflag [#allocation3], %s3380_s28 }
0x1c84   : > { %p3710_p1 = pneg %p3709_p0 }
0x1c86   : > { %3996 = dma.done.wait (%p3710_p1), %s3381_s25, 16  }
0x1c87   : > { %3998 = vsyncadd (%p3710_p1), %s3381_s25, 4294967280  ;;  %s3390_s27 = scalar_lea.sflag [#allocation5], %s3380_s28 }
0x1c88   : > { %4000 = dma.done.wait (%p3710_p1), %s3390_s27, 16  }
0x1c89   : > { %4002 = vsyncadd (%p3710_p1), %s3390_s27, 4294967280  ;;  %s5554_s28 = sld [smem:[#allocation12_spill]]  ;;  %s5557_s27 = smov %s4009_s3 }
0x1c8a   : > { %s5555_s20 = sld [smem:[#allocation9_spill]] }
0x1c8b   : > { %s5556_s7 = sld [smem:[#allocation13_spill]] }
0x1c8f   : > { %p40_p5 = scmp.ge.s32.totalorder %s5554_s28, 4  }
0x1c90   : > { %s5558_s3 = smov %s5555_s20 }
0x1c91   :  { %42 = sbr.rel (!%p40_p5) target bundleno = 27 (0x1b), region = 230 }
0x1c96   :  { %3395 = vsyncpa [#allocation3], 1 }
0x1c97   :  { %3397 = vsyncpa [#allocation3 + $0x1], 1 }
0x1c98   :  { %3398 = vsyncpa [#allocation5], 1 }
0x1c99   :  { %3400 = vsyncpa [#allocation5 + $0x1], 1 }

</bundles_post_ra>
